<compile_context>
chip_gen: v6e
topology: v6e:2x2x1
jax: 0.10.0
libtpu: 0.0.40
codegen_flags: <defaults>
</compile_context>

<pallas_src>
import functools

import jax
import jax.numpy as jnp
from jax.experimental import pallas as pl
from jax.experimental.pallas import tpu as pltpu

HIDDEN = 64            # H
INPUT_SIZE = 5
V = 3                  # sequence length after the view/transpose
OUT_CHANNEL = 2
OUT_PAD = 128          # lane-dense padded output width
GW = 8 * HIDDEN        # merged (both-direction) gate width = 512
BT_ALIGN = 16          # batch-tile alignment (bf16 output tile sublane = 16)


def _round_up(n, m):
    return ((n + m - 1) // m) * m


def _cdiv(a, b):
    return -(-a // b)


def _default_nonlin_bf16():
    """bf16 EUP/VPU exists on v6e/v7x; keep nonlinearities f32 on v5e and older."""
    try:
        kind = jax.devices()[0].device_kind.lower()
        return any(tag in kind for tag in ("v6", "v7", "7x"))
    except Exception:
        return False


# ---------------------------------------------------------------------------
# Kernel
# ---------------------------------------------------------------------------
def bilstm_kernel(x_ref, w0_ref, whh0_ref, whh1_ref, w1in_ref, w1p_ref,
                  b1_ref, w2_ref, b2_ref, out_ref, *, nonlin_dtype):
    """One batch tile of the full BiLSTM forward.

    Merged gate column layout (width 8H = 512), per recurrence step:
        [ i_fwd | i_rev | f_fwd | f_rev | o_fwd | o_rev | g_fwd | g_rev ]
    so the sigmoid covers [0:6H] (384 lanes) and tanh covers [6H:8H] (128 lanes),
    all 128-lane aligned.  State layout: h/c = [fwd(0:H) | rev(H:2H)].
    """
    H = HIDDEN
    bt = x_ref.shape[0]
    f32 = jnp.float32
    bf16 = jnp.bfloat16

    def cell(gates, c):
        # gates: (bt, 8H) f32 pre-activations in the merged layout above.
        g_nl = gates.astype(nonlin_dtype)
        # sigmoid(x) = 0.5*tanh(0.5*x) + 0.5  -> single EUP push per vreg (no exp+divide).
        sig = (jnp.tanh(g_nl[:, 0:6 * H] * 0.5) * 0.5 + 0.5).astype(f32)   # [i | f | o]
        i = sig[:, 0:2 * H]
        f = sig[:, 2 * H:4 * H]
        o = sig[:, 4 * H:6 * H]
        g = jnp.tanh(g_nl[:, 6 * H:8 * H]).astype(f32)                     # 128-wide
        c_new = f * c + i * g                                              # f32 state
        h_new = o * jnp.tanh(c_new.astype(nonlin_dtype)).astype(f32)
        return h_new, c_new

    x = x_ref[...].astype(bf16)                                   # (bt, 15)

    # Layer-0 input->gate pre-activations for every step & both directions: ONE matmul.
    # Column block s already pairs (fwd input @ t=s) with (rev input @ t=V-1-s).
    g0_all = jnp.dot(x, w0_ref[...], preferred_element_type=f32)  # (bt, V*8H)

    zeros_hc = jnp.zeros((bt, 2 * H), f32)

    # ---------------- layer 0: fwd/rev in lockstep, block-diagonal recurrence -------------
    whh0 = whh0_ref[...]                                          # (2H, 8H) bf16
    h0, c0 = zeros_hc, zeros_hc
    h0_steps = []                                                 # step s -> [h_fwd(t=s)|h_rev(t=V-1-s)]
    for s in range(V):
        gates = g0_all[:, s * GW:(s + 1) * GW]
        if s > 0:                                                 # h0 == 0 at s == 0
            gates = gates + jnp.dot(h0.astype(bf16), whh0, preferred_element_type=f32)
        h0, c0 = cell(gates, c0)
        h0_steps.append(h0.astype(bf16))                          # store bf16 (only consumed as bf16)

    # ---------------- layer 1: input->gate contributions batched OUTSIDE the recurrence ---
    h0_all = jnp.concatenate(h0_steps, axis=-1)                   # (bt, 6H) bf16
    g1_all = jnp.dot(h0_all, w1in_ref[...], preferred_element_type=f32)    # (bt, V*8H)

    whh1 = whh1_ref[...]                                          # (2H, 8H) bf16
    w1p = w1p_ref[...]                                            # (V*2H, 4H) bf16 (step-ordered rows)
    h1, c1 = zeros_hc, zeros_hc
    acc = jnp.zeros((bt, 4 * H), f32)                             # fused linear1 accumulator
    for s in range(V):
        gates = g1_all[:, s * GW:(s + 1) * GW]
        if s > 0:                                                 # h1 == 0 at s == 0
            gates = gates + jnp.dot(h1.astype(bf16), whh1, preferred_element_type=f32)
        h1, c1 = cell(gates, c1)
        out_t = jnp.tanh(h1.astype(nonlin_dtype)).astype(bf16)    # (bt, 2H)
        acc = acc + jnp.dot(out_t, w1p[s * 2 * H:(s + 1) * 2 * H, :],
                            preferred_element_type=f32)

    # ---------------- linear1 bias + ReLU, linear2 (output padded to 128 lanes, bf16) -----
    hidden = jnp.maximum(acc + b1_ref[...], 0.0)                  # (bt, 4H)
    logits = jnp.dot(hidden.astype(bf16), w2_ref[...],
                     preferred_element_type=f32) + b2_ref[...]    # (bt, OUT_PAD)
    out_ref[...] = logits.astype(out_ref.dtype)


# ---------------------------------------------------------------------------
# Weight preparation (trace-time, tiny arrays)
# ---------------------------------------------------------------------------
def _place_gates(w_t, d):
    """Scatter a pre-transposed (in, 4H) weight with PyTorch gate order [i|f|g|o]
    into the merged bidirectional layout (in, 8H):
        [i_f i_r | f_f f_r | o_f o_r | g_f g_r],  d=0 -> fwd slots, d=1 -> rev slots."""
    H = HIDDEN
    out = jnp.zeros((w_t.shape[0], 8 * H), w_t.dtype)
    for k, base in ((0, 0), (1, 2 * H), (2, 6 * H), (3, 4 * H)):   # i, f, g, o
        out = out.at[:, base + d * H: base + (d + 1) * H].set(w_t[:, k * H:(k + 1) * H])
    return out


def prepare_weights(params):
    H = HIDDEN
    f32, bf16 = jnp.float32, jnp.bfloat16

    wih0 = params["wih0"].astype(f32)   # (2, 5, 4H)
    whh0 = params["whh0"].astype(f32)   # (2, H, 4H)
    wih1 = params["wih1"].astype(f32)   # (2, 2H, 4H)
    whh1 = params["whh1"].astype(f32)   # (2, H, 4H)

    # ---- layer-0 batched input weight: folds view(-1,5,3).transpose(1,2) AND the
    #      fwd(t=s)/rev(t=V-1-s) lockstep pairing.  x_flat[:, f*V + t] == x[t, f].
    wih0_f = _place_gates(wih0[0], 0)   # (5, 8H), fwd columns
    wih0_r = _place_gates(wih0[1], 1)   # (5, 8H), rev columns
    w0_big = jnp.zeros((INPUT_SIZE * V, V * GW), f32)
    for s in range(V):
        for f in range(INPUT_SIZE):
            w0_big = w0_big.at[f * V + s,           s * GW:(s + 1) * GW].add(wih0_f[f])
            w0_big = w0_big.at[f * V + (V - 1 - s), s * GW:(s + 1) * GW].add(wih0_r[f])

    # ---- block-diagonal recurrent weights: [h_fwd | h_rev] @ (2H, 8H)
    whh0_bd = jnp.concatenate([_place_gates(whh0[0], 0),
                               _place_gates(whh0[1], 1)], axis=0)       # (2H, 8H)
    whh1_bd = jnp.concatenate([_place_gates(whh1[0], 0),
                               _place_gates(whh1[1], 1)], axis=0)       # (2H, 8H)

    # ---- layer-1 batched input weight.  h0_all columns 2H*s' : 2H*(s'+1) hold
    #      [h0_fwd(t=s') | h0_rev(t=V-1-s')];  output column block s is the layer-1
    #      lockstep-step-s input->gate pre-activation (fwd cell @ t=s, rev cell @ t=V-1-s).
    wih1_f = _place_gates(wih1[0], 0)   # (2H, 8H)
    wih1_r = _place_gates(wih1[1], 1)
    w1_in = jnp.zeros((V * 2 * H, V * GW), f32)
    for s in range(V):
        col = slice(s * GW, (s + 1) * GW)
        # fwd cell @ t=s : input = [h0_fwd(t=s), h0_rev(t=s)]
        w1_in = w1_in.at[2 * H * s:           2 * H * s + H,            col].add(wih1_f[0:H])
        w1_in = w1_in.at[2 * H * (V - 1 - s) + H: 2 * H * (V - 1 - s) + 2 * H, col].add(wih1_f[H:2 * H])
        # rev cell @ t=V-1-s : input = [h0_fwd(t=V-1-s), h0_rev(t=V-1-s)]
        w1_in = w1_in.at[2 * H * (V - 1 - s):  2 * H * (V - 1 - s) + H,  col].add(wih1_r[0:H])
        w1_in = w1_in.at[2 * H * s + H:        2 * H * s + 2 * H,        col].add(wih1_r[H:2 * H])

    # ---- linear1 weight permuted into per-step chunks matching the lockstep layer-1 outputs
    #      (kernel step s produces [h1_fwd(t=s) | h1_rev(t=V-1-s)]).
    w1 = params["w1"].astype(f32)       # (V*2H, 4H), rows in PyTorch time-major flat order
    chunks = []
    for s in range(V):
        chunks.append(jnp.concatenate(
            [w1[s * 2 * H: s * 2 * H + H],                                    # timestep s, fwd half
             w1[(V - 1 - s) * 2 * H + H:(V - 1 - s) * 2 * H + 2 * H]],        # timestep V-1-s, rev half
            axis=0))
    w1_perm = jnp.concatenate(chunks, axis=0)                                 # (V*2H, 4H)

    # ---- linear2 padded to a lane-dense 128-wide output
    w2 = params["w2"].astype(f32)                                             # (4H, 2)
    w2_pad = jnp.zeros((4 * H, OUT_PAD), f32).at[:, :OUT_CHANNEL].set(w2)
    b2_pad = jnp.zeros((1, OUT_PAD), f32).at[:, :OUT_CHANNEL].set(params["b2"].astype(f32))

    return dict(
        w0_big=w0_big.astype(bf16),
        whh0_bd=whh0_bd.astype(bf16),
        whh1_bd=whh1_bd.astype(bf16),
        w1_in=w1_in.astype(bf16),
        w1_perm=w1_perm.astype(bf16),
        b1=params["b1"].astype(f32),
        w2_pad=w2_pad.astype(bf16),
        b2_pad=b2_pad,
    )


# ---------------------------------------------------------------------------
# Wrapper
# ---------------------------------------------------------------------------
def bilstm_forward(x, params, *, block_b=256, nonlin_bf16=None):
    """x: any array reshapeable to (B, 15) (matches torch x.view(-1, 5, 3))."""
    H = HIDDEN
    if nonlin_bf16 is None:
        nonlin_bf16 = _default_nonlin_bf16()
    nonlin_dtype = jnp.bfloat16 if nonlin_bf16 else jnp.float32

    w = prepare_weights(params)

    x2 = x.reshape(-1, INPUT_SIZE * V).astype(jnp.float32)        # (B, 15); transpose folded into w0_big
    B = x2.shape[0]

    # Batch tiling: large tiles (>=256 rows fill the 256-wide MXU on v6e/v7x and amortize
    # the ~0.35us/step pipeline overhead), but keep >= 2 grid steps whenever the batch
    # allows it so the "parallel" axis actually splits across v7x's two TensorCores.
    b8 = _round_up(max(B, 1), BT_ALIGN)
    n_steps = _cdiv(b8, block_b)
    if b8 > BT_ALIGN:
        n_steps = max(n_steps, 2)
    bt = _round_up(_cdiv(b8, n_steps), BT_ALIGN)                  # balanced tile
    b_pad = _round_up(b8, bt)
    if b_pad != B:
        x2 = jnp.pad(x2, ((0, b_pad - B), (0, 0)))

    weights = (w["w0_big"], w["whh0_bd"], w["whh1_bd"], w["w1_in"],
               w["w1_perm"], w["b1"], w["w2_pad"], w["b2_pad"])

    batch_map = lambda i: (i, 0)
    const_map = lambda i: (0, 0)                                  # weights stay resident across steps

    in_specs = [pl.BlockSpec((bt, INPUT_SIZE * V), batch_map)]
    in_specs += [pl.BlockSpec(tuple(wt.shape), const_map) for wt in weights]

    # Rough cost hint for the XLA scheduler.
    flops_per_row = 2 * (INPUT_SIZE * V * V * 8 * H      # batched layer-0 input matmul
                         + (V - 1) * 2 * H * 8 * H       # layer-0 merged recurrence
                         + V * 2 * H * V * 8 * H         # batched layer-1 input matmul
                         + (V - 1) * 2 * H * 8 * H       # layer-1 merged recurrence
                         + V * 2 * H * 4 * H             # per-step linear1 accumulation
                         + 4 * H * OUT_PAD)              # padded linear2
    trans_per_row = 2 * V * (6 * H + 2 * H + 2 * H) + V * 2 * H
    weight_bytes = sum(int(wt.size) * wt.dtype.itemsize for wt in weights)
    cost = pl.CostEstimate(
        flops=b_pad * flops_per_row,
        transcendentals=b_pad * trans_per_row,
        bytes_accessed=b_pad * (INPUT_SIZE * V * 4 + OUT_PAD * 2) + weight_bytes,
    )

    out = pl.pallas_call(
        functools.partial(bilstm_kernel, nonlin_dtype=nonlin_dtype),
        out_shape=jax.ShapeDtypeStruct((b_pad, OUT_PAD), jnp.bfloat16),   # bf16 slab halves writeback
        grid=(b_pad // bt,),
        in_specs=in_specs,
        out_specs=pl.BlockSpec((bt, OUT_PAD), batch_map),
        compiler_params=pltpu.CompilerParams(
            dimension_semantics=("parallel",),
            vmem_limit_bytes=32 * 1024 * 1024),          # raise v5e's 16MiB default; v7x headroom ok
        cost_estimate=cost,
    )(x2, *weights)

    return out[:B, :OUT_CHANNEL].astype(jnp.float32)


# ---------------------------------------------------------------------------
# Parameter init (mirrors PyTorch shapes; LSTM weights stored pre-transposed (in, 4H),
# gate order i,f,g,o; stacked over direction: dim 0 = forward, 1 = reverse)
# ---------------------------------------------------------------------------
def init_params(key):
    ks = jax.random.split(key, 8)
    k_lstm = 1.0 / jnp.sqrt(HIDDEN)

    def u(k, shape, scale):
        return jax.random.uniform(k, shape, jnp.float32, -scale, scale)

    return {
        "wih0": u(ks[0], (2, INPUT_SIZE, 4 * HIDDEN), k_lstm),
        "whh0": u(ks[1], (2, HIDDEN, 4 * HIDDEN), k_lstm),
        "wih1": u(ks[2], (2, 2 * HIDDEN, 4 * HIDDEN), k_lstm),
        "whh1": u(ks[3], (2, HIDDEN, 4 * HIDDEN), k_lstm),
        "w1": u(ks[4], (V * 2 * HIDDEN, 4 * HIDDEN), 1.0 / jnp.sqrt(V * 2 * HIDDEN)),
        "b1": u(ks[5], (1, 4 * HIDDEN), 1.0 / jnp.sqrt(V * 2 * HIDDEN)),
        "w2": u(ks[6], (4 * HIDDEN, OUT_CHANNEL), 1.0 / jnp.sqrt(4 * HIDDEN)),
        "b2": u(ks[7], (1, OUT_CHANNEL), 1.0 / jnp.sqrt(4 * HIDDEN)),
    }


# ---------------------------------------------------------------------------
# Pure-JAX reference (mirrors the PyTorch module) for a correctness spot-check
# ---------------------------------------------------------------------------
def bilstm_reference(x, params):
    x3 = jnp.transpose(x.reshape(-1, INPUT_SIZE, V), (0, 2, 1))   # (B, V, 5)
    B = x3.shape[0]
    H = HIDDEN

    def cell(x_t, h, c, w_ih_t, w_hh_t):
        gates = x_t @ w_ih_t + h @ w_hh_t
        i = jax.nn.sigmoid(gates[:, 0:H])
        f = jax.nn.sigmoid(gates[:, H:2 * H])
        g = jnp.tanh(gates[:, 2 * H:3 * H])
        o = jax.nn.sigmoid(gates[:, 3 * H:4 * H])
        c = f * c + i * g
        return o * jnp.tanh(c), c

    def bidir(seq, wih, whh):
        T = len(seq)
        h = jnp.zeros((B, H)); c = jnp.zeros((B, H)); fwd = []
        for t in range(T):
            h, c = cell(seq[t], h, c, wih[0], whh[0]); fwd.append(h)
        h = jnp.zeros((B, H)); c = jnp.zeros((B, H)); bwd = [None] * T
        for t in reversed(range(T)):
            h, c = cell(seq[t], h, c, wih[1], whh[1]); bwd[t] = h
        return [jnp.concatenate([fwd[t], bwd[t]], axis=-1) for t in range(T)]

    o0 = bidir([x3[:, t, :] for t in range(V)], params["wih0"], params["whh0"])
    o1 = bidir(o0, params["wih1"], params["whh1"])
    flat = jnp.concatenate([jnp.tanh(o) for o in o1], axis=-1)
    h1 = jnp.maximum(flat @ params["w1"] + params["b1"], 0.0)
    return h1 @ params["w2"] + params["b2"]


if __name__ == "__main__":
    key = jax.random.PRNGKey(0)
    k_x, k_p = jax.random.split(key)

    B = 20                                                         # exercises padding + a 2-step grid
    x = jax.random.normal(k_x, (B, INPUT_SIZE * V), jnp.float32)   # views to (-1, 5, 3)
    params = init_params(k_p)

    out = bilstm_forward(x, params)
    out = jax.block_until_ready(out)
    assert out.shape == (B, OUT_CHANNEL), out.shape

    ref = bilstm_reference(x, params)
    err = float(jnp.max(jnp.abs(out - ref)))
    assert err < 0.1, f"max abs error vs reference: {err}"

    print("KERNEL_OK")
</pallas_src>

<mosaic_0001>
module attributes {stable_mosaic.version = 11 : i64} {
  func.func @bilstm_kernel(%arg0: i32, %arg1: memref<16x15xf32, #tpu.memory_space<vmem>>, %arg2: memref<15x1536xbf16, #tpu.memory_space<vmem>>, %arg3: memref<128x512xbf16, #tpu.memory_space<vmem>>, %arg4: memref<128x512xbf16, #tpu.memory_space<vmem>>, %arg5: memref<384x1536xbf16, #tpu.memory_space<vmem>>, %arg6: memref<384x256xbf16, #tpu.memory_space<vmem>>, %arg7: memref<1x256xf32, #tpu.memory_space<vmem>>, %arg8: memref<256x128xbf16, #tpu.memory_space<vmem>>, %arg9: memref<1x128xf32, #tpu.memory_space<vmem>>, %arg10: memref<16x128xbf16, #tpu.memory_space<vmem>>) attributes {dimension_semantics = [#tpu.dimension_semantics<parallel>], iteration_bounds = array<i64: 2>, scalar_prefetch = 0 : i64, scratch_operands = 0 : i64, tpu.core_type = #tpu.core_type<tc>, window_params = [{transform_indices = @transform_0, window_bounds = array<i64: 16, 15>}, {pipeline_mode = #tpu.pipeline_mode<synchronous>, transform_indices = @transform_1, window_bounds = array<i64: 15, 1536>}, {pipeline_mode = #tpu.pipeline_mode<synchronous>, transform_indices = @transform_2, window_bounds = array<i64: 128, 512>}, {pipeline_mode = #tpu.pipeline_mode<synchronous>, transform_indices = @transform_3, window_bounds = array<i64: 128, 512>}, {pipeline_mode = #tpu.pipeline_mode<synchronous>, transform_indices = @transform_4, window_bounds = array<i64: 384, 1536>}, {pipeline_mode = #tpu.pipeline_mode<synchronous>, transform_indices = @transform_5, window_bounds = array<i64: 384, 256>}, {pipeline_mode = #tpu.pipeline_mode<synchronous>, transform_indices = @transform_6, window_bounds = array<i64: 1, 256>}, {pipeline_mode = #tpu.pipeline_mode<synchronous>, transform_indices = @transform_7, window_bounds = array<i64: 256, 128>}, {pipeline_mode = #tpu.pipeline_mode<synchronous>, transform_indices = @transform_8, window_bounds = array<i64: 1, 128>}, {transform_indices = @transform_9, window_bounds = array<i64: 16, 128>}]} {
    %c0 = arith.constant 0 : index
    %c0_0 = arith.constant 0 : index
    %0 = vector.load %arg1[%c0, %c0_0] : memref<16x15xf32, #tpu.memory_space<vmem>>, vector<16x15xf32>
    %1 = arith.truncf %0 : vector<16x15xf32> to vector<16x15xbf16>
    %c0_1 = arith.constant 0 : index
    %c0_2 = arith.constant 0 : index
    %2 = vector.load %arg2[%c0_1, %c0_2] : memref<15x1536xbf16, #tpu.memory_space<vmem>>, vector<15x1536xbf16>
    %cst = arith.constant dense<0.000000e+00> : vector<16x1536xf32>
    %3 = tpu.matmul %1, %2, %cst {dimension_numbers = #tpu.dot_dimension_numbers<[1], [0], [0], [1], [0, 0, 1, 1], [], []>} : vector<16x15xbf16>, vector<15x1536xbf16>, vector<16x1536xf32> -> vector<16x1536xf32>
    %cst_3 = arith.constant 0.000000e+00 : f32
    %4 = vector.broadcast %cst_3 : f32 to vector<16x128xf32>
    %c0_4 = arith.constant 0 : index
    %c0_5 = arith.constant 0 : index
    %5 = vector.load %arg3[%c0_4, %c0_5] : memref<128x512xbf16, #tpu.memory_space<vmem>>, vector<128x512xbf16>
    %6 = vector.extract_strided_slice %3 {offsets = [0, 0], sizes = [16, 512], strides = [1, 1]} : vector<16x1536xf32> to vector<16x512xf32>
    %7 = vector.extract_strided_slice %6 {offsets = [0, 0], sizes = [16, 384], strides = [1, 1]} : vector<16x512xf32> to vector<16x384xf32>
    %cst_6 = arith.constant 5.000000e-01 : f32
    %8 = vector.broadcast %cst_6 : f32 to vector<16x384xf32>
    %9 = arith.mulf %7, %8 : vector<16x384xf32>
    %10 = math.tanh %9 : vector<16x384xf32>
    %cst_7 = arith.constant 5.000000e-01 : f32
    %11 = vector.broadcast %cst_7 : f32 to vector<16x384xf32>
    %12 = arith.mulf %10, %11 : vector<16x384xf32>
    %cst_8 = arith.constant 5.000000e-01 : f32
    %13 = vector.broadcast %cst_8 : f32 to vector<16x384xf32>
    %14 = arith.addf %12, %13 : vector<16x384xf32>
    %15 = vector.extract_strided_slice %14 {offsets = [0, 0], sizes = [16, 128], strides = [1, 1]} : vector<16x384xf32> to vector<16x128xf32>
    %16 = vector.extract_strided_slice %14 {offsets = [0, 128], sizes = [16, 128], strides = [1, 1]} : vector<16x384xf32> to vector<16x128xf32>
    %17 = vector.extract_strided_slice %14 {offsets = [0, 256], sizes = [16, 128], strides = [1, 1]} : vector<16x384xf32> to vector<16x128xf32>
    %18 = vector.extract_strided_slice %6 {offsets = [0, 384], sizes = [16, 128], strides = [1, 1]} : vector<16x512xf32> to vector<16x128xf32>
    %19 = math.tanh %18 : vector<16x128xf32>
    %20 = arith.mulf %16, %4 : vector<16x128xf32>
    %21 = arith.mulf %15, %19 : vector<16x128xf32>
    %22 = arith.addf %20, %21 : vector<16x128xf32>
    %23 = math.tanh %22 : vector<16x128xf32>
    %24 = arith.mulf %17, %23 : vector<16x128xf32>
    %25 = arith.truncf %24 : vector<16x128xf32> to vector<16x128xbf16>
    %26 = vector.extract_strided_slice %3 {offsets = [0, 512], sizes = [16, 512], strides = [1, 1]} : vector<16x1536xf32> to vector<16x512xf32>
    %27 = arith.truncf %24 : vector<16x128xf32> to vector<16x128xbf16>
    %cst_9 = arith.constant dense<0.000000e+00> : vector<16x512xf32>
    %28 = tpu.matmul %27, %5, %cst_9 {dimension_numbers = #tpu.dot_dimension_numbers<[1], [0], [0], [1], [0, 0, 1, 1], [], []>} : vector<16x128xbf16>, vector<128x512xbf16>, vector<16x512xf32> -> vector<16x512xf32>
    %29 = arith.addf %26, %28 : vector<16x512xf32>
    %30 = vector.extract_strided_slice %29 {offsets = [0, 0], sizes = [16, 384], strides = [1, 1]} : vector<16x512xf32> to vector<16x384xf32>
    %cst_10 = arith.constant 5.000000e-01 : f32
    %31 = vector.broadcast %cst_10 : f32 to vector<16x384xf32>
    %32 = arith.mulf %30, %31 : vector<16x384xf32>
    %33 = math.tanh %32 : vector<16x384xf32>
    %cst_11 = arith.constant 5.000000e-01 : f32
    %34 = vector.broadcast %cst_11 : f32 to vector<16x384xf32>
    %35 = arith.mulf %33, %34 : vector<16x384xf32>
    %cst_12 = arith.constant 5.000000e-01 : f32
    %36 = vector.broadcast %cst_12 : f32 to vector<16x384xf32>
    %37 = arith.addf %35, %36 : vector<16x384xf32>
    %38 = vector.extract_strided_slice %37 {offsets = [0, 0], sizes = [16, 128], strides = [1, 1]} : vector<16x384xf32> to vector<16x128xf32>
    %39 = vector.extract_strided_slice %37 {offsets = [0, 128], sizes = [16, 128], strides = [1, 1]} : vector<16x384xf32> to vector<16x128xf32>
    %40 = vector.extract_strided_slice %37 {offsets = [0, 256], sizes = [16, 128], strides = [1, 1]} : vector<16x384xf32> to vector<16x128xf32>
    %41 = vector.extract_strided_slice %29 {offsets = [0, 384], sizes = [16, 128], strides = [1, 1]} : vector<16x512xf32> to vector<16x128xf32>
    %42 = math.tanh %41 : vector<16x128xf32>
    %43 = arith.mulf %39, %22 : vector<16x128xf32>
    %44 = arith.mulf %38, %42 : vector<16x128xf32>
    %45 = arith.addf %43, %44 : vector<16x128xf32>
    %46 = math.tanh %45 : vector<16x128xf32>
    %47 = arith.mulf %40, %46 : vector<16x128xf32>
    %48 = arith.truncf %47 : vector<16x128xf32> to vector<16x128xbf16>
    %49 = vector.extract_strided_slice %3 {offsets = [0, 1024], sizes = [16, 512], strides = [1, 1]} : vector<16x1536xf32> to vector<16x512xf32>
    %50 = arith.truncf %47 : vector<16x128xf32> to vector<16x128xbf16>
    %cst_13 = arith.constant dense<0.000000e+00> : vector<16x512xf32>
    %51 = tpu.matmul %50, %5, %cst_13 {dimension_numbers = #tpu.dot_dimension_numbers<[1], [0], [0], [1], [0, 0, 1, 1], [], []>} : vector<16x128xbf16>, vector<128x512xbf16>, vector<16x512xf32> -> vector<16x512xf32>
    %52 = arith.addf %49, %51 : vector<16x512xf32>
    %53 = vector.extract_strided_slice %52 {offsets = [0, 0], sizes = [16, 384], strides = [1, 1]} : vector<16x512xf32> to vector<16x384xf32>
    %cst_14 = arith.constant 5.000000e-01 : f32
    %54 = vector.broadcast %cst_14 : f32 to vector<16x384xf32>
    %55 = arith.mulf %53, %54 : vector<16x384xf32>
    %56 = math.tanh %55 : vector<16x384xf32>
    %cst_15 = arith.constant 5.000000e-01 : f32
    %57 = vector.broadcast %cst_15 : f32 to vector<16x384xf32>
    %58 = arith.mulf %56, %57 : vector<16x384xf32>
    %cst_16 = arith.constant 5.000000e-01 : f32
    %59 = vector.broadcast %cst_16 : f32 to vector<16x384xf32>
    %60 = arith.addf %58, %59 : vector<16x384xf32>
    %61 = vector.extract_strided_slice %60 {offsets = [0, 0], sizes = [16, 128], strides = [1, 1]} : vector<16x384xf32> to vector<16x128xf32>
    %62 = vector.extract_strided_slice %60 {offsets = [0, 128], sizes = [16, 128], strides = [1, 1]} : vector<16x384xf32> to vector<16x128xf32>
    %63 = vector.extract_strided_slice %60 {offsets = [0, 256], sizes = [16, 128], strides = [1, 1]} : vector<16x384xf32> to vector<16x128xf32>
    %64 = vector.extract_strided_slice %52 {offsets = [0, 384], sizes = [16, 128], strides = [1, 1]} : vector<16x512xf32> to vector<16x128xf32>
    %65 = math.tanh %64 : vector<16x128xf32>
    %66 = arith.mulf %62, %45 : vector<16x128xf32>
    %67 = arith.mulf %61, %65 : vector<16x128xf32>
    %68 = arith.addf %66, %67 : vector<16x128xf32>
    %69 = math.tanh %68 : vector<16x128xf32>
    %70 = arith.mulf %63, %69 : vector<16x128xf32>
    %71 = arith.truncf %70 : vector<16x128xf32> to vector<16x128xbf16>
    %72 = tpu.concatenate %25, %48, %71 in 1 : vector<16x128xbf16>, vector<16x128xbf16>, vector<16x128xbf16> -> vector<16x384xbf16>
    %c0_17 = arith.constant 0 : index
    %c0_18 = arith.constant 0 : index
    %73 = vector.load %arg5[%c0_17, %c0_18] : memref<384x1536xbf16, #tpu.memory_space<vmem>>, vector<384x1536xbf16>
    %cst_19 = arith.constant dense<0.000000e+00> : vector<16x1536xf32>
    %74 = tpu.matmul %72, %73, %cst_19 {dimension_numbers = #tpu.dot_dimension_numbers<[1], [0], [0], [1], [0, 0, 1, 1], [], []>} : vector<16x384xbf16>, vector<384x1536xbf16>, vector<16x1536xf32> -> vector<16x1536xf32>
    %c0_20 = arith.constant 0 : index
    %c0_21 = arith.constant 0 : index
    %75 = vector.load %arg4[%c0_20, %c0_21] : memref<128x512xbf16, #tpu.memory_space<vmem>>, vector<128x512xbf16>
    %c0_22 = arith.constant 0 : index
    %c0_23 = arith.constant 0 : index
    %76 = vector.load %arg6[%c0_22, %c0_23] : memref<384x256xbf16, #tpu.memory_space<vmem>>, vector<384x256xbf16>
    %cst_24 = arith.constant 0.000000e+00 : f32
    %77 = vector.broadcast %cst_24 : f32 to vector<16x256xf32>
    %78 = vector.extract_strided_slice %74 {offsets = [0, 0], sizes = [16, 512], strides = [1, 1]} : vector<16x1536xf32> to vector<16x512xf32>
    %79 = vector.extract_strided_slice %78 {offsets = [0, 0], sizes = [16, 384], strides = [1, 1]} : vector<16x512xf32> to vector<16x384xf32>
    %cst_25 = arith.constant 5.000000e-01 : f32
    %80 = vector.broadcast %cst_25 : f32 to vector<16x384xf32>
    %81 = arith.mulf %79, %80 : vector<16x384xf32>
    %82 = math.tanh %81 : vector<16x384xf32>
    %cst_26 = arith.constant 5.000000e-01 : f32
    %83 = vector.broadcast %cst_26 : f32 to vector<16x384xf32>
    %84 = arith.mulf %82, %83 : vector<16x384xf32>
    %cst_27 = arith.constant 5.000000e-01 : f32
    %85 = vector.broadcast %cst_27 : f32 to vector<16x384xf32>
    %86 = arith.addf %84, %85 : vector<16x384xf32>
    %87 = vector.extract_strided_slice %86 {offsets = [0, 0], sizes = [16, 128], strides = [1, 1]} : vector<16x384xf32> to vector<16x128xf32>
    %88 = vector.extract_strided_slice %86 {offsets = [0, 128], sizes = [16, 128], strides = [1, 1]} : vector<16x384xf32> to vector<16x128xf32>
    %89 = vector.extract_strided_slice %86 {offsets = [0, 256], sizes = [16, 128], strides = [1, 1]} : vector<16x384xf32> to vector<16x128xf32>
    %90 = vector.extract_strided_slice %78 {offsets = [0, 384], sizes = [16, 128], strides = [1, 1]} : vector<16x512xf32> to vector<16x128xf32>
    %91 = math.tanh %90 : vector<16x128xf32>
    %92 = arith.mulf %88, %4 : vector<16x128xf32>
    %93 = arith.mulf %87, %91 : vector<16x128xf32>
    %94 = arith.addf %92, %93 : vector<16x128xf32>
    %95 = math.tanh %94 : vector<16x128xf32>
    %96 = arith.mulf %89, %95 : vector<16x128xf32>
    %97 = math.tanh %96 : vector<16x128xf32>
    %98 = arith.truncf %97 : vector<16x128xf32> to vector<16x128xbf16>
    %99 = vector.extract_strided_slice %76 {offsets = [0, 0], sizes = [128, 256], strides = [1, 1]} : vector<384x256xbf16> to vector<128x256xbf16>
    %cst_28 = arith.constant dense<0.000000e+00> : vector<16x256xf32>
    %100 = tpu.matmul %98, %99, %cst_28 {dimension_numbers = #tpu.dot_dimension_numbers<[1], [0], [0], [1], [0, 0, 1, 1], [], []>} : vector<16x128xbf16>, vector<128x256xbf16>, vector<16x256xf32> -> vector<16x256xf32>
    %101 = arith.addf %77, %100 : vector<16x256xf32>
    %102 = vector.extract_strided_slice %74 {offsets = [0, 512], sizes = [16, 512], strides = [1, 1]} : vector<16x1536xf32> to vector<16x512xf32>
    %103 = arith.truncf %96 : vector<16x128xf32> to vector<16x128xbf16>
    %cst_29 = arith.constant dense<0.000000e+00> : vector<16x512xf32>
    %104 = tpu.matmul %103, %75, %cst_29 {dimension_numbers = #tpu.dot_dimension_numbers<[1], [0], [0], [1], [0, 0, 1, 1], [], []>} : vector<16x128xbf16>, vector<128x512xbf16>, vector<16x512xf32> -> vector<16x512xf32>
    %105 = arith.addf %102, %104 : vector<16x512xf32>
    %106 = vector.extract_strided_slice %105 {offsets = [0, 0], sizes = [16, 384], strides = [1, 1]} : vector<16x512xf32> to vector<16x384xf32>
    %cst_30 = arith.constant 5.000000e-01 : f32
    %107 = vector.broadcast %cst_30 : f32 to vector<16x384xf32>
    %108 = arith.mulf %106, %107 : vector<16x384xf32>
    %109 = math.tanh %108 : vector<16x384xf32>
    %cst_31 = arith.constant 5.000000e-01 : f32
    %110 = vector.broadcast %cst_31 : f32 to vector<16x384xf32>
    %111 = arith.mulf %109, %110 : vector<16x384xf32>
    %cst_32 = arith.constant 5.000000e-01 : f32
    %112 = vector.broadcast %cst_32 : f32 to vector<16x384xf32>
    %113 = arith.addf %111, %112 : vector<16x384xf32>
    %114 = vector.extract_strided_slice %113 {offsets = [0, 0], sizes = [16, 128], strides = [1, 1]} : vector<16x384xf32> to vector<16x128xf32>
    %115 = vector.extract_strided_slice %113 {offsets = [0, 128], sizes = [16, 128], strides = [1, 1]} : vector<16x384xf32> to vector<16x128xf32>
    %116 = vector.extract_strided_slice %113 {offsets = [0, 256], sizes = [16, 128], strides = [1, 1]} : vector<16x384xf32> to vector<16x128xf32>
    %117 = vector.extract_strided_slice %105 {offsets = [0, 384], sizes = [16, 128], strides = [1, 1]} : vector<16x512xf32> to vector<16x128xf32>
    %118 = math.tanh %117 : vector<16x128xf32>
    %119 = arith.mulf %115, %94 : vector<16x128xf32>
    %120 = arith.mulf %114, %118 : vector<16x128xf32>
    %121 = arith.addf %119, %120 : vector<16x128xf32>
    %122 = math.tanh %121 : vector<16x128xf32>
    %123 = arith.mulf %116, %122 : vector<16x128xf32>
    %124 = math.tanh %123 : vector<16x128xf32>
    %125 = arith.truncf %124 : vector<16x128xf32> to vector<16x128xbf16>
    %126 = vector.extract_strided_slice %76 {offsets = [128, 0], sizes = [128, 256], strides = [1, 1]} : vector<384x256xbf16> to vector<128x256xbf16>
    %cst_33 = arith.constant dense<0.000000e+00> : vector<16x256xf32>
    %127 = tpu.matmul %125, %126, %cst_33 {dimension_numbers = #tpu.dot_dimension_numbers<[1], [0], [0], [1], [0, 0, 1, 1], [], []>} : vector<16x128xbf16>, vector<128x256xbf16>, vector<16x256xf32> -> vector<16x256xf32>
    %128 = arith.addf %101, %127 : vector<16x256xf32>
    %129 = vector.extract_strided_slice %74 {offsets = [0, 1024], sizes = [16, 512], strides = [1, 1]} : vector<16x1536xf32> to vector<16x512xf32>
    %130 = arith.truncf %123 : vector<16x128xf32> to vector<16x128xbf16>
    %cst_34 = arith.constant dense<0.000000e+00> : vector<16x512xf32>
    %131 = tpu.matmul %130, %75, %cst_34 {dimension_numbers = #tpu.dot_dimension_numbers<[1], [0], [0], [1], [0, 0, 1, 1], [], []>} : vector<16x128xbf16>, vector<128x512xbf16>, vector<16x512xf32> -> vector<16x512xf32>
    %132 = arith.addf %129, %131 : vector<16x512xf32>
    %133 = vector.extract_strided_slice %132 {offsets = [0, 0], sizes = [16, 384], strides = [1, 1]} : vector<16x512xf32> to vector<16x384xf32>
    %cst_35 = arith.constant 5.000000e-01 : f32
    %134 = vector.broadcast %cst_35 : f32 to vector<16x384xf32>
    %135 = arith.mulf %133, %134 : vector<16x384xf32>
    %136 = math.tanh %135 : vector<16x384xf32>
    %cst_36 = arith.constant 5.000000e-01 : f32
    %137 = vector.broadcast %cst_36 : f32 to vector<16x384xf32>
    %138 = arith.mulf %136, %137 : vector<16x384xf32>
    %cst_37 = arith.constant 5.000000e-01 : f32
    %139 = vector.broadcast %cst_37 : f32 to vector<16x384xf32>
    %140 = arith.addf %138, %139 : vector<16x384xf32>
    %141 = vector.extract_strided_slice %140 {offsets = [0, 0], sizes = [16, 128], strides = [1, 1]} : vector<16x384xf32> to vector<16x128xf32>
    %142 = vector.extract_strided_slice %140 {offsets = [0, 128], sizes = [16, 128], strides = [1, 1]} : vector<16x384xf32> to vector<16x128xf32>
    %143 = vector.extract_strided_slice %140 {offsets = [0, 256], sizes = [16, 128], strides = [1, 1]} : vector<16x384xf32> to vector<16x128xf32>
    %144 = vector.extract_strided_slice %132 {offsets = [0, 384], sizes = [16, 128], strides = [1, 1]} : vector<16x512xf32> to vector<16x128xf32>
    %145 = math.tanh %144 : vector<16x128xf32>
    %146 = arith.mulf %142, %121 : vector<16x128xf32>
    %147 = arith.mulf %141, %145 : vector<16x128xf32>
    %148 = arith.addf %146, %147 : vector<16x128xf32>
    %149 = math.tanh %148 : vector<16x128xf32>
    %150 = arith.mulf %143, %149 : vector<16x128xf32>
    %151 = math.tanh %150 : vector<16x128xf32>
    %152 = arith.truncf %151 : vector<16x128xf32> to vector<16x128xbf16>
    %153 = vector.extract_strided_slice %76 {offsets = [256, 0], sizes = [128, 256], strides = [1, 1]} : vector<384x256xbf16> to vector<128x256xbf16>
    %cst_38 = arith.constant dense<0.000000e+00> : vector<16x256xf32>
    %154 = tpu.matmul %152, %153, %cst_38 {dimension_numbers = #tpu.dot_dimension_numbers<[1], [0], [0], [1], [0, 0, 1, 1], [], []>} : vector<16x128xbf16>, vector<128x256xbf16>, vector<16x256xf32> -> vector<16x256xf32>
    %155 = arith.addf %128, %154 : vector<16x256xf32>
    %c0_39 = arith.constant 0 : index
    %c0_40 = arith.constant 0 : index
    %156 = vector.load %arg7[%c0_39, %c0_40] : memref<1x256xf32, #tpu.memory_space<vmem>>, vector<1x256xf32>
    %157 = vector.broadcast %156 : vector<1x256xf32> to vector<16x256xf32>
    %158 = arith.addf %155, %157 : vector<16x256xf32>
    %cst_41 = arith.constant 0.000000e+00 : f32
    %159 = vector.broadcast %cst_41 : f32 to vector<16x256xf32>
    %160 = arith.maximumf %158, %159 : vector<16x256xf32>
    %161 = arith.truncf %160 : vector<16x256xf32> to vector<16x256xbf16>
    %c0_42 = arith.constant 0 : index
    %c0_43 = arith.constant 0 : index
    %162 = vector.load %arg8[%c0_42, %c0_43] : memref<256x128xbf16, #tpu.memory_space<vmem>>, vector<256x128xbf16>
    %cst_44 = arith.constant dense<0.000000e+00> : vector<16x128xf32>
    %163 = tpu.matmul %161, %162, %cst_44 {dimension_numbers = #tpu.dot_dimension_numbers<[1], [0], [0], [1], [0, 0, 1, 1], [], []>} : vector<16x256xbf16>, vector<256x128xbf16>, vector<16x128xf32> -> vector<16x128xf32>
    %c0_45 = arith.constant 0 : index
    %c0_46 = arith.constant 0 : index
    %164 = vector.load %arg9[%c0_45, %c0_46] : memref<1x128xf32, #tpu.memory_space<vmem>>, vector<1x128xf32>
    %165 = vector.broadcast %164 : vector<1x128xf32> to vector<16x128xf32>
    %166 = arith.addf %163, %165 : vector<16x128xf32>
    %167 = arith.truncf %166 : vector<16x128xf32> to vector<16x128xbf16>
    %c0_47 = arith.constant 0 : index
    %c0_48 = arith.constant 0 : index
    %168 = vector.load %arg10[%c0_47, %c0_48] : memref<16x128xbf16, #tpu.memory_space<vmem>>, vector<16x128xbf16>
    tpu.vector_store %arg10[%c0_47, %c0_48], %167 {strides = array<i32>} : memref<16x128xbf16, #tpu.memory_space<vmem>>, vector<16x128xbf16>,
    return
  }
  func.func @transform_0(%arg0: i32) -> (i32, i32) {
    %c0_i32 = arith.constant 0 : i32
    %c0_i32_0 = arith.constant 0 : i32
    return %arg0, %c0_i32 : i32, i32
  }
  func.func @transform_1(%arg0: i32) -> (i32, i32) {
    %c0_i32 = arith.constant 0 : i32
    %c0_i32_0 = arith.constant 0 : i32
    %c0_i32_1 = arith.constant 0 : i32
    return %c0_i32, %c0_i32_0 : i32, i32
  }
  func.func @transform_2(%arg0: i32) -> (i32, i32) {
    %c0_i32 = arith.constant 0 : i32
    %c0_i32_0 = arith.constant 0 : i32
    %c0_i32_1 = arith.constant 0 : i32
    return %c0_i32, %c0_i32_0 : i32, i32
  }
  func.func @transform_3(%arg0: i32) -> (i32, i32) {
    %c0_i32 = arith.constant 0 : i32
    %c0_i32_0 = arith.constant 0 : i32
    %c0_i32_1 = arith.constant 0 : i32
    return %c0_i32, %c0_i32_0 : i32, i32
  }
  func.func @transform_4(%arg0: i32) -> (i32, i32) {
    %c0_i32 = arith.constant 0 : i32
    %c0_i32_0 = arith.constant 0 : i32
    %c0_i32_1 = arith.constant 0 : i32
    return %c0_i32, %c0_i32_0 : i32, i32
  }
  func.func @transform_5(%arg0: i32) -> (i32, i32) {
    %c0_i32 = arith.constant 0 : i32
    %c0_i32_0 = arith.constant 0 : i32
    %c0_i32_1 = arith.constant 0 : i32
    return %c0_i32, %c0_i32_0 : i32, i32
  }
  func.func @transform_6(%arg0: i32) -> (i32, i32) {
    %c0_i32 = arith.constant 0 : i32
    %c0_i32_0 = arith.constant 0 : i32
    %c0_i32_1 = arith.constant 0 : i32
    return %c0_i32, %c0_i32_0 : i32, i32
  }
  func.func @transform_7(%arg0: i32) -> (i32, i32) {
    %c0_i32 = arith.constant 0 : i32
    %c0_i32_0 = arith.constant 0 : i32
    %c0_i32_1 = arith.constant 0 : i32
    return %c0_i32, %c0_i32_0 : i32, i32
  }
  func.func @transform_8(%arg0: i32) -> (i32, i32) {
    %c0_i32 = arith.constant 0 : i32
    %c0_i32_0 = arith.constant 0 : i32
    %c0_i32_1 = arith.constant 0 : i32
    return %c0_i32, %c0_i32_0 : i32, i32
  }
  func.func @transform_9(%arg0: i32) -> (i32, i32) {
    %c0_i32 = arith.constant 0 : i32
    %c0_i32_0 = arith.constant 0 : i32
    return %arg0, %c0_i32 : i32, i32
  }
}

</mosaic_0001>

<bundles_post_ra>
// kernel: tpu_custom_call.1
= control target key start
LH: loop header
LB: loop body
LE: loop exit
PB: predicated region body
PF: predicated region fallthrough
CT: control target
= control target key end

     0   :  { %14 = vsyncpa [#allocation3], 0  ;;  %s7257_s0 = inlined_call_operand.vmem [shape: f32[32,15], index: 0, kind: input, shape index: {}]   ;;  %s7258_s1 = inlined_call_operand.hbm [shape: bf16[15,1536], index: 1, kind: input, shape index: {}]   ;;  %s7259_s2 = inlined_call_operand.hbm [shape: bf16[128,512], index: 2, kind: input, shape index: {}]   ;;  %s7260_s3 = inlined_call_operand.hbm [shape: bf16[128,512], index: 3, kind: input, shape index: {}]   ;;  %s7261_s4 = inlined_call_operand.hbm [shape: bf16[384,1536], index: 4, kind: input, shape index: {}]   ;;  %s7262_s5 = inlined_call_operand.hbm [shape: bf16[384,256], index: 5, kind: input, shape index: {}]   ;;  %s7263_s6 = inlined_call_operand.hbm [shape: f32[1,256], index: 6, kind: input, shape index: {}]   ;;  %s7264_s7 = inlined_call_operand.hbm [shape: bf16[256,128], index: 7, kind: input, shape index: {}]   ;;  %s7265_s8 = inlined_call_operand.hbm [shape: f32[1,128], index: 8, kind: input, shape index: {}]   ;;  %s7266_s9 = inlined_call_operand.hbm [shape: bf16[32,128], index: 9, kind: output, shape index: {}]  }
   0x1   :  { %15 = vsyncpa [#allocation6], 0 }
   0x2   :  { %16 = vsyncpa [#allocation9], 0 }
   0x3   :  { %17 = vsyncpa [#allocation12], 0 }
   0x4   :  { %18 = vsyncpa [#allocation15], 0 }
   0x5   :  { %19 = vsyncpa [#allocation4], 0 }
   0x6   :  { %21 = vsyncpa [#allocation4 + $0x1], 0  ;;  %s6585_s30 = smov 0   ;;  %s6587_s10 = smov 0  }
   0x7   :  { %s6589_s11 = smov 0   ;;  %s6591_s12 = smov 0  }
   0x8 LB: > { %7271 = sst [smem:[#allocation23_spill]] %s6508_s11  ;;  %s6606_s13 = sadd.s32 4294967295, %s6512_s12   ;;  %s6512_s12 = sphi %s6591_s12, %s7294_s12   ;;  %s6508_s11 = sphi %s6589_s11, %s7291_s11   ;;  %s6504_s10 = sphi %s6587_s10, %s7293_s10   ;;  %s6500_s30 = sphi %s6585_s30, %s7292_s30  }
   0x9   : > { %s4831_s14 = sadd.s32 4294967294, %s6512_s12   ;;  %s6610_s15 = sadd.s32 1, %s6512_s12  }
   0xa   : > { %s228_s16 = sadd.s32 1, %s6508_s11  ;;  %s225_s17 = ssub.s32 %s6512_s12, %s6610_s15 }
   0xb   : > { %p238_p0 = scmp.ne.s32.totalorder %s6508_s11, %s6504_s10  ;;  %p226_p1 = scmp.eq.s32.totalorder %s225_s17, 0 }
   0xc   : > { %p239_p2 = scmp.eq.s32.totalorder %s6606_s13, 1  ;;  %p244_p3 = scmp.ne.s32.totalorder %s6504_s10, %s6500_s30 }
   0xd   : > { %p245_p4 = scmp.eq.s32.totalorder %s4831_s14, 1  ;;  %p4832_p7 = scmp.ge.s32.totalorder %s6512_s12, 1 }
   0xe   : > { %s6621_s18 = scalar_select %p226_p1, %s6508_s11, %s228_s16  }
   0xf   : > { %p6623_p5 = por %p239_p2, %p238_p0  ;;  %p6627_p6 = por %p245_p4, %p244_p3 }
  0x10   : > { %7272 = sst [smem:[#allocation24_spill]] %s6621_s18  ;;  %p252_p8 = scmp.lt.s32.totalorder %s6512_s12, 3 }
  0x11   : > { %p7270_p9 = scmp.eq.s32.totalorder %s6606_s13, 0  ;;  %s6514_s22 = smov [#allocation5]  }
  0x12   : > { %p6634_p10 = pnand %p4832_p7, %p252_p8  ;;  %s277_s23 = sshll.u32 %s6514_s22, 4  ;;  %s278_s23 = int_to_ptr.vmem [resolvable:$true] %s277_s23 }
  0x13   : > { %s6515_s25 = smov [#allocation8]   ;;  %s6235_s28 = scalar_lea.vmem %s278_s23, 4096 }
  0x14   : > { %p5360_p11 = pneg %p6634_p10  ;;  %s303_s26 = sshll.u32 %s6515_s25, 4  ;;  %s304_s26 = int_to_ptr.vmem [resolvable:$true] %s303_s26 }
  0x15   : > { %p6236_p0 = scmp.ne.s32.totalorder %s278_s23, %s6235_s28  ;;  %p6243_p3 = scmp.lt.s32.totalorder %s278_s23, %s278_s23 }
  0x16   : > { %p6642_p12 = pnand %p7270_p9, %p5360_p11  ;;  %p6244_p4 = scmp.lt.s32.totalorder %s6235_s28, %s6235_s28 }
  0x18   : > { %p6648_p13 = pneg %p6642_p12  ;;  %p6245_p7 = por %p6244_p4, %p6243_p3 }
  0x1a   : > { %p6238_p1 = pnand %p6236_p0, %p6648_p13 }
  0x1c   : > { %p6239_p2 = pneg %p6238_p1 }
  0x1e   : > { %p6246_p8 = pnand %p6245_p7, %p6239_p2 }
  0x20   : > { %6249 = shalt.err (!%p6246_p8)
}
  0x21   : > { %s7268_s29 = smov 256   ;;  %s7269_s14 = smov 16  }
  0x22   : > { %5366 = dma.hbm_to_vmem [thread:$0]  (!%p6642_p12), %s7259_s2, 4096, %s278_s23, [#allocation6], %s7268_s29, %s7268_s29, %s7269_s14  }
  0x23   : > { %s6518_s22 = smov [#allocation11]   ;;  %s6261_s18 = scalar_lea.vmem %s304_s26, 36864 }
  0x24   : > { %s330_s25 = sshll.u32 %s6518_s22, 4  ;;  %p6262_p11 = scmp.ne.s32.totalorder %s304_s26, %s6261_s18  ;;  %s331_s25 = int_to_ptr.vmem [resolvable:$true] %s330_s25 }
  0x25   : > { %p6269_p2 = scmp.lt.s32.totalorder %s304_s26, %s304_s26  ;;  %p6270_p3 = scmp.lt.s32.totalorder %s6261_s18, %s6261_s18 }
  0x26   : > { %p6264_p0 = pnand %p6262_p11, %p6648_p13 }
  0x27   : > { %p6271_p4 = por %p6270_p3, %p6269_p2 }
  0x28   : > { %p6265_p1 = pneg %p6264_p0 }
  0x2a   : > { %p6272_p7 = pnand %p6271_p4, %p6265_p1 }
  0x2c   : > { %6275 = shalt.err (!%p6272_p7)
}
  0x2d   : > { %s6519_s28 = smov 768   ;;  %s6520_s11 = smov 48  }
  0x2e   : > { %5372 = dma.hbm_to_vmem [thread:$0]  (!%p6642_p12), %s7261_s4, 36864, %s304_s26, [#allocation9], %s6519_s28, %s6519_s28, %s6520_s11  }
  0x2f   : > { %s6287_s17 = scalar_lea.vmem %s331_s25, 32  ;;  %p6295_p1 = scmp.lt.s32.totalorder %s331_s25, %s331_s25 }
  0x30   : > { %p6288_p8 = scmp.ne.s32.totalorder %s331_s25, %s6287_s17  ;;  %p6296_p2 = scmp.lt.s32.totalorder %s6287_s17, %s6287_s17 }
  0x32   : > { %p6290_p11 = pnand %p6288_p8, %p6648_p13  ;;  %p6297_p3 = por %p6296_p2, %p6295_p1 }
  0x34   : > { %p6291_p0 = pneg %p6290_p11 }
  0x36   : > { %p6298_p4 = pnand %p6297_p3, %p6291_p0 }
  0x38   : > { %6301 = shalt.err (!%p6298_p4)
}
  0x39   : > { %5378 = dma.hbm_to_vmem [thread:$0]  (!%p6642_p12), %s7263_s6, 32, %s331_s25, [#allocation12]  }
  0x3a   : > { %s6521_s23 = smov [#allocation2]   ;;  %s6522_s16 = smov [#allocation7]  }
  0x3b   : > { %s264_s26 = sshll.u32 %s6521_s23, 4  ;;  %s290_s29 = sshll.u32 %s6522_s16, 4  ;;  %s265_s26 = int_to_ptr.vmem [resolvable:$true] %s264_s26  ;;  %s291_s29 = int_to_ptr.vmem [resolvable:$true] %s290_s29 }
  0x3c   : > { %s6313_s14 = scalar_lea.vmem %s265_s26, 1536  ;;  %p6321_p1 = scmp.lt.s32.totalorder %s265_s26, %s265_s26 }
  0x3d   : > { %p6314_p7 = scmp.ne.s32.totalorder %s265_s26, %s6313_s14  ;;  %p6322_p0 = scmp.lt.s32.totalorder %s6313_s14, %s6313_s14 }
  0x3f   : > { %p6316_p8 = pnand %p6314_p7, %p6648_p13  ;;  %p6323_p2 = por %p6322_p0, %p6321_p1 }
  0x41   : > { %p6317_p11 = pneg %p6316_p8 }
  0x43   : > { %p6324_p3 = pnand %p6323_p2, %p6317_p11 }
  0x45   : > { %6327 = shalt.err (!%p6324_p3)
}
  0x46   : > { %5363 = dma.hbm_to_vmem [thread:$0]  (!%p6642_p12), %s7258_s1, 1536, %s265_s26, [#allocation3], %s6519_s28, %s6519_s28, %s6520_s11  }
  0x47   : > { %s6339_s18 = scalar_lea.vmem %s291_s29, 4096  ;;  %p6347_p9 = scmp.lt.s32.totalorder %s291_s29, %s291_s29 }
  0x48   : > { %p6340_p4 = scmp.ne.s32.totalorder %s291_s29, %s6339_s18  ;;  %p6348_p1 = scmp.lt.s32.totalorder %s6339_s18, %s6339_s18 }
  0x4a   : > { %p6342_p7 = pnand %p6340_p4, %p6648_p13  ;;  %p6349_p11 = por %p6348_p1, %p6347_p9 }
  0x4c   : > { %p6343_p8 = pneg %p6342_p7 }
  0x4e   : > { %p6350_p0 = pnand %p6349_p11, %p6343_p8 }
  0x50   : > { %6353 = shalt.err (!%p6350_p0)
}
  0x51   : > { %s7278_s14 = smov 16   ;;  %s7279_s22 = smov 256  }
  0x52   : > { %5369 = dma.hbm_to_vmem [thread:$0]  (!%p6642_p12), %s7260_s3, 4096, %s291_s29, [#allocation6], %s7279_s22, %s7279_s22, %s7278_s14  }
  0x53   : > { %s6523_s11 = smov [#allocation10]  }
  0x54   : > { %s316_s28 = sshll.u32 %s6523_s11, 4  ;;  %s317_s28 = int_to_ptr.vmem [resolvable:$true] %s316_s28 }
  0x55   : > { %s6365_s26 = scalar_lea.vmem %s317_s28, 6144  ;;  %p6373_p4 = scmp.lt.s32.totalorder %s317_s28, %s317_s28 }
  0x56   : > { %p6366_p2 = scmp.ne.s32.totalorder %s317_s28, %s6365_s26  ;;  %p6374_p7 = scmp.lt.s32.totalorder %s6365_s26, %s6365_s26 }
  0x58   : > { %p6368_p3 = pnand %p6366_p2, %p6648_p13  ;;  %p6375_p8 = por %p6374_p7, %p6373_p4 }
  0x5a   : > { %p6369_p9 = pneg %p6368_p3 }
  0x5c   : > { %p6376_p1 = pnand %p6375_p8, %p6369_p9 }
  0x5e   : > { %6379 = shalt.err (!%p6376_p1)
}
  0x5f   : > { %s6524_s25 = smov 128   ;;  %s6525_s17 = smov 8  }
  0x60   : > { %5375 = dma.hbm_to_vmem [thread:$0]  (!%p6642_p12), %s7262_s5, 6144, %s317_s28, [#allocation9], %s6524_s25, %s6524_s25, %s6525_s17  }
  0x61   : > { %s6526_s14 = smov [#allocation13]  }
  0x62   : > { %s340_s22 = sshll.u32 %s6526_s14, 4  ;;  %s341_s22 = int_to_ptr.vmem [resolvable:$true] %s340_s22 }
  0x63   : > { %s6391_s23 = scalar_lea.vmem %s341_s22, 2048  ;;  %p6399_p3 = scmp.lt.s32.totalorder %s341_s22, %s341_s22 }
  0x64   : > { %p6392_p11 = scmp.ne.s32.totalorder %s341_s22, %s6391_s23  ;;  %p6400_p9 = scmp.lt.s32.totalorder %s6391_s23, %s6391_s23 }
  0x66   : > { %p6394_p0 = pnand %p6392_p11, %p6648_p13  ;;  %p6401_p4 = por %p6400_p9, %p6399_p3 }
  0x68   : > { %p6395_p2 = pneg %p6394_p0 }
  0x6a   : > { %p6402_p7 = pnand %p6401_p4, %p6395_p2 }
  0x6c   : > { %6405 = shalt.err (!%p6402_p7)
}
  0x6d   : > { %s6527_s16 = smov 64   ;;  %s6528_s11 = smov 4  }
  0x6e   : > { %5381 = dma.hbm_to_vmem [thread:$0]  (!%p6642_p12), %s7264_s7, 2048, %s341_s22, [#allocation12], %s6527_s16, %s6527_s16, %s6528_s11  }
  0x6f   : > { %s6529_s25 = smov [#allocation14]  }
  0x70   : > { %s354_s17 = sshll.u32 %s6529_s25, 4  ;;  %s355_s17 = int_to_ptr.vmem [resolvable:$true] %s354_s17 }
  0x71   : > { %s6417_s18 = scalar_lea.vmem %s355_s17, 16  ;;  %s6424_s29 = scalar_lea.vmem %s355_s17, 32 }
  0x72   : > { %p6418_p8 = scmp.ne.s32.totalorder %s355_s17, %s6417_s18  ;;  %p6425_p0 = scmp.lt.s32.totalorder %s355_s17, %s355_s17 }
  0x73   : > { %p6426_p2 = scmp.lt.s32.totalorder %s6424_s29, %s6417_s18 }
  0x74   : > { %p6420_p1 = pnand %p6418_p8, %p6648_p13 }
  0x75   : > { %p6427_p3 = por %p6426_p2, %p6425_p0 }
  0x76   : > { %p6421_p11 = pneg %p6420_p1 }
  0x78   : > { %p6428_p9 = pnand %p6427_p3, %p6421_p11 }
  0x7a   : > { %6431 = shalt.err (!%p6428_p9)
}
  0x7b   : > { %5384 = dma.hbm_to_vmem [thread:$0]  (!%p6642_p12), %s7265_s8, 16, %s355_s17, [#allocation15]  }
  0x7c   : > { %376 = sbr.rel (%p6634_p10) target bundleno = 2152 (0x868), region = 56  ;;  %p7280_p4 = scmp.eq.s32.totalorder (!%p6634_p10), %s6606_s13, 0 }
  0x81   : > { %6475 = dma.done.wait (%p7280_p4), [#allocation3], 1536   ;;  %p7281_p13 = pmov %p7280_p4 }
  0x82   : > { %p7282_p7 = pmov %p7280_p4 }
  0x83   : > { %6477 = vsyncadd (%p7281_p13), [#allocation3], 4294965760 }
  0x84   : > { %6479 = dma.done.wait (%p7282_p7), [#allocation6], 8192   ;;  %p7283_p8 = pmov %p7280_p4 }
  0x85   : > { %p7284_p1 = pmov %p7280_p4 }
  0x86   : > { %6481 = vsyncadd (%p7283_p8), [#allocation6], 4294959104 }
  0x87   : > { %6483 = dma.done.wait (%p7284_p1), [#allocation9], 43008   ;;  %p7285_p12 = pmov %p7284_p1 }
  0x88   : > { %p7286_p10 = pmov %p7284_p1 }
  0x89   : > { %6485 = vsyncadd (%p7285_p12), [#allocation9], 4294924288 }
  0x8a   : > { %6487 = dma.done.wait (%p7286_p10), [#allocation12], 2080   ;;  %p7287_p11 = pmov %p7284_p1 }
  0x8b   : > { %p7288_p0 = pmov %p7284_p1 }
  0x8c   : > { %6489 = vsyncadd (%p7287_p11), [#allocation12], 4294965216 }
  0x8d   : > { %6491 = dma.done.wait (%p7288_p0), [#allocation15], 16   ;;  %p7289_p2 = pmov %p7288_p0 }
  0x8e   : > { %vm515_vm0 = vcmask 1046528   ;;  %v6530_v0 = vmov 0   ;;  %s4852_s21 = sshll.u32 %s6606_s13, 1  ;;  %vm516_vm1 = vcmask 1047552   ;;  %v6531_v1 = vmov 65535   ;;  %s437_s11 = sand.u32 1, %s6504_s10  }
  0x8f   : > { %6493 = vsyncadd (%p7289_p2), [#allocation15], 4294967280  ;;  %587 = vmatprep.mubr.bf16.mxu0 %v6530_v0  ;;  %630 = vmatprep.mubr.bf16.mxu1 %v6530_v0  ;;  %p441_p3 = scmp.lt.s32.totalorder %s4852_s21, 3  ;;  %v517_v2 = vsel %vm515_vm0, 4294967295, %v6531_v1  ;;  %v5458_v4 = vld [vmem:[#allocation2 + $0x4] ss:$48 sps:$4 sm:$0xff]  }
  0x90   : > { %v518_v3 = vsel %vm516_vm1, %v517_v2, 0  ;;  %v5460_v5 = vld [vmem:[#allocation2 + $0xc] ss:$48 sps:$4 sm:$0xff]   ;;  %v5462_v7 = vld [vmem:[#allocation2] ss:$48 sps:$4 sm:$0xff]   ;;  %vm511_vm2 = vcmask 121856  }
  0x91   : > { %s7296_s21 = smov (!%p441_p3, %s4852_s21), 3  ;;  %v523_v6 = vand.u32 %v5458_v4, %v518_v3  ;;  %v5463_v8 = vld [vmem:[#allocation2 + $0x8] ss:$48 sps:$4 sm:$0xff]   ;;  %v529_v10 = vand.u32 %v5460_v5, %v518_v3  ;;  %v520_v12 = vand.u32 %v5462_v7, %v518_v3  ;;  %v5466_v15 = vld [vmem:[#allocation2 + $0x14] ss:$48 sps:$4 sm:$0xff]   ;;  %s4851_s26 = sshll.u32 %s437_s11, 3 }
  0x92   : > { %s4853_s24 = sshll.u32 %s7296_s21, 3  ;;  %v526_v13 = vand.u32 %v5463_v8, %v518_v3  ;;  %v5464_v16 = vld [vmem:[#allocation2 + $0x10] ss:$48 sps:$4 sm:$0xff]   ;;  %v535_v17 = vand.u32 %v5466_v15, %v518_v3  ;;  %v5469_v19 = vld [vmem:[#allocation2 + $0x1c] ss:$48 sps:$4 sm:$0xff]   ;;  %s5298_s28 = sshll.u32 %s6606_s13, 7 }
  0x93   : > { %s444_s16 = scalar_lea.vmem %s7257_s0, %s4853_s24  ;;  %569 = vmatprep.subr.bf16.mxu0 %v523_v6  ;;  %612 = vmatprep.subr.bf16.mxu1 %v529_v10  ;;  %v532_v18 = vand.u32 %v5464_v16, %v518_v3  ;;  %v5467_v20 = vld [vmem:[#allocation2 + $0x18] ss:$48 sps:$4 sm:$0xff]   ;;  %v541_v21 = vand.u32 %v5469_v19, %v518_v3  ;;  %v5472_v22 = vld [vmem:[#allocation2 + $0x24] ss:$48 sps:$4 sm:$0xff]   ;;  %v5470_v24 = vld [vmem:[#allocation2 + $0x20] ss:$48 sps:$4 sm:$0xff]   ;;  %s7213_s14 = scalar_lea.hbm %s7266_s9, %s5298_s28 }
  0x94   : > { %v448_v9 = vld [vmem:[%s444_s16] sm:$0xff]  ;;  %v449_v11 = vld [vmem:[%s444_s16 + $0x8] sm:$0xff]  ;;  %570 = vmatpush1.bf16.msra.mxu0 %v520_v12  ;;  %613 = vmatpush1.bf16.msra.mxu1 %v526_v13  ;;  %v538_v23 = vand.u32 %v5467_v20, %v518_v3  ;;  %v547_v25 = vand.u32 %v5472_v22, %v518_v3  ;;  %v544_v26 = vand.u32 %v5470_v24, %v518_v3  ;;  %s439_s25 = scalar_lea.vmem [#allocation16], %s4851_s26  ;;  %s7217_s23 = scalar_lea.sflag [#allocation4], %s437_s11 }
  0x95   : > { %v450_v14 = vpack.c.bf16 %v449_v11, %v448_v9  ;;  %655 = vmatprep.subr.bf16.mxu0 %v535_v17  ;;  %698 = vmatprep.subr.bf16.mxu1 %v541_v21  ;;  %v5475_v27 = vld [vmem:[#allocation2 + $0x2c] ss:$48 sps:$4 sm:$0xff]   ;;  %v5473_v28 = vld [vmem:[#allocation2 + $0x28] ss:$48 sps:$4 sm:$0xff]   ;;  %v6758_v31 = vld [vmem:[#allocation5 + $0xe4] ss:$16 sps:$4 sm:$0xff]  }
  0x96   : > { %v553_v29 = vand.u32 %v5475_v27, %v518_v3  ;;  %v550_v30 = vand.u32 %v5473_v28, %v518_v3  ;;  %v6760_v32 = vld [vmem:[#allocation5 + $0xec] ss:$16 sps:$4 sm:$0xff]   ;;  %v6762_v33 = vld [vmem:[#allocation5 + $0xe0] ss:$16 sps:$4 sm:$0xff]   ;;  %v6764_v34 = vld [vmem:[#allocation5 + $0xe8] ss:$16 sps:$4 sm:$0xff]  }
  0x97   : > { %4866 = vmatmul.mubr.msk.bf16.vlgmr.msra.gmra.mxu0 %vm511_vm2, %v450_v14  ;;  %4867 = vmatmul.mubr.msk.bf16.vlgmr.msra.gmra.mxu1 %vm511_vm2, %v450_v14  ;;  %v6771_v35 = vld [vmem:[#allocation5 + $0xc4] ss:$16 sps:$4 sm:$0xff]   ;;  %v6773_v36 = vld [vmem:[#allocation5 + $0xcc] ss:$16 sps:$4 sm:$0xff]   ;;  %v6776_v37 = vld [vmem:[#allocation5 + $0xc0] ss:$16 sps:$4 sm:$0xff]  }
  0x98   : > { %673 = vmatprep.mubr.bf16.mxu0 %v6530_v0  ;;  %716 = vmatprep.mubr.bf16.mxu1 %v6530_v0  ;;  %v6778_v38 = vld [vmem:[#allocation5 + $0xc8] ss:$16 sps:$4 sm:$0xff]   ;;  %v6784_v39 = vld [vmem:[#allocation5 + $0xa4] ss:$16 sps:$4 sm:$0xff]   ;;  %v6786_v40 = vld [vmem:[#allocation5 + $0xac] ss:$16 sps:$4 sm:$0xff]  }
  0x99   : > { %656 = vmatpush1.bf16.msra.mxu0 %v532_v18  ;;  %699 = vmatpush1.bf16.msra.mxu1 %v538_v23  ;;  %v6788_v41 = vld [vmem:[#allocation5 + $0xa0] ss:$16 sps:$4 sm:$0xff]   ;;  %v6790_v42 = vld [vmem:[#allocation5 + $0xa8] ss:$16 sps:$4 sm:$0xff]   ;;  %v6796_v43 = vld [vmem:[#allocation5 + $0x84] ss:$16 sps:$4 sm:$0xff]  }
  0x9a   : > { %741 = vmatprep.subr.bf16.mxu0 %v547_v25  ;;  %784 = vmatprep.subr.bf16.mxu1 %v553_v29  ;;  %v6798_v44 = vld [vmem:[#allocation5 + $0x8c] ss:$16 sps:$4 sm:$0xff]   ;;  %v6800_v45 = vld [vmem:[#allocation5 + $0x80] ss:$16 sps:$4 sm:$0xff]   ;;  %v6802_v46 = vld [vmem:[#allocation5 + $0x88] ss:$16 sps:$4 sm:$0xff]  }
  0x9b   : > { %v6808_v47 = vld [vmem:[#allocation5 + $0x64] ss:$16 sps:$4 sm:$0xff]   ;;  %v6810_v48 = vld [vmem:[#allocation5 + $0x6c] ss:$16 sps:$4 sm:$0xff]   ;;  %v6812_v49 = vld [vmem:[#allocation5 + $0x60] ss:$16 sps:$4 sm:$0xff]  }
  0x9c   : > { %v6814_v50 = vld [vmem:[#allocation5 + $0x68] ss:$16 sps:$4 sm:$0xff]   ;;  %v6820_v51 = vld [vmem:[#allocation5 + $0x44] ss:$16 sps:$4 sm:$0xff]   ;;  %v6822_v52 = vld [vmem:[#allocation5 + $0x4c] ss:$16 sps:$4 sm:$0xff]  }
  0x9d   : > { %v6824_v53 = vld [vmem:[#allocation5 + $0x40] ss:$16 sps:$4 sm:$0xff]   ;;  %v6826_v54 = vld [vmem:[#allocation5 + $0x48] ss:$16 sps:$4 sm:$0xff]   ;;  %v6832_v55 = vld [vmem:[#allocation5 + $0x24] ss:$16 sps:$4 sm:$0xff]  }
  0x9e   : > { %v6834_v56 = vld [vmem:[#allocation5 + $0x2c] ss:$16 sps:$4 sm:$0xff]   ;;  %v6836_v57 = vld [vmem:[#allocation5 + $0x20] ss:$16 sps:$4 sm:$0xff]   ;;  %v6838_v58 = vld [vmem:[#allocation5 + $0x28] ss:$16 sps:$4 sm:$0xff]  }
  0x9f   : > { %4868 = vmatmul.mubr.msk.bf16.vlgmr.msra.gmra.mxu0 %vm511_vm2, %v450_v14  ;;  %4869 = vmatmul.mubr.msk.bf16.vlgmr.msra.gmra.mxu1 %vm511_vm2, %v450_v14  ;;  %v6843_v59 = vld [vmem:[#allocation5] ss:$16 sps:$4 sm:$0xff]   ;;  %v6845_v60 = vld [vmem:[#allocation5 + $0x4] ss:$16 sps:$4 sm:$0xff]   ;;  %v6847_v61 = vld [vmem:[#allocation5 + $0x8] ss:$16 sps:$4 sm:$0xff]  }
  0xa0   : > { %759 = vmatprep.mubr.bf16.mxu0 %v6530_v0  ;;  %742 = vmatpush1.bf16.msra.mxu0 %v544_v26  ;;  %v6850_v62 = vld [vmem:[#allocation5 + $0xc] ss:$16 sps:$4 sm:$0xff]   ;;  %s4690_s17 = sshll.u32 %s439_s25, 4  ;;  %s6532_s13 = smov [#allocation16]   ;;  %s7215_s17 = int_to_ptr.vmem [resolvable:$true] %s4690_s17 }
  0xa1   : > { %802 = vmatprep.mubr.bf16.mxu1 %v6530_v0  ;;  %785 = vmatpush1.bf16.msra.mxu1 %v550_v30  ;;  %s6432_s21 = scalar_lea.vmem %s7215_s17, 128  ;;  %s6436_s24 = sshll.u32 %s6532_s13, 4  ;;  %s6437_s24 = int_to_ptr.vmem [resolvable:$false] %s6436_s24 }
  0xa2   : > { %1042 = vmatprep.subr.bf16.mxu0 %v6758_v31  ;;  %1085 = vmatprep.subr.bf16.mxu1 %v6760_v32  ;;  %p6433_p9 = scmp.ne.s32.totalorder %s7215_s17, %s6432_s21  ;;  %s6438_s27 = scalar_lea.vmem %s6437_s24, 256 }
  0xa3   : > { %p6439_p7 = scmp.lt.s32.totalorder %s7215_s17, %s6437_s24  ;;  %p6440_p8 = scmp.lt.s32.totalorder %s6438_s27, %s6432_s21 }
  0xa4   : > { %p6434_p4 = pnand %p6433_p9, %p6623_p5 }
  0xa5   : > { %p6441_p1 = por %p6440_p8, %p6439_p7 }
  0xa6   : > { %p6435_p13 = pneg %p6434_p4 }
  0xa7   : > { %4870 = vmatmul.mubr.msk.bf16.vlgmr.msra.gmra.mxu0 %vm511_vm2, %v450_v14  ;;  %4871 = vmatmul.mubr.msk.bf16.vlgmr.msra.gmra.mxu1 %vm511_vm2, %v450_v14 }
  0xa8   : > { %1074 = vmatprep.mubr.bf16.mxu0 %v6530_v0  ;;  %1043 = vmatpush1.bf16.msra.mxu0 %v6762_v33  ;;  %p6442_p12 = pnand %p6441_p1, %p6435_p13 }
  0xa9   : > { %1086 = vmatpush1.bf16.msra.mxu1 %v6764_v34  ;;  %1117 = vmatprep.mubr.bf16.mxu1 %v6530_v0 }
  0xaa   : > { %1044 = vmatprep.subr.bf16.mxu0 %v6771_v35  ;;  %1087 = vmatprep.subr.bf16.mxu1 %v6773_v36 }
  0xac   : > { %1045 = vmatpush1.bf16.msra.mxu0 %v6776_v37 }
  0xad   : > { %1088 = vmatpush1.bf16.msra.mxu1 %v6778_v38  ;;  %1046 = vmatprep.subr.bf16.mxu0 %v6784_v39 }
  0xae   : > { %1089 = vmatprep.subr.bf16.mxu1 %v6786_v40 }
  0xb0   : > { %1047 = vmatpush1.bf16.msra.mxu0 %v6788_v41 }
  0xb1   : > { %1090 = vmatpush1.bf16.msra.mxu1 %v6790_v42  ;;  %1048 = vmatprep.subr.bf16.mxu0 %v6796_v43 }
  0xb2   : > { %1091 = vmatprep.subr.bf16.mxu1 %v6798_v44 }
  0xb4   : > { %1049 = vmatpush1.bf16.msra.mxu0 %v6800_v45 }
  0xb5   : > { %1092 = vmatpush1.bf16.msra.mxu1 %v6802_v46  ;;  %1050 = vmatprep.subr.bf16.mxu0 %v6808_v47 }
  0xb6   : > { %1093 = vmatprep.subr.bf16.mxu1 %v6810_v48 }
  0xb8   : > { %1051 = vmatpush1.bf16.msra.mxu0 %v6812_v49 }
  0xb9   : > { %1094 = vmatpush1.bf16.msra.mxu1 %v6814_v50  ;;  %1052 = vmatprep.subr.bf16.mxu0 %v6820_v51 }
  0xba   : > { %1095 = vmatprep.subr.bf16.mxu1 %v6822_v52 }
  0xbc   : > { %1053 = vmatpush1.bf16.msra.mxu0 %v6824_v53 }
  0xbd   : > { %1096 = vmatpush1.bf16.msra.mxu1 %v6826_v54  ;;  %1054 = vmatprep.subr.bf16.mxu0 %v6832_v55 }
  0xbe   : > { %1097 = vmatprep.subr.bf16.mxu1 %v6834_v56 }
  0xc0   : > { %1055 = vmatpush1.bf16.msra.mxu0 %v6836_v57 }
  0xc1   : > { %1098 = vmatpush1.bf16.msra.mxu1 %v6838_v58  ;;  %1056 = vmatprep.subr.bf16.mxu0 %v6845_v60 }
  0xc2   : > { %1099 = vmatprep.subr.bf16.mxu1 %v6850_v62 }
  0xc4   : > { %1057 = vmatpush1.bf16.msra.mxu0 %v6843_v59 }
  0xc5   : > { %1100 = vmatpush1.bf16.msra.mxu1 %v6847_v61  ;;  %1173 = vmatprep.subr.bf16.mxu0 %v6758_v31 }
  0xc6   : > { %1216 = vmatprep.subr.bf16.mxu1 %v6760_v32 }
 0x157   : > { %v589_v63 = vpop.f32.mrf.mxu0  ;;  %v632_v1 = vpop.f32.mrf.mxu1 }
 0x158   : > { %v845_v2 = vmul.f32 0.5, %v589_v63  ;;  %v847_v14 = vmul.f32 0.5, %v632_v1 }
 0x159   : > { %v591_v3 = vpop.f32.mrf.mxu0  ;;  %v634_v4 = vpop.f32.mrf.mxu1 }
 0x15a   : > { %6092 = vtanh.f32 %v845_v2  ;;  %v846_v5 = vmul.f32 0.5, %v591_v3 }
 0x15b   : > { %v593_v6 = vpop.f32.mrf.mxu0  ;;  %v636_v8 = vpop.f32.mrf.mxu1 }
 0x15c   : > { %6094 = vtanh.f32 %v846_v5  ;;  %v848_v7 = vmul.f32 0.5, %v593_v6  ;;  %v850_v16 = vmul.f32 0.5, %v636_v8 }
 0x15d   : > { %6096 = vtanh.f32 %v634_v4  ;;  %v595_v9 = vpop.f32.mrf.mxu0  ;;  %v638_v11 = vpop.f32.mrf.mxu1 }
 0x15e   : > { %6098 = vtanh.f32 %v848_v7  ;;  %v849_v10 = vmul.f32 0.5, %v595_v9 }
 0x160   : > { %6100 = vtanh.f32 %v849_v10 }
 0x161   : > { %6102 = vtanh.f32 %v638_v11 }
 0x162   : > { %6104 = vtanh.f32 %v847_v14 }
 0x163   : > { %6106 = vtanh.f32 %v850_v16 }
 0x167   : > { %v6093_v12 = vpop.eup %6092 }
 0x168   : > { %v857_v13 = vmul.f32 0.5, %v6093_v12 }
 0x169   : > { %v6095_v15 = vpop.eup %6094 }
 0x16a   : > { %v6097_v17 = vpop.eup %6096  ;;  %v863_v18 = vadd.f32 0.5, %v857_v13  ;;  %v858_v19 = vmul.f32 0.5, %v6095_v15 }
 0x16b   : > { %v6099_v20 = vpop.eup %6098 }
 0x16c   : > { %v864_v21 = vadd.f32 0.5, %v858_v19  ;;  %v860_v22 = vmul.f32 0.5, %v6099_v20  ;;  %v873_v25 = vmul.f32 %v6097_v17, %v863_v18 }
 0x16d   : > { %v6101_v23 = vpop.eup %6100 }
 0x16e   : > { %v871_v24 = vmul.f32 0.0, %v864_v21  ;;  %v866_v26 = vadd.f32 0.5, %v860_v22  ;;  %v861_v27 = vmul.f32 0.5, %v6101_v23  ;;  %v6103_v30 = vpop.eup %6102 }
 0x16f   : > { %v6105_v1 = vpop.eup %6104 }
 0x170   : > { %v6858_v28 = vadd.f32 %v873_v25, %v871_v24  ;;  %v867_v29 = vadd.f32 0.5, %v861_v27  ;;  %v874_v32 = vmul.f32 %v6103_v30, %v866_v26  ;;  %v6107_v2 = vpop.eup %6106  ;;  %v859_v3 = vmul.f32 0.5, %v6105_v1 }
 0x171   : > { %v862_v4 = vmul.f32 0.5, %v6107_v2 }
 0x172   : > { %v872_v31 = vmul.f32 0.0, %v867_v29  ;;  %6108 = vtanh.f32 %v6858_v28  ;;  %v865_v6 = vadd.f32 0.5, %v859_v3 }
 0x173   : > { %v868_v7 = vadd.f32 0.5, %v862_v4 }
 0x174   : > { %v6861_v63 = vadd.f32 %v874_v32, %v872_v31 }
 0x176   : > { %6110 = vtanh.f32 %v6861_v63 }
 0x17f   : > { %v6109_v5 = vpop.eup %6108 }
 0x180   : > { %v879_v9 = vmul.f32 %v6109_v5, %v865_v6 }
 0x183   : > { %v6111_v8 = vpop.eup %6110 }
 0x184   : > { %v880_v10 = vmul.f32 %v6111_v8, %v868_v7 }
 0x186   : > { %v6864_v11 = vpack.c.bf16 %v880_v10, %v879_v9 }
 0x188   : > { %1075 = vmatmul.mubr.bf16.vlgmr.msra.gmra.mxu0 %v6864_v11  ;;  %1118 = vmatmul.mubr.bf16.vlgmr.msra.gmra.mxu1 %v6864_v11 }
 0x189   : > { %1174 = vmatpush1.bf16.msra.mxu0 %v6762_v33  ;;  %1217 = vmatpush1.bf16.msra.mxu1 %v6764_v34  ;;  %v5526_v33 = vld [vmem:[#allocation8 + $0x2a4] ss:$48 sps:$4 sm:$0xff]   ;;  %v675_v34 = vpop.f32.mrf.mxu0 }
 0x18a   : > { %1175 = vmatprep.subr.bf16.mxu0 %v6771_v35  ;;  %1218 = vmatprep.subr.bf16.mxu1 %v6773_v36  ;;  %v718_v35 = vpop.f32.mrf.mxu1 }
 0x18b   : > { %1205 = vmatprep.mubr.bf16.mxu0 %v6530_v0  ;;  %1248 = vmatprep.mubr.bf16.mxu1 %v6530_v0  ;;  %v677_v36 = vpop.f32.mrf.mxu0 }
 0x18d   : > { %1176 = vmatpush1.bf16.msra.mxu0 %v6776_v37  ;;  %1219 = vmatpush1.bf16.msra.mxu1 %v6778_v38  ;;  %v720_v37 = vpop.f32.mrf.mxu1  ;;  %v679_v38 = vpop.f32.mrf.mxu0 }
 0x18e   : > { %1177 = vmatprep.subr.bf16.mxu0 %v6784_v39  ;;  %1220 = vmatprep.subr.bf16.mxu1 %v6786_v40 }
 0x18f   : > { %v722_v39 = vpop.f32.mrf.mxu1  ;;  %v681_v40 = vpop.f32.mrf.mxu0 }
 0x191   : > { %1178 = vmatpush1.bf16.msra.mxu0 %v6788_v41  ;;  %1221 = vmatpush1.bf16.msra.mxu1 %v6790_v42  ;;  %v724_v41 = vpop.f32.mrf.mxu1  ;;  %v6900_v42 = vpop.f32.mrf.mxu0 }
 0x192   : > { %1179 = vmatprep.subr.bf16.mxu0 %v6796_v43  ;;  %1222 = vmatprep.subr.bf16.mxu1 %v6798_v44 }
 0x193   : > { %v6902_v43 = vpop.f32.mrf.mxu1  ;;  %v6904_v44 = vpop.f32.mrf.mxu0 }
 0x195   : > { %1180 = vmatpush1.bf16.msra.mxu0 %v6800_v45  ;;  %1223 = vmatpush1.bf16.msra.mxu1 %v6802_v46  ;;  %v6906_v45 = vpop.f32.mrf.mxu1  ;;  %v6908_v46 = vpop.f32.mrf.mxu0 }
 0x196   : > { %1181 = vmatprep.subr.bf16.mxu0 %v6808_v47  ;;  %1224 = vmatprep.subr.bf16.mxu1 %v6810_v48 }
 0x197   : > { %v6910_v47 = vpop.f32.mrf.mxu1  ;;  %v6912_v48 = vpop.f32.mrf.mxu0 }
 0x199   : > { %1182 = vmatpush1.bf16.msra.mxu0 %v6812_v49  ;;  %1225 = vmatpush1.bf16.msra.mxu1 %v6814_v50  ;;  %v6914_v49 = vpop.f32.mrf.mxu1 }
 0x19a   : > { %1183 = vmatprep.subr.bf16.mxu0 %v6820_v51  ;;  %1226 = vmatprep.subr.bf16.mxu1 %v6822_v52 }
 0x19d   : > { %1184 = vmatpush1.bf16.msra.mxu0 %v6824_v53  ;;  %1227 = vmatpush1.bf16.msra.mxu1 %v6826_v54 }
 0x19e   : > { %1185 = vmatprep.subr.bf16.mxu0 %v6832_v55  ;;  %1228 = vmatprep.subr.bf16.mxu1 %v6834_v56 }
 0x1a1   : > { %1186 = vmatpush1.bf16.msra.mxu0 %v6836_v57  ;;  %1229 = vmatpush1.bf16.msra.mxu1 %v6838_v58 }
 0x1a2   : > { %1187 = vmatprep.subr.bf16.mxu0 %v6845_v60  ;;  %1230 = vmatprep.subr.bf16.mxu1 %v6850_v62 }
 0x1a5   : > { %1188 = vmatpush1.bf16.msra.mxu0 %v6843_v59  ;;  %1231 = vmatpush1.bf16.msra.mxu1 %v6847_v61 }
 0x1a6   : > { %3032 = vmatprep.subr.bf16.mxu0 %v5526_v33 }
 0x248   : > { %v1076_v50 = vpop.f32.mrf.mxu0  ;;  %v1119_v51 = vpop.f32.mrf.mxu1 }
 0x249   : > { %v1128_v52 = vadd.f32 %v1076_v50, %v675_v34  ;;  %v1130_v17 = vadd.f32 %v1119_v51, %v718_v35  ;;  %v5527_v51 = vld [vmem:[#allocation8 + $0x240] ss:$48 sps:$4 sm:$0xff]  }
 0x24a   : > { %v1078_v53 = vpop.f32.mrf.mxu0  ;;  %v1121_v54 = vpop.f32.mrf.mxu1 }
 0x24b   : > { %v1136_v55 = vmul.f32 0.5, %v1128_v52  ;;  %v1129_v56 = vadd.f32 %v1078_v53, %v677_v36  ;;  %v1131_v61 = vadd.f32 %v1121_v54, %v720_v37  ;;  %v1138_v21 = vmul.f32 0.5, %v1130_v17  ;;  %v5532_v52 = vld [vmem:[#allocation8 + $0x1e4] ss:$48 sps:$4 sm:$0xff]   ;;  %v5530_v53 = vld [vmem:[#allocation8 + $0x1e0] ss:$48 sps:$4 sm:$0xff]  }
 0x24c   : > { %v1080_v57 = vpop.f32.mrf.mxu0  ;;  %v1123_v58 = vpop.f32.mrf.mxu1  ;;  %v5535_v54 = vld [vmem:[#allocation8 + $0x184] ss:$48 sps:$4 sm:$0xff]  }
 0x24d   : > { %6112 = vtanh.f32 %v1136_v55  ;;  %v1137_v59 = vmul.f32 0.5, %v1129_v56  ;;  %v1132_v60 = vadd.f32 %v1080_v57, %v679_v38  ;;  %v1134_v18 = vadd.f32 %v1123_v58, %v722_v39  ;;  %v5533_v55 = vld [vmem:[#allocation8 + $0x180] ss:$48 sps:$4 sm:$0xff]   ;;  %v5538_v56 = vld [vmem:[#allocation8 + $0x124] ss:$48 sps:$4 sm:$0xff]  }
 0x24e   : > { %v1082_v62 = vpop.f32.mrf.mxu0  ;;  %v1125_v14 = vpop.f32.mrf.mxu1  ;;  %v5536_v57 = vld [vmem:[#allocation8 + $0x120] ss:$48 sps:$4 sm:$0xff]   ;;  %v5541_v58 = vld [vmem:[#allocation8 + $0xc4] ss:$48 sps:$4 sm:$0xff]  }
 0x24f   : > { %6114 = vtanh.f32 %v1137_v59  ;;  %v1139_v12 = vmul.f32 0.5, %v1132_v60  ;;  %v1133_v13 = vadd.f32 %v1082_v62, %v681_v40  ;;  %v1135_v16 = vadd.f32 %v1125_v14, %v724_v41  ;;  %v5524_v41 = vld [vmem:[#allocation8 + $0x2a0] ss:$48 sps:$4 sm:$0xff]   ;;  %v5544_v60 = vld [vmem:[#allocation8 + $0x64] ss:$48 sps:$4 sm:$0xff]  }
 0x250   : > { %v1141_v23 = vmul.f32 0.5, %v1134_v18  ;;  %v5539_v59 = vld [vmem:[#allocation8 + $0xc0] ss:$48 sps:$4 sm:$0xff]   ;;  %v5547_v62 = vld [vmem:[#allocation8 + $0x4] ss:$48 sps:$4 sm:$0xff]  }
 0x251   : > { %6116 = vtanh.f32 %v1139_v12  ;;  %v1140_v15 = vmul.f32 0.5, %v1133_v13  ;;  %v5545_v12 = vld [vmem:[#allocation8] ss:$48 sps:$4 sm:$0xff]   ;;  %v5550_v13 = vld [vmem:[#allocation8 + $0x5a4] ss:$48 sps:$4 sm:$0xff]  }
 0x252   : > { %6118 = vtanh.f32 %v1131_v61  ;;  %v5542_v61 = vld [vmem:[#allocation8 + $0x60] ss:$48 sps:$4 sm:$0xff]   ;;  %v5556_v17 = vld [vmem:[#allocation8 + $0x4e4] ss:$48 sps:$4 sm:$0xff]  }
 0x253   : > { %6120 = vtanh.f32 %v1140_v15  ;;  %v5548_v14 = vld [vmem:[#allocation8 + $0x5a0] ss:$48 sps:$4 sm:$0xff]   ;;  %v5553_v15 = vld [vmem:[#allocation8 + $0x544] ss:$48 sps:$4 sm:$0xff]  }
 0x254   : > { %6122 = vtanh.f32 %v1135_v16  ;;  %v5551_v16 = vld [vmem:[#allocation8 + $0x540] ss:$48 sps:$4 sm:$0xff]  }
 0x255   : > { %6124 = vtanh.f32 %v1138_v21  ;;  %v5554_v18 = vld [vmem:[#allocation8 + $0x4e0] ss:$48 sps:$4 sm:$0xff]   ;;  %v5562_v21 = vld [vmem:[#allocation8 + $0x424] ss:$48 sps:$4 sm:$0xff]  }
 0x256   : > { %6126 = vtanh.f32 %v1141_v23  ;;  %v5565_v23 = vld [vmem:[#allocation8 + $0x3c4] ss:$48 sps:$4 sm:$0xff]  }
 0x25a   : > { %v6113_v19 = vpop.eup %6112 }
 0x25b   : > { %v1148_v20 = vmul.f32 0.5, %v6113_v19  ;;  %v5559_v19 = vld [vmem:[#allocation8 + $0x484] ss:$48 sps:$4 sm:$0xff]  }
 0x25c   : > { %v6115_v22 = vpop.eup %6114 }
 0x25d   : > { %v1154_v24 = vadd.f32 0.5, %v1148_v20  ;;  %v1149_v25 = vmul.f32 0.5, %v6115_v22  ;;  %v5557_v20 = vld [vmem:[#allocation8 + $0x480] ss:$48 sps:$4 sm:$0xff]  }
 0x25e   : > { %v6117_v26 = vpop.eup %6116  ;;  %v5560_v22 = vld [vmem:[#allocation8 + $0x420] ss:$48 sps:$4 sm:$0xff]  }
 0x25f   : > { %v6119_v27 = vpop.eup %6118  ;;  %v1155_v29 = vadd.f32 0.5, %v1149_v25  ;;  %v1151_v30 = vmul.f32 0.5, %v6117_v26  ;;  %v5568_v25 = vld [vmem:[#allocation8 + $0x364] ss:$48 sps:$4 sm:$0xff]   ;;  %v5566_v26 = vld [vmem:[#allocation8 + $0x360] ss:$48 sps:$4 sm:$0xff]  }
 0x260   : > { %v6121_v31 = vpop.eup %6120  ;;  %v1164_v1 = vmul.f32 %v6119_v27, %v1154_v24  ;;  %v5563_v24 = vld [vmem:[#allocation8 + $0x3c0] ss:$48 sps:$4 sm:$0xff]   ;;  %v5571_v27 = vld [vmem:[#allocation8 + $0x304] ss:$48 sps:$4 sm:$0xff]  }
 0x261   : > { %v1162_v32 = vmul.f32 %v1155_v29, %v6858_v28  ;;  %v1157_v2 = vadd.f32 0.5, %v1151_v30  ;;  %v1152_v3 = vmul.f32 0.5, %v6121_v31  ;;  %v6123_v6 = vpop.eup %6122  ;;  %v5569_v29 = vld [vmem:[#allocation8 + $0x300] ss:$48 sps:$4 sm:$0xff]   ;;  %v5574_v30 = vld [vmem:[#allocation8 + $0x8a4] ss:$48 sps:$4 sm:$0xff]  }
 0x262   : > { %v6125_v10 = vpop.eup %6124  ;;  %v5577_v31 = vld [vmem:[#allocation8 + $0x8ac] ss:$48 sps:$4 sm:$0xff]   ;;  %3075 = vmatprep.subr.bf16.mxu1 %v5574_v30 }
 0x263   : > { %v6917_v4 = vadd.f32 %v1164_v1, %v1162_v32  ;;  %v1158_v5 = vadd.f32 0.5, %v1152_v3  ;;  %v1165_v8 = vmul.f32 %v6123_v6, %v1157_v2  ;;  %v6127_v33 = vpop.eup %6126  ;;  %v1150_v34 = vmul.f32 0.5, %v6125_v10  ;;  %v5572_v32 = vld [vmem:[#allocation8 + $0x8a0] ss:$48 sps:$4 sm:$0xff]   ;;  %v5575_v1 = vld [vmem:[#allocation8 + $0x8a8] ss:$48 sps:$4 sm:$0xff]  }
 0x264   : > { %v1153_v28 = vmul.f32 0.5, %v6127_v33  ;;  %v5580_v2 = vld [vmem:[#allocation8 + $0x844] ss:$48 sps:$4 sm:$0xff]   ;;  %v5583_v3 = vld [vmem:[#allocation8 + $0x84c] ss:$48 sps:$4 sm:$0xff]  }
 0x265   : > { %v1163_v7 = vmul.f32 %v1158_v5, %v6861_v63  ;;  %6128 = vtanh.f32 %v6917_v4  ;;  %v1156_v36 = vadd.f32 0.5, %v1150_v34  ;;  %v5529_v63 = vld [vmem:[#allocation8 + $0x244] ss:$48 sps:$4 sm:$0xff]   ;;  %v5578_v5 = vld [vmem:[#allocation8 + $0x840] ss:$48 sps:$4 sm:$0xff]  }
 0x266   : > { %v1159_v37 = vadd.f32 0.5, %v1153_v28  ;;  %v5581_v6 = vld [vmem:[#allocation8 + $0x848] ss:$48 sps:$4 sm:$0xff]   ;;  %v5584_v10 = vld [vmem:[#allocation8 + $0x7e0] ss:$48 sps:$4 sm:$0xff]  }
 0x267   : > { %v6921_v9 = vadd.f32 %v1165_v8, %v1163_v7  ;;  %v5586_v7 = vld [vmem:[#allocation8 + $0x7e4] ss:$48 sps:$4 sm:$0xff]   ;;  %v5589_v8 = vld [vmem:[#allocation8 + $0x7ec] ss:$48 sps:$4 sm:$0xff]   ;;  %v5587_v33 = vld [vmem:[#allocation8 + $0x7e8] ss:$48 sps:$4 sm:$0xff]  }
 0x268   : > { %v5592_v34 = vld [vmem:[#allocation8 + $0x784] ss:$48 sps:$4 sm:$0xff]   ;;  %v5595_v28 = vld [vmem:[#allocation8 + $0x78c] ss:$48 sps:$4 sm:$0xff]  }
 0x269   : > { %6130 = vtanh.f32 %v6921_v9 }
 0x272   : > { %v6129_v35 = vpop.eup %6128 }
 0x273   : > { %v1170_v39 = vmul.f32 %v6129_v35, %v1156_v36  ;;  %v5590_v35 = vld [vmem:[#allocation8 + $0x780] ss:$48 sps:$4 sm:$0xff]   ;;  %v5593_v36 = vld [vmem:[#allocation8 + $0x788] ss:$48 sps:$4 sm:$0xff]  }
 0x276   : > { %v6131_v38 = vpop.eup %6130 }
 0x277   : > { %v1171_v40 = vmul.f32 %v6131_v38, %v1159_v37  ;;  %v5598_v37 = vld [vmem:[#allocation8 + $0x724] ss:$48 sps:$4 sm:$0xff]   ;;  %v5596_v38 = vld [vmem:[#allocation8 + $0x720] ss:$48 sps:$4 sm:$0xff]  }
 0x279   : > { %v6924_v50 = vpack.c.bf16 %v1171_v40, %v1170_v39  ;;  %v5599_v39 = vld [vmem:[#allocation8 + $0x728] ss:$48 sps:$4 sm:$0xff]   ;;  %v5601_v40 = vld [vmem:[#allocation8 + $0x72c] ss:$48 sps:$4 sm:$0xff]  }
 0x27b   : > { %1206 = vmatmul.mubr.bf16.vlgmr.msra.gmra.mxu0 %v6924_v50  ;;  %1249 = vmatmul.mubr.bf16.vlgmr.msra.gmra.mxu1 %v6924_v50 }
 0x27c   : > { %3033 = vmatpush1.bf16.msra.mxu0 %v5524_v41  ;;  %3064 = vmatprep.mubr.bf16.mxu0 %v6924_v50  ;;  %v5604_v41 = vld [vmem:[#allocation8 + $0x6c4] ss:$48 sps:$4 sm:$0xff]  }
 0x27d   : > { %3034 = vmatprep.subr.bf16.mxu0 %v5529_v63  ;;  %3107 = vmatprep.mubr.bf16.mxu1 %v6530_v0  ;;  %v5607_v63 = vld [vmem:[#allocation8 + $0x6cc] ss:$48 sps:$4 sm:$0xff]  }
 0x27e   : > { %3076 = vmatpush1.bf16.msra.mxu1 %v5572_v32 }
 0x27f   : > { %3077 = vmatprep.subr.bf16.mxu1 %v5580_v2 }
 0x280   : > { %3035 = vmatpush1.bf16.msra.mxu0 %v5527_v51  ;;  %v5602_v51 = vld [vmem:[#allocation8 + $0x6c0] ss:$48 sps:$4 sm:$0xff]  }
 0x281   : > { %3036 = vmatprep.subr.bf16.mxu0 %v5532_v52  ;;  %v5605_v52 = vld [vmem:[#allocation8 + $0x6c8] ss:$48 sps:$4 sm:$0xff]  }
 0x282   : > { %3078 = vmatpush1.bf16.msra.mxu1 %v5578_v5 }
 0x283   : > { %3079 = vmatprep.subr.bf16.mxu1 %v5586_v7 }
 0x284   : > { %3037 = vmatpush1.bf16.msra.mxu0 %v5530_v53  ;;  %v5610_v53 = vld [vmem:[#allocation8 + $0x664] ss:$48 sps:$4 sm:$0xff]  }
 0x285   : > { %3038 = vmatprep.subr.bf16.mxu0 %v5535_v54  ;;  %v5613_v54 = vld [vmem:[#allocation8 + $0x66c] ss:$48 sps:$4 sm:$0xff]  }
 0x286   : > { %3080 = vmatpush1.bf16.msra.mxu1 %v5584_v10 }
 0x287   : > { %3081 = vmatprep.subr.bf16.mxu1 %v5592_v34 }
 0x288   : > { %3039 = vmatpush1.bf16.msra.mxu0 %v5533_v55  ;;  %v5608_v55 = vld [vmem:[#allocation8 + $0x660] ss:$48 sps:$4 sm:$0xff]  }
 0x289   : > { %3040 = vmatprep.subr.bf16.mxu0 %v5538_v56  ;;  %v5611_v56 = vld [vmem:[#allocation8 + $0x668] ss:$48 sps:$4 sm:$0xff]  }
 0x28a   : > { %3082 = vmatpush1.bf16.msra.mxu1 %v5590_v35 }
 0x28b   : > { %3083 = vmatprep.subr.bf16.mxu1 %v5598_v37 }
 0x28c   : > { %3041 = vmatpush1.bf16.msra.mxu0 %v5536_v57  ;;  %v5616_v57 = vld [vmem:[#allocation8 + $0x604] ss:$48 sps:$4 sm:$0xff]  }
 0x28d   : > { %3042 = vmatprep.subr.bf16.mxu0 %v5541_v58  ;;  %v5619_v58 = vld [vmem:[#allocation8 + $0x60c] ss:$48 sps:$4 sm:$0xff]  }
 0x28e   : > { %3084 = vmatpush1.bf16.msra.mxu1 %v5596_v38 }
 0x28f   : > { %3085 = vmatprep.subr.bf16.mxu1 %v5604_v41 }
 0x290   : > { %3043 = vmatpush1.bf16.msra.mxu0 %v5539_v59  ;;  %v5614_v59 = vld [vmem:[#allocation8 + $0x600] ss:$48 sps:$4 sm:$0xff]  }
 0x291   : > { %3044 = vmatprep.subr.bf16.mxu0 %v5544_v60  ;;  %v5617_v60 = vld [vmem:[#allocation8 + $0x608] ss:$48 sps:$4 sm:$0xff]  }
 0x292   : > { %3086 = vmatpush1.bf16.msra.mxu1 %v5602_v51 }
 0x293   : > { %3087 = vmatprep.subr.bf16.mxu1 %v5610_v53 }
 0x294   : > { %3045 = vmatpush1.bf16.msra.mxu0 %v5542_v61  ;;  %v5622_v61 = vld [vmem:[#allocation8 + $0x2ac] ss:$48 sps:$4 sm:$0xff]  }
 0x295   : > { %3046 = vmatprep.subr.bf16.mxu0 %v5547_v62  ;;  %v5625_v62 = vld [vmem:[#allocation8 + $0x2b4] ss:$48 sps:$4 sm:$0xff]  }
 0x296   : > { %3088 = vmatpush1.bf16.msra.mxu1 %v5608_v55  ;;  %v5620_v55 = vld [vmem:[#allocation8 + $0x2a8] ss:$48 sps:$4 sm:$0xff]  }
 0x297   : > { %3089 = vmatprep.subr.bf16.mxu1 %v5616_v57 }
 0x298   : > { %3047 = vmatpush1.bf16.msra.mxu0 %v5545_v12 }
 0x299   : > { %3048 = vmatprep.subr.bf16.mxu0 %v5550_v13 }
 0x29a   : > { %3090 = vmatpush1.bf16.msra.mxu1 %v5614_v59  ;;  %v5626_v59 = vld [vmem:[#allocation8 + $0x248] ss:$48 sps:$4 sm:$0xff]  }
 0x29b   : > { %3118 = vmatprep.subr.bf16.mxu1 %v5622_v61  ;;  %v5634_v61 = vld [vmem:[#allocation8 + $0x1ec] ss:$48 sps:$4 sm:$0xff]  }
 0x29c   : > { %3049 = vmatpush2.bf16.msra.mxu0 %v5548_v14 }
 0x29d   : > { %3050 = vmatprep.subr.bf16.mxu0 %v5553_v15 }
 0x2a0   : > { %3051 = vmatpush2.bf16.msra.mxu0 %v5551_v16 }
 0x2a1   : > { %3052 = vmatprep.subr.bf16.mxu0 %v5556_v17 }
 0x2a4   : > { %3053 = vmatpush2.bf16.msra.mxu0 %v5554_v18 }
 0x2a5   : > { %3054 = vmatprep.subr.bf16.mxu0 %v5559_v19 }
 0x2a8   : > { %3055 = vmatpush2.bf16.msra.mxu0 %v5557_v20 }
 0x2a9   : > { %3056 = vmatprep.subr.bf16.mxu0 %v5562_v21 }
 0x2ac   : > { %3057 = vmatpush2.bf16.msra.mxu0 %v5560_v22 }
 0x2ad   : > { %3058 = vmatprep.subr.bf16.mxu0 %v5565_v23 }
 0x2b0   : > { %3059 = vmatpush2.bf16.msra.mxu0 %v5563_v24 }
 0x2b1   : > { %3060 = vmatprep.subr.bf16.mxu0 %v5568_v25 }
 0x2b4   : > { %3061 = vmatpush2.bf16.msra.mxu0 %v5566_v26 }
 0x2b5   : > { %3062 = vmatprep.subr.bf16.mxu0 %v5571_v27 }
 0x2b8   : > { %3063 = vmatpush2.bf16.msra.mxu0 %v5569_v29 }
 0x2b9   : > { %3161 = vmatprep.subr.bf16.mxu0 %v5577_v31 }
 0x2bb   : > { %3065 = vmatmul.mubr.bf16.vlgmr.msra.gmra.mxu0 %v6864_v11 }
 0x2bc   : > { %3193 = vmatprep.mubr.bf16.mxu0 %v6530_v0  ;;  %3162 = vmatpush1.bf16.msra.mxu0 %v5575_v1 }
 0x2bd   : > { %3163 = vmatprep.subr.bf16.mxu0 %v5583_v3 }
 0x2c0   : > { %3164 = vmatpush1.bf16.msra.mxu0 %v5581_v6 }
 0x2c1   : > { %3165 = vmatprep.subr.bf16.mxu0 %v5589_v8 }
 0x2c4   : > { %3166 = vmatpush1.bf16.msra.mxu0 %v5587_v33 }
 0x2c5   : > { %3167 = vmatprep.subr.bf16.mxu0 %v5595_v28 }
 0x2c8   : > { %3168 = vmatpush1.bf16.msra.mxu0 %v5593_v36 }
 0x2c9   : > { %3169 = vmatprep.subr.bf16.mxu0 %v5601_v40 }
 0x2cc   : > { %3170 = vmatpush1.bf16.msra.mxu0 %v5599_v39 }
 0x2cd   : > { %3171 = vmatprep.subr.bf16.mxu0 %v5607_v63 }
 0x2d0   : > { %3172 = vmatpush1.bf16.msra.mxu0 %v5605_v52 }
 0x2d1   : > { %3173 = vmatprep.subr.bf16.mxu0 %v5613_v54 }
 0x2d4   : > { %3174 = vmatpush1.bf16.msra.mxu0 %v5611_v56  ;;  %v5623_v56 = vld [vmem:[#allocation8 + $0x2b0] ss:$48 sps:$4 sm:$0xff]  }
 0x2d5   : > { %3175 = vmatprep.subr.bf16.mxu0 %v5619_v58  ;;  %v5628_v58 = vld [vmem:[#allocation8 + $0x24c] ss:$48 sps:$4 sm:$0xff]  }
 0x2d8   : > { %3176 = vmatpush1.bf16.msra.mxu0 %v5617_v60  ;;  %v5629_v60 = vld [vmem:[#allocation8 + $0x250] ss:$48 sps:$4 sm:$0xff]  }
 0x2d9   : > { %3204 = vmatprep.subr.bf16.mxu0 %v5625_v62  ;;  %v5637_v62 = vld [vmem:[#allocation8 + $0x1f4] ss:$48 sps:$4 sm:$0xff]  }
 0x33b   : > { %v1207_v12 = vpop.f32.mrf.mxu0  ;;  %v1250_v13 = vpop.f32.mrf.mxu1 }
 0x33c   : > { %v1259_v14 = vadd.f32 %v1207_v12, %v6900_v42  ;;  %v1261_v29 = vadd.f32 %v1250_v13, %v6902_v43  ;;  %v5632_v12 = vld [vmem:[#allocation8 + $0x1e8] ss:$48 sps:$4 sm:$0xff]   ;;  %v5635_v13 = vld [vmem:[#allocation8 + $0x1f0] ss:$48 sps:$4 sm:$0xff]  }
 0x33d   : > { %v1209_v15 = vpop.f32.mrf.mxu0  ;;  %v1252_v16 = vpop.f32.mrf.mxu1 }
 0x33e   : > { %v1267_v17 = vmul.f32 0.5, %v1259_v14  ;;  %v1260_v18 = vadd.f32 %v1209_v15, %v6904_v44  ;;  %v1262_v23 = vadd.f32 %v1252_v16, %v6906_v45  ;;  %v1269_v45 = vmul.f32 0.5, %v1261_v29  ;;  %v5640_v14 = vld [vmem:[#allocation8 + $0x18c] ss:$48 sps:$4 sm:$0xff]   ;;  %v5643_v15 = vld [vmem:[#allocation8 + $0x194] ss:$48 sps:$4 sm:$0xff]  }
 0x33f   : > { %v1211_v19 = vpop.f32.mrf.mxu0  ;;  %v1254_v20 = vpop.f32.mrf.mxu1  ;;  %v5638_v16 = vld [vmem:[#allocation8 + $0x188] ss:$48 sps:$4 sm:$0xff]   ;;  %v5664_v29 = vld [vmem:[#allocation8 + $0xc] ss:$48 sps:$4 sm:$0xff]  }
 0x340   : > { %6132 = vtanh.f32 %v1267_v17  ;;  %v1268_v21 = vmul.f32 0.5, %v1260_v18  ;;  %v1263_v22 = vadd.f32 %v1211_v19, %v6908_v46  ;;  %v1265_v30 = vadd.f32 %v1254_v20, %v6910_v47  ;;  %v5641_v17 = vld [vmem:[#allocation8 + $0x190] ss:$48 sps:$4 sm:$0xff]   ;;  %v5646_v18 = vld [vmem:[#allocation8 + $0x12c] ss:$48 sps:$4 sm:$0xff]  }
 0x341   : > { %v1213_v24 = vpop.f32.mrf.mxu0  ;;  %v1256_v27 = vpop.f32.mrf.mxu1  ;;  %v5649_v19 = vld [vmem:[#allocation8 + $0x134] ss:$48 sps:$4 sm:$0xff]   ;;  %v5644_v20 = vld [vmem:[#allocation8 + $0x128] ss:$48 sps:$4 sm:$0xff]  }
 0x342   : > { %6134 = vtanh.f32 %v1268_v21  ;;  %v1270_v25 = vmul.f32 0.5, %v1263_v22  ;;  %v1264_v26 = vadd.f32 %v1213_v24, %v6912_v48  ;;  %v1266_v44 = vadd.f32 %v1256_v27, %v6914_v49  ;;  %v5647_v21 = vld [vmem:[#allocation8 + $0x130] ss:$48 sps:$4 sm:$0xff]   ;;  %v5652_v22 = vld [vmem:[#allocation8 + $0xcc] ss:$48 sps:$4 sm:$0xff]  }
 0x343   : > { %v1272_v1 = vmul.f32 0.5, %v1265_v30  ;;  %v5650_v24 = vld [vmem:[#allocation8 + $0xc8] ss:$48 sps:$4 sm:$0xff]   ;;  %v5661_v27 = vld [vmem:[#allocation8 + $0x74] ss:$48 sps:$4 sm:$0xff]  }
 0x344   : > { %6136 = vtanh.f32 %v1270_v25  ;;  %v1271_v42 = vmul.f32 0.5, %v1264_v26  ;;  %v5653_v25 = vld [vmem:[#allocation8 + $0xd0] ss:$48 sps:$4 sm:$0xff]   ;;  %v5658_v26 = vld [vmem:[#allocation8 + $0x6c] ss:$48 sps:$4 sm:$0xff]  }
 0x345   : > { %6138 = vtanh.f32 %v1262_v23  ;;  %v5655_v23 = vld [vmem:[#allocation8 + $0xd4] ss:$48 sps:$4 sm:$0xff]  }
 0x346   : > { %6140 = vtanh.f32 %v1271_v42  ;;  %v5656_v42 = vld [vmem:[#allocation8 + $0x68] ss:$48 sps:$4 sm:$0xff]   ;;  %v5667_v30 = vld [vmem:[#allocation8 + $0x14] ss:$48 sps:$4 sm:$0xff]  }
 0x347   : > { %6142 = vtanh.f32 %v1266_v44  ;;  %v5659_v44 = vld [vmem:[#allocation8 + $0x70] ss:$48 sps:$4 sm:$0xff]  }
 0x348   : > { %6144 = vtanh.f32 %v1269_v45  ;;  %v5670_v45 = vld [vmem:[#allocation8 + $0x5ac] ss:$48 sps:$4 sm:$0xff]  }
 0x349   : > { %6146 = vtanh.f32 %v1272_v1  ;;  %v5668_v1 = vld [vmem:[#allocation8 + $0x5a8] ss:$48 sps:$4 sm:$0xff]  }
 0x34d   : > { %v6133_v46 = vpop.eup %6132 }
 0x34e   : > { %v1279_v31 = vmul.f32 0.5, %v6133_v46  ;;  %v5662_v46 = vld [vmem:[#allocation8 + $0x8] ss:$48 sps:$4 sm:$0xff]  }
 0x34f   : > { %v6135_v32 = vpop.eup %6134 }
 0x350   : > { %v1285_v2 = vadd.f32 0.5, %v1279_v31  ;;  %v1280_v3 = vmul.f32 0.5, %v6135_v32  ;;  %v5665_v31 = vld [vmem:[#allocation8 + $0x10] ss:$48 sps:$4 sm:$0xff]   ;;  %v5673_v32 = vld [vmem:[#allocation8 + $0x5b4] ss:$48 sps:$4 sm:$0xff]  }
 0x351   : > { %v6137_v48 = vpop.eup %6136 }
 0x352   : > { %v6139_v5 = vpop.eup %6138  ;;  %v1286_v6 = vadd.f32 0.5, %v1280_v3  ;;  %v1282_v7 = vmul.f32 0.5, %v6137_v48  ;;  %v5676_v3 = vld [vmem:[#allocation8 + $0x54c] ss:$48 sps:$4 sm:$0xff]   ;;  %v5679_v48 = vld [vmem:[#allocation8 + $0x554] ss:$48 sps:$4 sm:$0xff]  }
 0x353   : > { %v6141_v8 = vpop.eup %6140  ;;  %v1295_v43 = vmul.f32 %v6139_v5, %v1285_v2  ;;  %v5671_v2 = vld [vmem:[#allocation8 + $0x5b0] ss:$48 sps:$4 sm:$0xff]   ;;  %v5674_v5 = vld [vmem:[#allocation8 + $0x548] ss:$48 sps:$4 sm:$0xff]  }
 0x354   : > { %v1293_v49 = vmul.f32 %v1286_v6, %v6917_v4  ;;  %v1288_v10 = vadd.f32 0.5, %v1282_v7  ;;  %v1283_v33 = vmul.f32 0.5, %v6141_v8  ;;  %v6143_v28 = vpop.eup %6142  ;;  %v5677_v6 = vld [vmem:[#allocation8 + $0x550] ss:$48 sps:$4 sm:$0xff]   ;;  %v5682_v7 = vld [vmem:[#allocation8 + $0x4ec] ss:$48 sps:$4 sm:$0xff]  }
 0x355   : > { %v6145_v38 = vpop.eup %6144  ;;  %v5685_v8 = vld [vmem:[#allocation8 + $0x4f4] ss:$48 sps:$4 sm:$0xff]  }
 0x356   : > { %v1297_v47 = vadd.f32 %v1295_v43, %v1293_v49  ;;  %v1289_v34 = vadd.f32 0.5, %v1283_v33  ;;  %v1296_v36 = vmul.f32 %v6143_v28, %v1288_v10  ;;  %v6147_v39 = vpop.eup %6146  ;;  %v1281_v40 = vmul.f32 0.5, %v6145_v38  ;;  %v5680_v49 = vld [vmem:[#allocation8 + $0x4e8] ss:$48 sps:$4 sm:$0xff]   ;;  %v5683_v43 = vld [vmem:[#allocation8 + $0x4f0] ss:$48 sps:$4 sm:$0xff]  }
 0x357   : > { %v1284_v41 = vmul.f32 0.5, %v6147_v39  ;;  %v5688_v10 = vld [vmem:[#allocation8 + $0x48c] ss:$48 sps:$4 sm:$0xff]   ;;  %v5691_v33 = vld [vmem:[#allocation8 + $0x494] ss:$48 sps:$4 sm:$0xff]  }
 0x358   : > { %v1294_v35 = vmul.f32 %v1289_v34, %v6921_v9  ;;  %6148 = vtanh.f32 %v1297_v47  ;;  %v1287_v51 = vadd.f32 0.5, %v1281_v40  ;;  %v5631_v9 = vld [vmem:[#allocation8 + $0x254] ss:$48 sps:$4 sm:$0xff]   ;;  %v5686_v47 = vld [vmem:[#allocation8 + $0x488] ss:$48 sps:$4 sm:$0xff]  }
 0x359   : > { %v1290_v52 = vadd.f32 0.5, %v1284_v41  ;;  %v5689_v34 = vld [vmem:[#allocation8 + $0x490] ss:$48 sps:$4 sm:$0xff]   ;;  %v5694_v28 = vld [vmem:[#allocation8 + $0x42c] ss:$48 sps:$4 sm:$0xff]  }
 0x35a   : > { %v1298_v37 = vadd.f32 %v1296_v36, %v1294_v35  ;;  %v5697_v35 = vld [vmem:[#allocation8 + $0x434] ss:$48 sps:$4 sm:$0xff]   ;;  %v5692_v36 = vld [vmem:[#allocation8 + $0x428] ss:$48 sps:$4 sm:$0xff]   ;;  %v5700_v38 = vld [vmem:[#allocation8 + $0x3cc] ss:$48 sps:$4 sm:$0xff]  }
 0x35b   : > { %v5703_v39 = vld [vmem:[#allocation8 + $0x3d4] ss:$48 sps:$4 sm:$0xff]   ;;  %v5698_v40 = vld [vmem:[#allocation8 + $0x3c8] ss:$48 sps:$4 sm:$0xff]   ;;  %v5701_v41 = vld [vmem:[#allocation8 + $0x3d0] ss:$48 sps:$4 sm:$0xff]  }
 0x35c   : > { %6150 = vtanh.f32 %v1298_v37  ;;  %v5695_v37 = vld [vmem:[#allocation8 + $0x430] ss:$48 sps:$4 sm:$0xff]  }
 0x365   : > { %v6149_v63 = vpop.eup %6148 }
 0x366   : > { %v1301_v53 = vmul.f32 %v6149_v63, %v1287_v51  ;;  %v5706_v63 = vld [vmem:[#allocation8 + $0x36c] ss:$48 sps:$4 sm:$0xff]   ;;  %v5709_v51 = vld [vmem:[#allocation8 + $0x374] ss:$48 sps:$4 sm:$0xff]  }
 0x369   : > { %v6151_v4 = vpop.eup %6150 }
 0x36a   : > { %v1302_v54 = vmul.f32 %v6151_v4, %v1290_v52  ;;  %v5704_v52 = vld [vmem:[#allocation8 + $0x368] ss:$48 sps:$4 sm:$0xff]   ;;  %v5707_v4 = vld [vmem:[#allocation8 + $0x370] ss:$48 sps:$4 sm:$0xff]  }
 0x36c   : > { %v6942_v57 = vpack.c.bf16 %v1302_v54, %v1301_v53  ;;  %v5712_v53 = vld [vmem:[#allocation8 + $0x30c] ss:$48 sps:$4 sm:$0xff]   ;;  %v5715_v54 = vld [vmem:[#allocation8 + $0x314] ss:$48 sps:$4 sm:$0xff]  }
 0x36e   : > { %3108 = vmatmul.mubr.bf16.vlgmr.msra.gmra.mxu1 %v6942_v57  ;;  %3194 = vmatmul.mubr.bf16.vlgmr.msra.gmra.mxu0 %v6942_v57 }
 0x36f   : > { %3119 = vmatpush1.bf16.msra.mxu1 %v5620_v55  ;;  %3205 = vmatpush1.bf16.msra.mxu0 %v5623_v56  ;;  %v5710_v55 = vld [vmem:[#allocation8 + $0x308] ss:$48 sps:$4 sm:$0xff]   ;;  %v5713_v56 = vld [vmem:[#allocation8 + $0x310] ss:$48 sps:$4 sm:$0xff]  }
 0x370   : > { %3150 = vmatprep.mubr.bf16.mxu1 %v6924_v50  ;;  %3236 = vmatprep.mubr.bf16.mxu0 %v6924_v50 }
 0x371   : > { %3120 = vmatprep.subr.bf16.mxu1 %v5628_v58  ;;  %3206 = vmatprep.subr.bf16.mxu0 %v5631_v9  ;;  %v5718_v58 = vld [vmem:[#allocation8 + $0x8b4] ss:$48 sps:$4 sm:$0xff]   ;;  %v5721_v9 = vld [vmem:[#allocation8 + $0x8bc] ss:$48 sps:$4 sm:$0xff]  }
 0x373   : > { %3121 = vmatpush1.bf16.msra.mxu1 %v5626_v59  ;;  %3207 = vmatpush1.bf16.msra.mxu0 %v5629_v60  ;;  %v5716_v59 = vld [vmem:[#allocation8 + $0x8b0] ss:$48 sps:$4 sm:$0xff]   ;;  %v5719_v60 = vld [vmem:[#allocation8 + $0x8b8] ss:$48 sps:$4 sm:$0xff]  }
 0x374   : > { %3122 = vmatprep.subr.bf16.mxu1 %v5634_v61  ;;  %3208 = vmatprep.subr.bf16.mxu0 %v5637_v62  ;;  %v5724_v61 = vld [vmem:[#allocation8 + $0x854] ss:$48 sps:$4 sm:$0xff]   ;;  %v5727_v62 = vld [vmem:[#allocation8 + $0x85c] ss:$48 sps:$4 sm:$0xff]  }
 0x377   : > { %3123 = vmatpush1.bf16.msra.mxu1 %v5632_v12  ;;  %3209 = vmatpush1.bf16.msra.mxu0 %v5635_v13  ;;  %v5722_v12 = vld [vmem:[#allocation8 + $0x850] ss:$48 sps:$4 sm:$0xff]   ;;  %v5725_v13 = vld [vmem:[#allocation8 + $0x858] ss:$48 sps:$4 sm:$0xff]  }
 0x378   : > { %3124 = vmatprep.subr.bf16.mxu1 %v5640_v14  ;;  %3210 = vmatprep.subr.bf16.mxu0 %v5643_v15  ;;  %v5730_v14 = vld [vmem:[#allocation8 + $0x7f4] ss:$48 sps:$4 sm:$0xff]   ;;  %v5733_v15 = vld [vmem:[#allocation8 + $0x7fc] ss:$48 sps:$4 sm:$0xff]  }
 0x37b   : > { %3125 = vmatpush1.bf16.msra.mxu1 %v5638_v16  ;;  %3211 = vmatpush1.bf16.msra.mxu0 %v5641_v17  ;;  %v5728_v16 = vld [vmem:[#allocation8 + $0x7f0] ss:$48 sps:$4 sm:$0xff]   ;;  %v5731_v17 = vld [vmem:[#allocation8 + $0x7f8] ss:$48 sps:$4 sm:$0xff]  }
 0x37c   : > { %3126 = vmatprep.subr.bf16.mxu1 %v5646_v18  ;;  %3212 = vmatprep.subr.bf16.mxu0 %v5649_v19  ;;  %v5736_v18 = vld [vmem:[#allocation8 + $0x794] ss:$48 sps:$4 sm:$0xff]   ;;  %v5739_v19 = vld [vmem:[#allocation8 + $0x79c] ss:$48 sps:$4 sm:$0xff]  }
 0x37f   : > { %3127 = vmatpush1.bf16.msra.mxu1 %v5644_v20  ;;  %3213 = vmatpush1.bf16.msra.mxu0 %v5647_v21  ;;  %v5734_v20 = vld [vmem:[#allocation8 + $0x790] ss:$48 sps:$4 sm:$0xff]   ;;  %v5737_v21 = vld [vmem:[#allocation8 + $0x798] ss:$48 sps:$4 sm:$0xff]  }
 0x380   : > { %3128 = vmatprep.subr.bf16.mxu1 %v5652_v22  ;;  %3214 = vmatprep.subr.bf16.mxu0 %v5655_v23  ;;  %v5742_v22 = vld [vmem:[#allocation8 + $0x734] ss:$48 sps:$4 sm:$0xff]   ;;  %v5745_v23 = vld [vmem:[#allocation8 + $0x73c] ss:$48 sps:$4 sm:$0xff]  }
 0x383   : > { %3129 = vmatpush1.bf16.msra.mxu1 %v5650_v24  ;;  %3215 = vmatpush1.bf16.msra.mxu0 %v5653_v25  ;;  %v5740_v24 = vld [vmem:[#allocation8 + $0x730] ss:$48 sps:$4 sm:$0xff]   ;;  %v5743_v25 = vld [vmem:[#allocation8 + $0x738] ss:$48 sps:$4 sm:$0xff]  }
 0x384   : > { %3130 = vmatprep.subr.bf16.mxu1 %v5658_v26  ;;  %3216 = vmatprep.subr.bf16.mxu0 %v5661_v27  ;;  %v5748_v26 = vld [vmem:[#allocation8 + $0x6d4] ss:$48 sps:$4 sm:$0xff]   ;;  %v5751_v27 = vld [vmem:[#allocation8 + $0x6dc] ss:$48 sps:$4 sm:$0xff]  }
 0x387   : > { %3131 = vmatpush1.bf16.msra.mxu1 %v5656_v42  ;;  %3217 = vmatpush1.bf16.msra.mxu0 %v5659_v44  ;;  %v5746_v42 = vld [vmem:[#allocation8 + $0x6d0] ss:$48 sps:$4 sm:$0xff]   ;;  %v5749_v44 = vld [vmem:[#allocation8 + $0x6d8] ss:$48 sps:$4 sm:$0xff]  }
 0x388   : > { %3132 = vmatprep.subr.bf16.mxu1 %v5664_v29  ;;  %3218 = vmatprep.subr.bf16.mxu0 %v5667_v30  ;;  %v5754_v29 = vld [vmem:[#allocation8 + $0x674] ss:$48 sps:$4 sm:$0xff]   ;;  %v5757_v30 = vld [vmem:[#allocation8 + $0x67c] ss:$48 sps:$4 sm:$0xff]  }
 0x38b   : > { %3133 = vmatpush1.bf16.msra.mxu1 %v5662_v46  ;;  %3219 = vmatpush1.bf16.msra.mxu0 %v5665_v31  ;;  %v5752_v46 = vld [vmem:[#allocation8 + $0x670] ss:$48 sps:$4 sm:$0xff]   ;;  %v5755_v31 = vld [vmem:[#allocation8 + $0x678] ss:$48 sps:$4 sm:$0xff]  }
 0x38c   : > { %3134 = vmatprep.subr.bf16.mxu1 %v5670_v45  ;;  %3220 = vmatprep.subr.bf16.mxu0 %v5673_v32  ;;  %v5760_v45 = vld [vmem:[#allocation8 + $0x614] ss:$48 sps:$4 sm:$0xff]   ;;  %v5763_v32 = vld [vmem:[#allocation8 + $0x61c] ss:$48 sps:$4 sm:$0xff]  }
 0x38f   : > { %3135 = vmatpush2.bf16.msra.mxu1 %v5668_v1  ;;  %3221 = vmatpush2.bf16.msra.mxu0 %v5671_v2  ;;  %v5758_v1 = vld [vmem:[#allocation8 + $0x610] ss:$48 sps:$4 sm:$0xff]   ;;  %v5761_v2 = vld [vmem:[#allocation8 + $0x618] ss:$48 sps:$4 sm:$0xff]  }
 0x390   : > { %3136 = vmatprep.subr.bf16.mxu1 %v5676_v3  ;;  %3222 = vmatprep.subr.bf16.mxu0 %v5679_v48  ;;  %v5766_v3 = vld [vmem:[#allocation8 + $0x2bc] ss:$48 sps:$4 sm:$0xff]   ;;  %v5769_v48 = vld [vmem:[#allocation8 + $0x2c4] ss:$48 sps:$4 sm:$0xff]  }
 0x393   : > { %3137 = vmatpush2.bf16.msra.mxu1 %v5674_v5  ;;  %3223 = vmatpush2.bf16.msra.mxu0 %v5677_v6  ;;  %v5764_v5 = vld [vmem:[#allocation8 + $0x2b8] ss:$48 sps:$4 sm:$0xff]   ;;  %v5767_v6 = vld [vmem:[#allocation8 + $0x2c0] ss:$48 sps:$4 sm:$0xff]  }
 0x394   : > { %3138 = vmatprep.subr.bf16.mxu1 %v5682_v7  ;;  %3224 = vmatprep.subr.bf16.mxu0 %v5685_v8  ;;  %v5772_v7 = vld [vmem:[#allocation8 + $0x25c] ss:$48 sps:$4 sm:$0xff]   ;;  %v5775_v8 = vld [vmem:[#allocation8 + $0x264] ss:$48 sps:$4 sm:$0xff]  }
 0x397   : > { %3139 = vmatpush2.bf16.msra.mxu1 %v5680_v49  ;;  %3225 = vmatpush2.bf16.msra.mxu0 %v5683_v43  ;;  %v5770_v49 = vld [vmem:[#allocation8 + $0x258] ss:$48 sps:$4 sm:$0xff]   ;;  %v5773_v43 = vld [vmem:[#allocation8 + $0x260] ss:$48 sps:$4 sm:$0xff]  }
 0x398   : > { %3140 = vmatprep.subr.bf16.mxu1 %v5688_v10  ;;  %3226 = vmatprep.subr.bf16.mxu0 %v5691_v33  ;;  %v5778_v10 = vld [vmem:[#allocation8 + $0x1fc] ss:$48 sps:$4 sm:$0xff]   ;;  %v5781_v33 = vld [vmem:[#allocation8 + $0x204] ss:$48 sps:$4 sm:$0xff]  }
 0x39b   : > { %3141 = vmatpush2.bf16.msra.mxu1 %v5686_v47  ;;  %3227 = vmatpush2.bf16.msra.mxu0 %v5689_v34  ;;  %v5776_v47 = vld [vmem:[#allocation8 + $0x1f8] ss:$48 sps:$4 sm:$0xff]   ;;  %v5779_v34 = vld [vmem:[#allocation8 + $0x200] ss:$48 sps:$4 sm:$0xff]  }
 0x39c   : > { %3142 = vmatprep.subr.bf16.mxu1 %v5694_v28  ;;  %3228 = vmatprep.subr.bf16.mxu0 %v5697_v35  ;;  %v5784_v28 = vld [vmem:[#allocation8 + $0x19c] ss:$48 sps:$4 sm:$0xff]   ;;  %v5787_v35 = vld [vmem:[#allocation8 + $0x1a4] ss:$48 sps:$4 sm:$0xff]  }
 0x39f   : > { %3143 = vmatpush2.bf16.msra.mxu1 %v5692_v36  ;;  %3229 = vmatpush2.bf16.msra.mxu0 %v5695_v37  ;;  %v5782_v36 = vld [vmem:[#allocation8 + $0x198] ss:$48 sps:$4 sm:$0xff]   ;;  %v5785_v37 = vld [vmem:[#allocation8 + $0x1a0] ss:$48 sps:$4 sm:$0xff]  }
 0x3a0   : > { %3144 = vmatprep.subr.bf16.mxu1 %v5700_v38  ;;  %3230 = vmatprep.subr.bf16.mxu0 %v5703_v39  ;;  %v5790_v38 = vld [vmem:[#allocation8 + $0x13c] ss:$48 sps:$4 sm:$0xff]   ;;  %v5793_v39 = vld [vmem:[#allocation8 + $0x144] ss:$48 sps:$4 sm:$0xff]  }
 0x3a3   : > { %3145 = vmatpush2.bf16.msra.mxu1 %v5698_v40  ;;  %3231 = vmatpush2.bf16.msra.mxu0 %v5701_v41  ;;  %v5788_v40 = vld [vmem:[#allocation8 + $0x138] ss:$48 sps:$4 sm:$0xff]   ;;  %v5791_v41 = vld [vmem:[#allocation8 + $0x140] ss:$48 sps:$4 sm:$0xff]  }
 0x3a4   : > { %3146 = vmatprep.subr.bf16.mxu1 %v5706_v63  ;;  %3232 = vmatprep.subr.bf16.mxu0 %v5709_v51  ;;  %v5796_v63 = vld [vmem:[#allocation8 + $0xdc] ss:$48 sps:$4 sm:$0xff]   ;;  %v5799_v51 = vld [vmem:[#allocation8 + $0xe4] ss:$48 sps:$4 sm:$0xff]  }
 0x3a7   : > { %3147 = vmatpush2.bf16.msra.mxu1 %v5704_v52  ;;  %3233 = vmatpush2.bf16.msra.mxu0 %v5707_v4  ;;  %v5794_v52 = vld [vmem:[#allocation8 + $0xd8] ss:$48 sps:$4 sm:$0xff]   ;;  %v5797_v4 = vld [vmem:[#allocation8 + $0xe0] ss:$48 sps:$4 sm:$0xff]  }
 0x3a8   : > { %3148 = vmatprep.subr.bf16.mxu1 %v5712_v53  ;;  %3234 = vmatprep.subr.bf16.mxu0 %v5715_v54  ;;  %v5802_v53 = vld [vmem:[#allocation8 + $0x7c] ss:$48 sps:$4 sm:$0xff]   ;;  %v5805_v54 = vld [vmem:[#allocation8 + $0x84] ss:$48 sps:$4 sm:$0xff]  }
 0x3ab   : > { %3149 = vmatpush2.bf16.msra.mxu1 %v5710_v55  ;;  %3235 = vmatpush2.bf16.msra.mxu0 %v5713_v56  ;;  %v5800_v55 = vld [vmem:[#allocation8 + $0x78] ss:$48 sps:$4 sm:$0xff]   ;;  %v5803_v56 = vld [vmem:[#allocation8 + $0x80] ss:$48 sps:$4 sm:$0xff]  }
 0x3ac   : > { %3247 = vmatprep.subr.bf16.mxu1 %v5718_v58  ;;  %3333 = vmatprep.subr.bf16.mxu0 %v5721_v9  ;;  %v5808_v58 = vld [vmem:[#allocation8 + $0x1c] ss:$48 sps:$4 sm:$0xff]   ;;  %v5811_v9 = vld [vmem:[#allocation8 + $0x24] ss:$48 sps:$4 sm:$0xff]  }
 0x3ae   : > { %3151 = vmatmul.mubr.bf16.vlgmr.msra.gmra.mxu1 %v6864_v11  ;;  %3237 = vmatmul.mubr.bf16.vlgmr.msra.gmra.mxu0 %v6864_v11 }
 0x3af   : > { %3248 = vmatpush1.bf16.msra.mxu1 %v5716_v59  ;;  %3334 = vmatpush1.bf16.msra.mxu0 %v5719_v60  ;;  %v5806_v59 = vld [vmem:[#allocation8 + $0x18] ss:$48 sps:$4 sm:$0xff]   ;;  %v5809_v60 = vld [vmem:[#allocation8 + $0x20] ss:$48 sps:$4 sm:$0xff]  }
 0x3b0   : > { %3249 = vmatprep.subr.bf16.mxu1 %v5724_v61  ;;  %3335 = vmatprep.subr.bf16.mxu0 %v5727_v62  ;;  %v5814_v61 = vld [vmem:[#allocation8 + $0x5bc] ss:$48 sps:$4 sm:$0xff]   ;;  %v5817_v62 = vld [vmem:[#allocation8 + $0x5c4] ss:$48 sps:$4 sm:$0xff]  }
 0x3b1   : > { %3279 = vmatprep.mubr.bf16.mxu1 %v6530_v0  ;;  %3365 = vmatprep.mubr.bf16.mxu0 %v6530_v0 }
 0x3b3   : > { %3250 = vmatpush1.bf16.msra.mxu1 %v5722_v12  ;;  %3336 = vmatpush1.bf16.msra.mxu0 %v5725_v13  ;;  %v5812_v12 = vld [vmem:[#allocation8 + $0x5b8] ss:$48 sps:$4 sm:$0xff]   ;;  %v5815_v13 = vld [vmem:[#allocation8 + $0x5c0] ss:$48 sps:$4 sm:$0xff]  }
 0x3b4   : > { %3251 = vmatprep.subr.bf16.mxu1 %v5730_v14  ;;  %3337 = vmatprep.subr.bf16.mxu0 %v5733_v15  ;;  %v5820_v14 = vld [vmem:[#allocation8 + $0x55c] ss:$48 sps:$4 sm:$0xff]   ;;  %v5823_v15 = vld [vmem:[#allocation8 + $0x564] ss:$48 sps:$4 sm:$0xff]  }
 0x3b7   : > { %3252 = vmatpush1.bf16.msra.mxu1 %v5728_v16  ;;  %3338 = vmatpush1.bf16.msra.mxu0 %v5731_v17  ;;  %v5818_v16 = vld [vmem:[#allocation8 + $0x558] ss:$48 sps:$4 sm:$0xff]   ;;  %v5821_v17 = vld [vmem:[#allocation8 + $0x560] ss:$48 sps:$4 sm:$0xff]  }
 0x3b8   : > { %3253 = vmatprep.subr.bf16.mxu1 %v5736_v18  ;;  %3339 = vmatprep.subr.bf16.mxu0 %v5739_v19  ;;  %v5826_v18 = vld [vmem:[#allocation8 + $0x4fc] ss:$48 sps:$4 sm:$0xff]   ;;  %v5829_v19 = vld [vmem:[#allocation8 + $0x504] ss:$48 sps:$4 sm:$0xff]  }
 0x3bb   : > { %3254 = vmatpush1.bf16.msra.mxu1 %v5734_v20  ;;  %3340 = vmatpush1.bf16.msra.mxu0 %v5737_v21  ;;  %v5824_v20 = vld [vmem:[#allocation8 + $0x4f8] ss:$48 sps:$4 sm:$0xff]   ;;  %v5827_v21 = vld [vmem:[#allocation8 + $0x500] ss:$48 sps:$4 sm:$0xff]  }
 0x3bc   : > { %3255 = vmatprep.subr.bf16.mxu1 %v5742_v22  ;;  %3341 = vmatprep.subr.bf16.mxu0 %v5745_v23  ;;  %v5832_v22 = vld [vmem:[#allocation8 + $0x49c] ss:$48 sps:$4 sm:$0xff]   ;;  %v5835_v23 = vld [vmem:[#allocation8 + $0x4a4] ss:$48 sps:$4 sm:$0xff]  }
 0x3bf   : > { %3256 = vmatpush1.bf16.msra.mxu1 %v5740_v24  ;;  %3342 = vmatpush1.bf16.msra.mxu0 %v5743_v25  ;;  %v5830_v24 = vld [vmem:[#allocation8 + $0x498] ss:$48 sps:$4 sm:$0xff]   ;;  %v5833_v25 = vld [vmem:[#allocation8 + $0x4a0] ss:$48 sps:$4 sm:$0xff]  }
 0x3c0   : > { %3257 = vmatprep.subr.bf16.mxu1 %v5748_v26  ;;  %3343 = vmatprep.subr.bf16.mxu0 %v5751_v27  ;;  %v5838_v26 = vld [vmem:[#allocation8 + $0x43c] ss:$48 sps:$4 sm:$0xff]   ;;  %v5841_v27 = vld [vmem:[#allocation8 + $0x444] ss:$48 sps:$4 sm:$0xff]  }
 0x3c3   : > { %3258 = vmatpush1.bf16.msra.mxu1 %v5746_v42  ;;  %3344 = vmatpush1.bf16.msra.mxu0 %v5749_v44  ;;  %v5836_v42 = vld [vmem:[#allocation8 + $0x438] ss:$48 sps:$4 sm:$0xff]   ;;  %v5839_v44 = vld [vmem:[#allocation8 + $0x440] ss:$48 sps:$4 sm:$0xff]  }
 0x3c4   : > { %3259 = vmatprep.subr.bf16.mxu1 %v5754_v29  ;;  %3345 = vmatprep.subr.bf16.mxu0 %v5757_v30  ;;  %v5844_v29 = vld [vmem:[#allocation8 + $0x3dc] ss:$48 sps:$4 sm:$0xff]   ;;  %v5847_v30 = vld [vmem:[#allocation8 + $0x3e4] ss:$48 sps:$4 sm:$0xff]  }
 0x3c7   : > { %3260 = vmatpush1.bf16.msra.mxu1 %v5752_v46  ;;  %3346 = vmatpush1.bf16.msra.mxu0 %v5755_v31  ;;  %v5842_v46 = vld [vmem:[#allocation8 + $0x3d8] ss:$48 sps:$4 sm:$0xff]   ;;  %v5845_v31 = vld [vmem:[#allocation8 + $0x3e0] ss:$48 sps:$4 sm:$0xff]  }
 0x3c8   : > { %3261 = vmatprep.subr.bf16.mxu1 %v5760_v45  ;;  %3347 = vmatprep.subr.bf16.mxu0 %v5763_v32  ;;  %v5850_v45 = vld [vmem:[#allocation8 + $0x37c] ss:$48 sps:$4 sm:$0xff]   ;;  %v5853_v32 = vld [vmem:[#allocation8 + $0x384] ss:$48 sps:$4 sm:$0xff]  }
 0x3cb   : > { %3262 = vmatpush1.bf16.msra.mxu1 %v5758_v1  ;;  %3348 = vmatpush1.bf16.msra.mxu0 %v5761_v2  ;;  %v5848_v1 = vld [vmem:[#allocation8 + $0x378] ss:$48 sps:$4 sm:$0xff]   ;;  %v5851_v2 = vld [vmem:[#allocation8 + $0x380] ss:$48 sps:$4 sm:$0xff]  }
 0x3cc   : > { %3290 = vmatprep.subr.bf16.mxu1 %v5766_v3  ;;  %3376 = vmatprep.subr.bf16.mxu0 %v5769_v48  ;;  %v5856_v3 = vld [vmem:[#allocation8 + $0x31c] ss:$48 sps:$4 sm:$0xff]   ;;  %v5859_v48 = vld [vmem:[#allocation8 + $0x324] ss:$48 sps:$4 sm:$0xff]  }
 0x3ce   : > { %3280 = vmatmul.mubr.bf16.vlgmr.msra.gmra.mxu1 %v6942_v57  ;;  %3366 = vmatmul.mubr.bf16.vlgmr.msra.gmra.mxu0 %v6942_v57 }
 0x3cf   : > { %3291 = vmatpush1.bf16.msra.mxu1 %v5764_v5  ;;  %3322 = vmatprep.mubr.bf16.mxu1 %v6924_v50  ;;  %v5854_v5 = vld [vmem:[#allocation8 + $0x318] ss:$48 sps:$4 sm:$0xff]  }
 0x3d0   : > { %3377 = vmatpush1.bf16.msra.mxu0 %v5767_v6  ;;  %3408 = vmatprep.mubr.bf16.mxu0 %v6924_v50  ;;  %v5857_v6 = vld [vmem:[#allocation8 + $0x320] ss:$48 sps:$4 sm:$0xff]  }
 0x3d1   : > { %3292 = vmatprep.subr.bf16.mxu1 %v5772_v7  ;;  %3378 = vmatprep.subr.bf16.mxu0 %v5775_v8  ;;  %v5862_v7 = vld [vmem:[#allocation8 + $0x8c4] ss:$48 sps:$4 sm:$0xff]   ;;  %v5865_v8 = vld [vmem:[#allocation8 + $0x8cc] ss:$48 sps:$4 sm:$0xff]  }
 0x3d3   : > { %3293 = vmatpush1.bf16.msra.mxu1 %v5770_v49  ;;  %v5860_v49 = vld [vmem:[#allocation8 + $0x8c0] ss:$48 sps:$4 sm:$0xff]  }
 0x3d4   : > { %3379 = vmatpush1.bf16.msra.mxu0 %v5773_v43  ;;  %3294 = vmatprep.subr.bf16.mxu1 %v5778_v10  ;;  %v5863_v43 = vld [vmem:[#allocation8 + $0x8c8] ss:$48 sps:$4 sm:$0xff]   ;;  %v5868_v10 = vld [vmem:[#allocation8 + $0x864] ss:$48 sps:$4 sm:$0xff]  }
 0x3d5   : > { %3380 = vmatprep.subr.bf16.mxu0 %v5781_v33  ;;  %v5871_v33 = vld [vmem:[#allocation8 + $0x86c] ss:$48 sps:$4 sm:$0xff]  }
 0x3d7   : > { %3295 = vmatpush1.bf16.msra.mxu1 %v5776_v47  ;;  %v5866_v47 = vld [vmem:[#allocation8 + $0x860] ss:$48 sps:$4 sm:$0xff]  }
 0x3d8   : > { %3381 = vmatpush1.bf16.msra.mxu0 %v5779_v34  ;;  %3296 = vmatprep.subr.bf16.mxu1 %v5784_v28  ;;  %v5869_v34 = vld [vmem:[#allocation8 + $0x868] ss:$48 sps:$4 sm:$0xff]   ;;  %v5874_v28 = vld [vmem:[#allocation8 + $0x804] ss:$48 sps:$4 sm:$0xff]  }
 0x3d9   : > { %3382 = vmatprep.subr.bf16.mxu0 %v5787_v35  ;;  %v5877_v35 = vld [vmem:[#allocation8 + $0x80c] ss:$48 sps:$4 sm:$0xff]  }
 0x3db   : > { %3297 = vmatpush1.bf16.msra.mxu1 %v5782_v36  ;;  %v5872_v36 = vld [vmem:[#allocation8 + $0x800] ss:$48 sps:$4 sm:$0xff]  }
 0x3dc   : > { %3383 = vmatpush1.bf16.msra.mxu0 %v5785_v37  ;;  %3298 = vmatprep.subr.bf16.mxu1 %v5790_v38  ;;  %v5875_v37 = vld [vmem:[#allocation8 + $0x808] ss:$48 sps:$4 sm:$0xff]   ;;  %v5880_v38 = vld [vmem:[#allocation8 + $0x7a4] ss:$48 sps:$4 sm:$0xff]  }
 0x3dd   : > { %3384 = vmatprep.subr.bf16.mxu0 %v5793_v39  ;;  %v5883_v39 = vld [vmem:[#allocation8 + $0x7ac] ss:$48 sps:$4 sm:$0xff]  }
 0x3df   : > { %3299 = vmatpush1.bf16.msra.mxu1 %v5788_v40  ;;  %v5878_v40 = vld [vmem:[#allocation8 + $0x7a0] ss:$48 sps:$4 sm:$0xff]  }
 0x3e0   : > { %3385 = vmatpush1.bf16.msra.mxu0 %v5791_v41  ;;  %3300 = vmatprep.subr.bf16.mxu1 %v5796_v63  ;;  %v5881_v41 = vld [vmem:[#allocation8 + $0x7a8] ss:$48 sps:$4 sm:$0xff]   ;;  %v5886_v63 = vld [vmem:[#allocation8 + $0x744] ss:$48 sps:$4 sm:$0xff]  }
 0x3e1   : > { %3386 = vmatprep.subr.bf16.mxu0 %v5799_v51  ;;  %v5889_v51 = vld [vmem:[#allocation8 + $0x74c] ss:$48 sps:$4 sm:$0xff]  }
 0x3e3   : > { %3301 = vmatpush1.bf16.msra.mxu1 %v5794_v52  ;;  %v5884_v52 = vld [vmem:[#allocation8 + $0x740] ss:$48 sps:$4 sm:$0xff]  }
 0x3e4   : > { %3387 = vmatpush1.bf16.msra.mxu0 %v5797_v4  ;;  %3302 = vmatprep.subr.bf16.mxu1 %v5802_v53  ;;  %v5887_v4 = vld [vmem:[#allocation8 + $0x748] ss:$48 sps:$4 sm:$0xff]   ;;  %v5892_v53 = vld [vmem:[#allocation8 + $0x6e4] ss:$48 sps:$4 sm:$0xff]  }
 0x3e5   : > { %3388 = vmatprep.subr.bf16.mxu0 %v5805_v54  ;;  %v5895_v54 = vld [vmem:[#allocation8 + $0x6ec] ss:$48 sps:$4 sm:$0xff]  }
 0x3e7   : > { %3303 = vmatpush1.bf16.msra.mxu1 %v5800_v55  ;;  %v5890_v55 = vld [vmem:[#allocation8 + $0x6e0] ss:$48 sps:$4 sm:$0xff]  }
 0x3e8   : > { %3389 = vmatpush1.bf16.msra.mxu0 %v5803_v56  ;;  %3304 = vmatprep.subr.bf16.mxu1 %v5808_v58  ;;  %v5893_v56 = vld [vmem:[#allocation8 + $0x6e8] ss:$48 sps:$4 sm:$0xff]   ;;  %v5898_v58 = vld [vmem:[#allocation8 + $0x684] ss:$48 sps:$4 sm:$0xff]  }
 0x3e9   : > { %3390 = vmatprep.subr.bf16.mxu0 %v5811_v9  ;;  %v5901_v9 = vld [vmem:[#allocation8 + $0x68c] ss:$48 sps:$4 sm:$0xff]  }
 0x3eb   : > { %3305 = vmatpush1.bf16.msra.mxu1 %v5806_v59  ;;  %v5896_v59 = vld [vmem:[#allocation8 + $0x680] ss:$48 sps:$4 sm:$0xff]  }
 0x3ec   : > { %3391 = vmatpush1.bf16.msra.mxu0 %v5809_v60  ;;  %3306 = vmatprep.subr.bf16.mxu1 %v5814_v61  ;;  %v5899_v60 = vld [vmem:[#allocation8 + $0x688] ss:$48 sps:$4 sm:$0xff]   ;;  %v5904_v61 = vld [vmem:[#allocation8 + $0x624] ss:$48 sps:$4 sm:$0xff]  }
 0x3ed   : > { %3392 = vmatprep.subr.bf16.mxu0 %v5817_v62  ;;  %v5907_v62 = vld [vmem:[#allocation8 + $0x62c] ss:$48 sps:$4 sm:$0xff]  }
 0x3ef   : > { %3307 = vmatpush2.bf16.msra.mxu1 %v5812_v12  ;;  %v5902_v12 = vld [vmem:[#allocation8 + $0x620] ss:$48 sps:$4 sm:$0xff]  }
 0x3f0   : > { %3393 = vmatpush2.bf16.msra.mxu0 %v5815_v13  ;;  %3308 = vmatprep.subr.bf16.mxu1 %v5820_v14  ;;  %v5905_v13 = vld [vmem:[#allocation8 + $0x628] ss:$48 sps:$4 sm:$0xff]   ;;  %v5910_v14 = vld [vmem:[#allocation8 + $0x2cc] ss:$48 sps:$4 sm:$0xff]  }
 0x3f1   : > { %3394 = vmatprep.subr.bf16.mxu0 %v5823_v15  ;;  %v6960_v15 = vld [vmem:[#allocation7 + $0xe4] ss:$16 sps:$4 sm:$0xff]  }
 0x3f3   : > { %3309 = vmatpush2.bf16.msra.mxu1 %v5818_v16  ;;  %v5908_v16 = vld [vmem:[#allocation8 + $0x2c8] ss:$48 sps:$4 sm:$0xff]  }
 0x3f4   : > { %3395 = vmatpush2.bf16.msra.mxu0 %v5821_v17  ;;  %3310 = vmatprep.subr.bf16.mxu1 %v5826_v18  ;;  %v5913_v17 = vld [vmem:[#allocation8 + $0x26c] ss:$48 sps:$4 sm:$0xff]   ;;  %v6962_v18 = vld [vmem:[#allocation7 + $0xe0] ss:$16 sps:$4 sm:$0xff]  }
 0x3f5   : > { %3396 = vmatprep.subr.bf16.mxu0 %v5829_v19  ;;  %v6966_v19 = vld [vmem:[#allocation7 + $0xc4] ss:$16 sps:$4 sm:$0xff]  }
 0x3f7   : > { %3311 = vmatpush2.bf16.msra.mxu1 %v5824_v20  ;;  %v5911_v20 = vld [vmem:[#allocation8 + $0x268] ss:$48 sps:$4 sm:$0xff]  }
 0x3f8   : > { %3397 = vmatpush2.bf16.msra.mxu0 %v5827_v21  ;;  %3312 = vmatprep.subr.bf16.mxu1 %v5832_v22  ;;  %v5916_v21 = vld [vmem:[#allocation8 + $0x20c] ss:$48 sps:$4 sm:$0xff]   ;;  %v6971_v22 = vld [vmem:[#allocation7 + $0xc0] ss:$16 sps:$4 sm:$0xff]  }
 0x3f9   : > { %3398 = vmatprep.subr.bf16.mxu0 %v5835_v23  ;;  %v6975_v23 = vld [vmem:[#allocation7 + $0xa4] ss:$16 sps:$4 sm:$0xff]  }
 0x3fb   : > { %3313 = vmatpush2.bf16.msra.mxu1 %v5830_v24  ;;  %v5914_v24 = vld [vmem:[#allocation8 + $0x208] ss:$48 sps:$4 sm:$0xff]  }
 0x3fc   : > { %3399 = vmatpush2.bf16.msra.mxu0 %v5833_v25  ;;  %3314 = vmatprep.subr.bf16.mxu1 %v5838_v26  ;;  %v6978_v25 = vld [vmem:[#allocation7 + $0xa0] ss:$16 sps:$4 sm:$0xff]   ;;  %v5917_v26 = vld [vmem:[#allocation8 + $0x1a8] ss:$48 sps:$4 sm:$0xff]  }
 0x3fd   : > { %3400 = vmatprep.subr.bf16.mxu0 %v5841_v27  ;;  %v5922_v27 = vld [vmem:[#allocation8 + $0x14c] ss:$48 sps:$4 sm:$0xff]  }
 0x3ff   : > { %3315 = vmatpush2.bf16.msra.mxu1 %v5836_v42  ;;  %v6984_v42 = vld [vmem:[#allocation7 + $0x80] ss:$16 sps:$4 sm:$0xff]  }
 0x400   : > { %3401 = vmatpush2.bf16.msra.mxu0 %v5839_v44  ;;  %3316 = vmatprep.subr.bf16.mxu1 %v5844_v29  ;;  %v6987_v44 = vld [vmem:[#allocation7 + $0x64] ss:$16 sps:$4 sm:$0xff]   ;;  %v5920_v29 = vld [vmem:[#allocation8 + $0x148] ss:$48 sps:$4 sm:$0xff]  }
 0x401   : > { %3402 = vmatprep.subr.bf16.mxu0 %v5847_v30  ;;  %v5925_v30 = vld [vmem:[#allocation8 + $0xec] ss:$48 sps:$4 sm:$0xff]  }
 0x403   : > { %3317 = vmatpush2.bf16.msra.mxu1 %v5842_v46  ;;  %v6990_v46 = vld [vmem:[#allocation7 + $0x60] ss:$16 sps:$4 sm:$0xff]  }
 0x404   : > { %3403 = vmatpush2.bf16.msra.mxu0 %v5845_v31  ;;  %3318 = vmatprep.subr.bf16.mxu1 %v5850_v45  ;;  %v6993_v31 = vld [vmem:[#allocation7 + $0x44] ss:$16 sps:$4 sm:$0xff]   ;;  %v5923_v45 = vld [vmem:[#allocation8 + $0xe8] ss:$48 sps:$4 sm:$0xff]  }
 0x405   : > { %3404 = vmatprep.subr.bf16.mxu0 %v5853_v32  ;;  %v5928_v32 = vld [vmem:[#allocation8 + $0x8c] ss:$48 sps:$4 sm:$0xff]  }
 0x407   : > { %3319 = vmatpush2.bf16.msra.mxu1 %v5848_v1  ;;  %v6996_v1 = vld [vmem:[#allocation7 + $0x40] ss:$16 sps:$4 sm:$0xff]  }
 0x408   : > { %3405 = vmatpush2.bf16.msra.mxu0 %v5851_v2  ;;  %3320 = vmatprep.subr.bf16.mxu1 %v5856_v3  ;;  %v6999_v2 = vld [vmem:[#allocation7 + $0x24] ss:$16 sps:$4 sm:$0xff]   ;;  %v5926_v3 = vld [vmem:[#allocation8 + $0x88] ss:$48 sps:$4 sm:$0xff]  }
 0x409   : > { %3406 = vmatprep.subr.bf16.mxu0 %v5859_v48  ;;  %v5931_v48 = vld [vmem:[#allocation8 + $0x2c] ss:$48 sps:$4 sm:$0xff]  }
 0x40b   : > { %3321 = vmatpush2.bf16.msra.mxu1 %v5854_v5  ;;  %v7002_v5 = vld [vmem:[#allocation7 + $0x20] ss:$16 sps:$4 sm:$0xff]  }
 0x40c   : > { %3407 = vmatpush2.bf16.msra.mxu0 %v5857_v6  ;;  %3419 = vmatprep.subr.bf16.mxu1 %v5862_v7  ;;  %v7005_v6 = vld [vmem:[#allocation7 + $0x4] ss:$16 sps:$4 sm:$0xff]   ;;  %v5929_v7 = vld [vmem:[#allocation8 + $0x28] ss:$48 sps:$4 sm:$0xff]  }
 0x40d   : > { %3505 = vmatprep.subr.bf16.mxu0 %v5865_v8  ;;  %v5934_v8 = vld [vmem:[#allocation8 + $0x5cc] ss:$48 sps:$4 sm:$0xff]  }
 0x40e   : > { %3323 = vmatmul.mubr.bf16.vlgmr.msra.gmra.mxu1 %v6864_v11 }
 0x40f   : > { %3409 = vmatmul.mubr.bf16.vlgmr.msra.gmra.mxu0 %v6864_v11  ;;  %3420 = vmatpush1.bf16.msra.mxu1 %v5860_v49  ;;  %v7008_v49 = vld [vmem:[#allocation7] ss:$16 sps:$4 sm:$0xff]  }
 0x410   : > { %3506 = vmatpush1.bf16.msra.mxu0 %v5863_v43  ;;  %3421 = vmatprep.subr.bf16.mxu1 %v5868_v10  ;;  %v5932_v43 = vld [vmem:[#allocation8 + $0x5c8] ss:$48 sps:$4 sm:$0xff]   ;;  %v5937_v10 = vld [vmem:[#allocation8 + $0x56c] ss:$48 sps:$4 sm:$0xff]  }
 0x411   : > { %3507 = vmatprep.subr.bf16.mxu0 %v5871_v33  ;;  %3451 = vmatprep.mubr.bf16.mxu1 %v6530_v0  ;;  %v5935_v33 = vld [vmem:[#allocation8 + $0x568] ss:$48 sps:$4 sm:$0xff]  }
 0x412   : > { %3537 = vmatprep.mubr.bf16.mxu0 %v6530_v0 }
 0x413   : > { %3422 = vmatpush1.bf16.msra.mxu1 %v5866_v47  ;;  %v5940_v47 = vld [vmem:[#allocation8 + $0x50c] ss:$48 sps:$4 sm:$0xff]  }
 0x414   : > { %3508 = vmatpush1.bf16.msra.mxu0 %v5869_v34  ;;  %3423 = vmatprep.subr.bf16.mxu1 %v5874_v28  ;;  %v5938_v34 = vld [vmem:[#allocation8 + $0x508] ss:$48 sps:$4 sm:$0xff]   ;;  %v5943_v28 = vld [vmem:[#allocation8 + $0x4ac] ss:$48 sps:$4 sm:$0xff]  }
 0x415   : > { %3509 = vmatprep.subr.bf16.mxu0 %v5877_v35 }
 0x417   : > { %3424 = vmatpush1.bf16.msra.mxu1 %v5872_v36  ;;  %v5941_v36 = vld [vmem:[#allocation8 + $0x4a8] ss:$48 sps:$4 sm:$0xff]  }
 0x418   : > { %3510 = vmatpush1.bf16.msra.mxu0 %v5875_v37  ;;  %3425 = vmatprep.subr.bf16.mxu1 %v5880_v38  ;;  %v5946_v37 = vld [vmem:[#allocation8 + $0x44c] ss:$48 sps:$4 sm:$0xff]   ;;  %v3066_v38 = vpop.f32.mrf.mxu0 }
 0x419   : > { %3511 = vmatprep.subr.bf16.mxu0 %v5883_v39 }
 0x41b   : > { %3426 = vmatpush1.bf16.msra.mxu1 %v5878_v40  ;;  %v5944_v40 = vld [vmem:[#allocation8 + $0x448] ss:$48 sps:$4 sm:$0xff]  }
 0x41c   : > { %3512 = vmatpush1.bf16.msra.mxu0 %v5881_v41  ;;  %3427 = vmatprep.subr.bf16.mxu1 %v5886_v63  ;;  %v5949_v41 = vld [vmem:[#allocation8 + $0x3ec] ss:$48 sps:$4 sm:$0xff]   ;;  %v3068_v63 = vpop.f32.mrf.mxu0 }
 0x41d   : > { %3513 = vmatprep.subr.bf16.mxu0 %v5889_v51 }
 0x41f   : > { %3428 = vmatpush1.bf16.msra.mxu1 %v5884_v52  ;;  %v5947_v52 = vld [vmem:[#allocation8 + $0x3e8] ss:$48 sps:$4 sm:$0xff]  }
 0x420   : > { %3514 = vmatpush1.bf16.msra.mxu0 %v5887_v4  ;;  %3429 = vmatprep.subr.bf16.mxu1 %v5892_v53  ;;  %v5952_v4 = vld [vmem:[#allocation8 + $0x38c] ss:$48 sps:$4 sm:$0xff]   ;;  %v3070_v53 = vpop.f32.mrf.mxu0 }
 0x421   : > { %3515 = vmatprep.subr.bf16.mxu0 %v5895_v54 }
 0x423   : > { %3430 = vmatpush1.bf16.msra.mxu1 %v5890_v55 }
 0x424   : > { %3516 = vmatpush1.bf16.msra.mxu0 %v5893_v56  ;;  %3431 = vmatprep.subr.bf16.mxu1 %v5898_v58  ;;  %v5950_v56 = vld [vmem:[#allocation8 + $0x388] ss:$48 sps:$4 sm:$0xff]  }
 0x425   : > { %3517 = vmatprep.subr.bf16.mxu0 %v5901_v9  ;;  %v5955_v9 = vld [vmem:[#allocation8 + $0x32c] ss:$48 sps:$4 sm:$0xff]  }
 0x427   : > { %3432 = vmatpush1.bf16.msra.mxu1 %v5896_v59  ;;  %v3072_v59 = vpop.f32.mrf.mxu0 }
 0x428   : > { %3518 = vmatpush1.bf16.msra.mxu0 %v5899_v60  ;;  %3433 = vmatprep.subr.bf16.mxu1 %v5904_v61 }
 0x429   : > { %3519 = vmatprep.subr.bf16.mxu0 %v5907_v62  ;;  %v5953_v62 = vld [vmem:[#allocation8 + $0x328] ss:$48 sps:$4 sm:$0xff]  }
 0x42b   : > { %3434 = vmatpush1.bf16.msra.mxu1 %v5902_v12 }
 0x42c   : > { %3520 = vmatpush1.bf16.msra.mxu0 %v5905_v13  ;;  %3462 = vmatprep.subr.bf16.mxu1 %v5910_v14 }
 0x42d   : > { %3828 = vmatprep.subr.bf16.mxu0 %v6960_v15 }
 0x42e   : > { %3452 = vmatmul.mubr.bf16.vlgmr.msra.gmra.mxu1 %v6942_v57  ;;  %v3109_v35 = vpop.f32.mrf.mxu1  ;;  %v3195_v13 = vpop.f32.mrf.mxu0 }
 0x42f   : > { %3538 = vmatmul.mubr.bf16.vlgmr.msra.gmra.mxu0 %v6942_v57  ;;  %3463 = vmatpush1.bf16.msra.mxu1 %v5908_v16  ;;  %v5919_v57 = vld [vmem:[#allocation8 + $0x1ac] ss:$48 sps:$4 sm:$0xff]   ;;  %v3110_v58 = vadd.f32 %v3109_v35, %v3066_v38  ;;  %v7040_v38 = vld [vmem:[#allocation7 + $0x68] ss:$16 sps:$4 sm:$0xff]  }
 0x430   : > { %3494 = vmatprep.mubr.bf16.mxu1 %v6924_v50  ;;  %3464 = vmatprep.subr.bf16.mxu1 %v5913_v17  ;;  %v6981_v50 = vld [vmem:[#allocation7 + $0x84] ss:$16 sps:$4 sm:$0xff]   ;;  %v3111_v39 = vpop.f32.mrf.mxu1  ;;  %v7012_v16 = vld [vmem:[#allocation7 + $0xec] ss:$16 sps:$4 sm:$0xff]  }
 0x431   : > { %3829 = vmatpush1.bf16.msra.mxu0 %v6962_v18  ;;  %3860 = vmatprep.mubr.bf16.mxu0 %v6530_v0  ;;  %v3112_v54 = vadd.f32 %v3111_v39, %v3068_v63  ;;  %v3628_v12 = vmul.f32 0.5, %v3110_v58 }
 0x432   : > { %3830 = vmatprep.subr.bf16.mxu0 %v6966_v19  ;;  %v3113_v51 = vpop.f32.mrf.mxu1 }
 0x433   : > { %3465 = vmatpush1.bf16.msra.mxu1 %v5911_v20  ;;  %v3629_v60 = vmul.f32 0.5, %v3112_v54  ;;  %v3114_v14 = vadd.f32 %v3113_v51, %v3070_v53  ;;  %v7014_v20 = vld [vmem:[#allocation7 + $0xe8] ss:$16 sps:$4 sm:$0xff]  }
 0x434   : > { %3466 = vmatprep.subr.bf16.mxu1 %v5916_v21  ;;  %v3115_v55 = vpop.f32.mrf.mxu1  ;;  %v3197_v21 = vpop.f32.mrf.mxu0  ;;  %v7046_v53 = vld [vmem:[#allocation7 + $0x48] ss:$16 sps:$4 sm:$0xff]  }
 0x435   : > { %3831 = vmatpush1.bf16.msra.mxu0 %v6971_v22  ;;  %v3116_v61 = vadd.f32 %v3115_v55, %v3072_v59  ;;  %6152 = vtanh.f32 %v3629_v60 }
 0x436   : > { %3832 = vmatprep.subr.bf16.mxu0 %v6975_v23  ;;  %6154 = vtanh.f32 %v3628_v12 }
 0x437   : > { %3467 = vmatpush1.bf16.msra.mxu1 %v5914_v24  ;;  %v3632_v17 = vmul.f32 0.5, %v3116_v61  ;;  %v3631_v24 = vmul.f32 0.5, %v3114_v14  ;;  %v7052_v61 = vld [vmem:[#allocation7 + $0x28] ss:$16 sps:$4 sm:$0xff]  }
 0x438   : > { %3468 = vmatprep.subr.bf16.mxu1 %v5919_v57  ;;  %v7017_v57 = vld [vmem:[#allocation7 + $0xcc] ss:$16 sps:$4 sm:$0xff]  }
 0x439   : > { %3833 = vmatpush1.bf16.msra.mxu0 %v6978_v25  ;;  %6156 = vtanh.f32 %v3632_v17 }
 0x43a   : > { %3834 = vmatprep.subr.bf16.mxu0 %v6981_v50  ;;  %6158 = vtanh.f32 %v3631_v24  ;;  %v7060_v24 = vld [vmem:[#allocation7 + $0x8] ss:$16 sps:$4 sm:$0xff]  }
 0x43b   : > { %3469 = vmatpush1.bf16.msra.mxu1 %v5917_v26 }
 0x43c   : > { %3470 = vmatprep.subr.bf16.mxu1 %v5922_v27  ;;  %v7021_v27 = vld [vmem:[#allocation7 + $0xc8] ss:$16 sps:$4 sm:$0xff]  }
 0x43d   : > { %3835 = vmatpush1.bf16.msra.mxu0 %v6984_v42 }
 0x43e   : > { %3836 = vmatprep.subr.bf16.mxu0 %v6987_v44 }
 0x43f   : > { %3471 = vmatpush1.bf16.msra.mxu1 %v5920_v29  ;;  %v3199_v29 = vpop.f32.mrf.mxu0 }
 0x440   : > { %3472 = vmatprep.subr.bf16.mxu1 %v5925_v30 }
 0x441   : > { %3837 = vmatpush1.bf16.msra.mxu0 %v6990_v46 }
 0x442   : > { %3838 = vmatprep.subr.bf16.mxu0 %v6993_v31 }
 0x443   : > { %3473 = vmatpush1.bf16.msra.mxu1 %v5923_v45  ;;  %v7025_v45 = vld [vmem:[#allocation7 + $0xac] ss:$16 sps:$4 sm:$0xff]  }
 0x444   : > { %3474 = vmatprep.subr.bf16.mxu1 %v5928_v32 }
 0x445   : > { %3839 = vmatpush1.bf16.msra.mxu0 %v6996_v1 }
 0x446   : > { %3840 = vmatprep.subr.bf16.mxu0 %v6999_v2 }
 0x447   : > { %3475 = vmatpush1.bf16.msra.mxu1 %v5926_v3 }
 0x448   : > { %3476 = vmatprep.subr.bf16.mxu1 %v5931_v48  ;;  %v7028_v48 = vld [vmem:[#allocation7 + $0xa8] ss:$16 sps:$4 sm:$0xff]  }
 0x449   : > { %3841 = vmatpush1.bf16.msra.mxu0 %v7002_v5 }
 0x44a   : > { %3842 = vmatprep.subr.bf16.mxu0 %v7005_v6 }
 0x44b   : > { %3477 = vmatpush1.bf16.msra.mxu1 %v5929_v7 }
 0x44c   : > { %3478 = vmatprep.subr.bf16.mxu1 %v5934_v8  ;;  %v7031_v8 = vld [vmem:[#allocation7 + $0x8c] ss:$16 sps:$4 sm:$0xff]  }
 0x44d   : > { %3843 = vmatpush1.bf16.msra.mxu0 %v7008_v49 }
 0x44f   : > { %3479 = vmatpush2.bf16.msra.mxu1 %v5932_v43 }
 0x450   : > { %3480 = vmatprep.subr.bf16.mxu1 %v5937_v10  ;;  %v6153_v10 = vpop.eup %6152 }
 0x451   : > { %v3641_v35 = vmul.f32 0.5, %v6153_v10 }
 0x453   : > { %3481 = vmatpush2.bf16.msra.mxu1 %v5935_v33  ;;  %v7034_v33 = vld [vmem:[#allocation7 + $0x88] ss:$16 sps:$4 sm:$0xff]   ;;  %v3647_v51 = vadd.f32 0.5, %v3641_v35 }
 0x454   : > { %3482 = vmatprep.subr.bf16.mxu1 %v5940_v47  ;;  %v7037_v47 = vld [vmem:[#allocation7 + $0x6c] ss:$16 sps:$4 sm:$0xff]  }
 0x457   : > { %3483 = vmatpush2.bf16.msra.mxu1 %v5938_v34  ;;  %v6155_v34 = vpop.eup %6154 }
 0x458   : > { %3484 = vmatprep.subr.bf16.mxu1 %v5943_v28  ;;  %v3640_v39 = vmul.f32 0.5, %v6155_v34 }
 0x45a   : > { %v3646_v54 = vadd.f32 0.5, %v3640_v39  ;;  %v6009_v39 = vld [vmem:[#allocation10 + $0x64] ss:$8 sps:$4 sm:$0xff]  }
 0x45b   : > { %3485 = vmatpush2.bf16.msra.mxu1 %v5941_v36 }
 0x45c   : > { %3486 = vmatprep.subr.bf16.mxu1 %v5946_v37  ;;  %v6157_v37 = vpop.eup %6156 }
 0x45f   : > { %3487 = vmatpush2.bf16.msra.mxu1 %v5944_v40  ;;  %v7043_v40 = vld [vmem:[#allocation7 + $0x4c] ss:$16 sps:$4 sm:$0xff]  }
 0x460   : > { %3488 = vmatprep.subr.bf16.mxu1 %v5949_v41  ;;  %v6159_v41 = vpop.eup %6158 }
 0x461   : > { %v3643_v55 = vmul.f32 0.5, %v6159_v41  ;;  %v6007_v41 = vld [vmem:[#allocation10 + $0x60] ss:$8 sps:$4 sm:$0xff]  }
 0x463   : > { %3489 = vmatpush2.bf16.msra.mxu1 %v5947_v52  ;;  %v3644_v52 = vmul.f32 0.5, %v6157_v37 }
 0x464   : > { %3490 = vmatprep.subr.bf16.mxu1 %v5952_v4 }
 0x465   : > { %v3650_v59 = vadd.f32 0.5, %v3644_v52  ;;  %v6015_v52 = vld [vmem:[#allocation10 + $0x44] ss:$8 sps:$4 sm:$0xff]  }
 0x467   : > { %3491 = vmatpush2.bf16.msra.mxu1 %v5950_v56  ;;  %v7049_v56 = vld [vmem:[#allocation7 + $0x2c] ss:$16 sps:$4 sm:$0xff]   ;;  %v3655_v17 = vmul.f32 0.0, %v3650_v59 }
 0x468   : > { %3492 = vmatprep.subr.bf16.mxu1 %v5955_v9  ;;  %v3654_v9 = vmul.f32 0.0, %v3647_v51  ;;  %v6010_v51 = vld [vmem:[#allocation10 + $0x50] ss:$8 sps:$4 sm:$0xff]   ;;  %v6024_v59 = vld [vmem:[#allocation10 + $0x14] ss:$8 sps:$4 sm:$0xff]  }
 0x46b   : > { %3493 = vmatpush2.bf16.msra.mxu1 %v5953_v62  ;;  %v3649_v62 = vadd.f32 0.5, %v3643_v55  ;;  %v6016_v55 = vld [vmem:[#allocation10 + $0x30] ss:$8 sps:$4 sm:$0xff]  }
 0x46c   : > { %3871 = vmatprep.subr.bf16.mxu1 %v7012_v16 }
 0x46e   : > { %v3152_v26 = vpop.f32.mrf.mxu1  ;;  %3495 = vmatmul.mubr.bf16.vlgmr.msra.gmra.mxu1 %v6864_v11  ;;  %v3201_v11 = vpop.f32.mrf.mxu0 }
 0x46f   : > { %3872 = vmatpush1.bf16.msra.mxu1 %v7014_v20  ;;  %3903 = vmatprep.mubr.bf16.mxu1 %v6530_v0  ;;  %v3196_v28 = vadd.f32 %v3195_v13, %v3152_v26  ;;  %v7057_v13 = vld [vmem:[#allocation7 + $0xc] ss:$16 sps:$4 sm:$0xff]  }
 0x470   : > { %v3154_v30 = vpop.f32.mrf.mxu1  ;;  %3873 = vmatprep.subr.bf16.mxu1 %v7017_v57 }
 0x471   : > { %v3198_v32 = vadd.f32 %v3197_v21, %v3154_v30  ;;  %v3630_v63 = vmul.f32 0.5, %v3196_v28 }
 0x472   : > { %v3156_v3 = vpop.f32.mrf.mxu1 }
 0x473   : > { %3874 = vmatpush1.bf16.msra.mxu1 %v7021_v27  ;;  %6160 = vtanh.f32 %v3198_v32  ;;  %v3200_v36 = vadd.f32 %v3199_v29, %v3156_v3  ;;  %v6006_v29 = vld [vmem:[#allocation10 + $0x74] ss:$8 sps:$4 sm:$0xff]  }
 0x474   : > { %v3158_v7 = vpop.f32.mrf.mxu1  ;;  %3875 = vmatprep.subr.bf16.mxu1 %v7025_v45 }
 0x475   : > { %v3202_v43 = vadd.f32 %v3201_v11, %v3158_v7  ;;  %v3633_v4 = vmul.f32 0.5, %v3200_v36  ;;  %v6004_v36 = vld [vmem:[#allocation10 + $0x70] ss:$8 sps:$4 sm:$0xff]  }
 0x477   : > { %3876 = vmatpush1.bf16.msra.mxu1 %v7028_v48  ;;  %6162 = vtanh.f32 %v3202_v43 }
 0x478   : > { %3877 = vmatprep.subr.bf16.mxu1 %v7031_v8  ;;  %6164 = vtanh.f32 %v3630_v63  ;;  %v6012_v63 = vld [vmem:[#allocation10 + $0x54] ss:$8 sps:$4 sm:$0xff]  }
 0x479   : > { %6166 = vtanh.f32 %v3633_v4  ;;  %v6013_v4 = vld [vmem:[#allocation10 + $0x40] ss:$8 sps:$4 sm:$0xff]  }
 0x47b   : > { %3878 = vmatpush1.bf16.msra.mxu1 %v7034_v33 }
 0x47c   : > { %3879 = vmatprep.subr.bf16.mxu1 %v7037_v47 }
 0x47f   : > { %3880 = vmatpush1.bf16.msra.mxu1 %v7040_v38 }
 0x480   : > { %3881 = vmatprep.subr.bf16.mxu1 %v7043_v40  ;;  %v6161_v58 = vpop.eup %6160 }
 0x481   : > { %v3656_v60 = vmul.f32 %v6161_v58, %v3646_v54  ;;  %v6018_v54 = vld [vmem:[#allocation10 + $0x34] ss:$8 sps:$4 sm:$0xff]   ;;  %v6021_v58 = vld [vmem:[#allocation10 + $0x24] ss:$8 sps:$4 sm:$0xff]  }
 0x483   : > { %3882 = vmatpush1.bf16.msra.mxu1 %v7046_v53  ;;  %v7054_v12 = vadd.f32 %v3656_v60, %v3654_v9  ;;  %v6019_v9 = vld [vmem:[#allocation10 + $0x20] ss:$8 sps:$4 sm:$0xff]   ;;  %v6022_v60 = vld [vmem:[#allocation10 + $0x10] ss:$8 sps:$4 sm:$0xff]  }
 0x484   : > { %3883 = vmatprep.subr.bf16.mxu1 %v7049_v56  ;;  %v6163_v14 = vpop.eup %6162 }
 0x485   : > { %v3657_v21 = vmul.f32 %v6163_v14, %v3649_v62  ;;  %6168 = vtanh.f32 %v7054_v12  ;;  %v6165_v30 = vpop.eup %6164  ;;  %v6027_v62 = vld [vmem:[#allocation10 + $0x4] ss:$8 sps:$4 sm:$0xff]   ;;  %v6025_v14 = vld [vmem:[#allocation10] ss:$8 sps:$4 sm:$0xff]  }
 0x486   : > { %v6167_v32 = vpop.eup %6166  ;;  %v3642_v3 = vmul.f32 0.5, %v6165_v30 }
 0x487   : > { %3884 = vmatpush1.bf16.msra.mxu1 %v7052_v61  ;;  %v7063_v26 = vadd.f32 %v3657_v21, %v3655_v17  ;;  %v3645_v11 = vmul.f32 0.5, %v6167_v32 }
 0x488   : > { %3885 = vmatprep.subr.bf16.mxu1 %v7057_v13  ;;  %v3648_v43 = vadd.f32 0.5, %v3642_v3 }
 0x489   : > { %6170 = vtanh.f32 %v7063_v26  ;;  %v3651_v10 = vadd.f32 0.5, %v3645_v11 }
 0x48b   : > { %3886 = vmatpush1.bf16.msra.mxu1 %v7060_v24 }
 0x48c   : > { %4164 = vmatprep.subr.bf16.mxu1 %v6006_v29 }
 0x492   : > { %v6169_v7 = vpop.eup %6168 }
 0x493   : > { %v3662_v28 = vmul.f32 %v6169_v7, %v3648_v43 }
 0x496   : > { %v6171_v34 = vpop.eup %6170 }
 0x497   : > { %v3663_v35 = vmul.f32 %v6171_v34, %v3651_v10 }
 0x499   : > { %v3667_v37 = vpack.c.bf16 %v3663_v35, %v3662_v28  ;;  %6172 = vtanh.f32 %v3663_v35 }
 0x49a   : > { %6174 = vtanh.f32 %v3662_v28 }
 0x49b   : > { %3861 = vmatmul.mubr.bf16.vlgmr.msra.gmra.mxu0 %v3667_v37  ;;  %3904 = vmatmul.mubr.bf16.vlgmr.msra.gmra.mxu1 %v3667_v37 }
 0x49c   : > { %4165 = vmatpush1.bf16.msra.mxu1 %v6004_v36  ;;  %4196 = vmatprep.mubr.bf16.mxu1 %v6530_v0 }
 0x49d   : > { %4166 = vmatprep.subr.bf16.mxu1 %v6009_v39  ;;  %4073 = vmatprep.mubr.bf16.mxu0 %v6530_v0  ;;  %v6028_v39 = vld [vmem:[#allocation10 + $0xf0] ss:$8 sps:$4 sm:$0xff]  }
 0x4a0   : > { %4167 = vmatpush1.bf16.msra.mxu1 %v6007_v41  ;;  %v6030_v41 = vld [vmem:[#allocation10 + $0xf4] ss:$8 sps:$4 sm:$0xff]  }
 0x4a1   : > { %4168 = vmatprep.subr.bf16.mxu1 %v6012_v63  ;;  %4041 = vmatprep.subr.bf16.mxu0 %v6030_v41  ;;  %v6031_v63 = vld [vmem:[#allocation10 + $0xe0] ss:$8 sps:$4 sm:$0xff]  }
 0x4a2   : > { %4042 = vmatpush1.bf16.msra.mxu0 %v6028_v39 }
 0x4a4   : > { %4169 = vmatpush1.bf16.msra.mxu1 %v6010_v51  ;;  %v6033_v51 = vld [vmem:[#allocation10 + $0xe4] ss:$8 sps:$4 sm:$0xff]  }
 0x4a5   : > { %4170 = vmatprep.subr.bf16.mxu1 %v6015_v52  ;;  %4043 = vmatprep.subr.bf16.mxu0 %v6033_v51  ;;  %v6036_v52 = vld [vmem:[#allocation10 + $0xd4] ss:$8 sps:$4 sm:$0xff]  }
 0x4a6   : > { %v6173_v17 = vpop.eup %6172  ;;  %4044 = vmatpush1.bf16.msra.mxu0 %v6031_v63 }
 0x4a7   : > { %v6175_v21 = vpop.eup %6174  ;;  %4045 = vmatprep.subr.bf16.mxu0 %v6036_v52 }
 0x4a8   : > { %4171 = vmatpush1.bf16.msra.mxu1 %v6013_v4  ;;  %v3666_v29 = vpack.c.bf16 %v6173_v17, %v6175_v21  ;;  %v6034_v4 = vld [vmem:[#allocation10 + $0xd0] ss:$8 sps:$4 sm:$0xff]   ;;  %v6051_v17 = vld [vmem:[#allocation10 + $0x84] ss:$8 sps:$4 sm:$0xff]   ;;  %v6049_v21 = vld [vmem:[#allocation10 + $0x80] ss:$8 sps:$4 sm:$0xff]  }
 0x4a9   : > { %4172 = vmatprep.subr.bf16.mxu1 %v6018_v54  ;;  %v6039_v54 = vld [vmem:[#allocation10 + $0xc4] ss:$8 sps:$4 sm:$0xff]  }
 0x4aa   : > { %4046 = vmatpush1.bf16.msra.mxu0 %v6034_v4 }
 0x4ab   : > { %4047 = vmatprep.subr.bf16.mxu0 %v6039_v54 }
 0x4ac   : > { %4173 = vmatpush1.bf16.msra.mxu1 %v6016_v55  ;;  %v6037_v55 = vld [vmem:[#allocation10 + $0xc0] ss:$8 sps:$4 sm:$0xff]  }
 0x4ad   : > { %4174 = vmatprep.subr.bf16.mxu1 %v6021_v58  ;;  %v6042_v58 = vld [vmem:[#allocation10 + $0xb4] ss:$8 sps:$4 sm:$0xff]  }
 0x4ae   : > { %4048 = vmatpush1.bf16.msra.mxu0 %v6037_v55 }
 0x4af   : > { %4049 = vmatprep.subr.bf16.mxu0 %v6042_v58 }
 0x4b0   : > { %4175 = vmatpush1.bf16.msra.mxu1 %v6019_v9  ;;  %v6040_v9 = vld [vmem:[#allocation10 + $0xb0] ss:$8 sps:$4 sm:$0xff]  }
 0x4b1   : > { %4176 = vmatprep.subr.bf16.mxu1 %v6024_v59  ;;  %v6045_v59 = vld [vmem:[#allocation10 + $0xa4] ss:$8 sps:$4 sm:$0xff]  }
 0x4b2   : > { %4050 = vmatpush1.bf16.msra.mxu0 %v6040_v9 }
 0x4b3   : > { %4051 = vmatprep.subr.bf16.mxu0 %v6045_v59 }
 0x4b4   : > { %4177 = vmatpush1.bf16.msra.mxu1 %v6022_v60  ;;  %v6043_v60 = vld [vmem:[#allocation10 + $0xa0] ss:$8 sps:$4 sm:$0xff]  }
 0x4b5   : > { %4178 = vmatprep.subr.bf16.mxu1 %v6027_v62  ;;  %v6048_v62 = vld [vmem:[#allocation10 + $0x94] ss:$8 sps:$4 sm:$0xff]  }
 0x4b6   : > { %4052 = vmatpush1.bf16.msra.mxu0 %v6043_v60 }
 0x4b7   : > { %4053 = vmatprep.subr.bf16.mxu0 %v6048_v62 }
 0x4b8   : > { %4179 = vmatpush1.bf16.msra.mxu1 %v6025_v14  ;;  %v6046_v14 = vld [vmem:[#allocation10 + $0x90] ss:$8 sps:$4 sm:$0xff]  }
 0x4b9   : > { %4251 = vmatprep.subr.bf16.mxu1 %v7012_v16  ;;  %v7080_v16 = vpop.f32.mrf.mxu0 }
 0x4ba   : > { %4054 = vmatpush1.bf16.msra.mxu0 %v6046_v14 }
 0x4bb   : > { %4197 = vmatmul.mubr.bf16.vlgmr.msra.gmra.mxu1 %v3666_v29  ;;  %4055 = vmatprep.subr.bf16.mxu0 %v6051_v17 }
 0x4bc   : > { %4252 = vmatpush1.bf16.msra.mxu1 %v7014_v20  ;;  %4283 = vmatprep.mubr.bf16.mxu1 %v6530_v0  ;;  %v7084_v20 = vpop.f32.mrf.mxu0 }
 0x4bd   : > { %4253 = vmatprep.subr.bf16.mxu1 %v7017_v57  ;;  %v7087_v57 = vpop.f32.mrf.mxu1 }
 0x4be   : > { %4056 = vmatpush1.bf16.msra.mxu0 %v6049_v21  ;;  %v3282_v51 = vadd.f32 %v7087_v57, %v7080_v16 }
 0x4bf   : > { %4208 = vmatprep.subr.bf16.mxu0 %v6960_v15 }
 0x4c0   : > { %4254 = vmatpush1.bf16.msra.mxu1 %v7021_v27  ;;  %v7090_v27 = vpop.f32.mrf.mxu0 }
 0x4c1   : > { %4255 = vmatprep.subr.bf16.mxu1 %v7025_v45  ;;  %v7093_v45 = vpop.f32.mrf.mxu1 }
 0x4c2   : > { %v3284_v4 = vadd.f32 %v7093_v45, %v7084_v20 }
 0x4c4   : > { %4256 = vmatpush1.bf16.msra.mxu1 %v7028_v48  ;;  %v7096_v48 = vpop.f32.mrf.mxu0 }
 0x4c5   : > { %4257 = vmatprep.subr.bf16.mxu1 %v7031_v8 }
 0x4c6   : > { %v7099_v8 = vpop.f32.mrf.mxu0 }
 0x4c8   : > { %4258 = vmatpush1.bf16.msra.mxu1 %v7034_v33  ;;  %v7101_v33 = vpop.f32.mrf.mxu1 }
 0x4c9   : > { %4259 = vmatprep.subr.bf16.mxu1 %v7037_v47  ;;  %v7103_v47 = vpop.f32.mrf.mxu0  ;;  %v3286_v9 = vadd.f32 %v7101_v33, %v7090_v27 }
 0x4cc   : > { %4260 = vmatpush1.bf16.msra.mxu1 %v7040_v38  ;;  %v7105_v38 = vpop.f32.mrf.mxu1 }
 0x4cd   : > { %4261 = vmatprep.subr.bf16.mxu1 %v7043_v40  ;;  %v3288_v16 = vadd.f32 %v7105_v38, %v7096_v48 }
 0x4ce   : > { %v7107_v40 = vpop.f32.mrf.mxu1 }
 0x4cf   : > { %v3368_v48 = vadd.f32 %v7099_v8, %v7107_v40 }
 0x4d0   : > { %4262 = vmatpush1.bf16.msra.mxu1 %v7046_v53  ;;  %v7109_v53 = vpop.f32.mrf.mxu0 }
 0x4d1   : > { %4263 = vmatprep.subr.bf16.mxu1 %v7049_v56  ;;  %v7111_v56 = vpop.f32.mrf.mxu1 }
 0x4d2   : > { %v3370_v62 = vadd.f32 %v7103_v47, %v7111_v56 }
 0x4d3   : > { %v7115_v30 = vpop.f32.mrf.mxu1 }
 0x4d4   : > { %4264 = vmatpush1.bf16.msra.mxu1 %v7052_v61  ;;  %v7113_v61 = vpop.f32.mrf.mxu0  ;;  %v3372_v38 = vadd.f32 %v7109_v53, %v7115_v30 }
 0x4d5   : > { %4265 = vmatprep.subr.bf16.mxu1 %v7057_v13  ;;  %v7117_v32 = vpop.f32.mrf.mxu1 }
 0x4d6   : > { %v3410_v13 = vpop.f32.mrf.mxu0  ;;  %v3374_v27 = vadd.f32 %v7113_v61, %v7117_v32 }
 0x4d8   : > { %4266 = vmatpush1.bf16.msra.mxu1 %v7060_v24  ;;  %v3412_v24 = vpop.f32.mrf.mxu0 }
 0x4da   : > { %v3414_v7 = vpop.f32.mrf.mxu0 }
 0x4dc   : > { %v3416_v35 = vpop.f32.mrf.mxu0 }
 0x4ee   : > { %v3453_v3 = vpop.f32.mrf.mxu1 }
 0x4ef   : > { %v7119_v11 = vadd.f32 %v3453_v3, %v3410_v13  ;;  %v3539_v29 = vpop.f32.mrf.mxu0 }
 0x4f0   : > { %v3455_v43 = vpop.f32.mrf.mxu1 }
 0x4f1   : > { %v7121_v10 = vadd.f32 %v3455_v43, %v3412_v24  ;;  %v3541_v13 = vpop.f32.mrf.mxu0 }
 0x4f2   : > { %v3457_v34 = vpop.f32.mrf.mxu1 }
 0x4f3   : > { %v7123_v28 = vadd.f32 %v3457_v34, %v3414_v7  ;;  %v3543_v7 = vpop.f32.mrf.mxu0 }
 0x4f4   : > { %v3459_v36 = vpop.f32.mrf.mxu1 }
 0x4f5   : > { %v7125_v37 = vadd.f32 %v3459_v36, %v3416_v35  ;;  %v3545_v39 = vpop.f32.mrf.mxu0 }
 0x52e   : > { %v3496_v24 = vpop.f32.mrf.mxu1 }
 0x52f   : > { %v7128_v3 = vadd.f32 %v3539_v29, %v3496_v24 }
 0x530   : > { %v3498_v43 = vpop.f32.mrf.mxu1 }
 0x531   : > { %v7130_v34 = vadd.f32 %v3541_v13, %v3498_v43 }
 0x532   : > { %v3500_v35 = vpop.f32.mrf.mxu1 }
 0x533   : > { %v7132_v36 = vadd.f32 %v3543_v7, %v3500_v35 }
 0x534   : > { %v3502_v41 = vpop.f32.mrf.mxu1 }
 0x535   : > { %v7134_v63 = vadd.f32 %v3545_v39, %v3502_v41 }
 0x55b   : > { %v3862_v15 = vpop.f32.mrf.mxu0  ;;  %v3905_v52 = vpop.f32.mrf.mxu1 }
 0x55c   : > { %v3914_v54 = vadd.f32 %v3862_v15, %v3282_v51  ;;  %v3916_v56 = vadd.f32 %v3905_v52, %v3368_v48  ;;  %v6076_v48 = vld [vmem:[#allocation13 + $0x78] sm:$0xff]  }
 0x55d   : > { %v3864_v55 = vpop.f32.mrf.mxu0  ;;  %v3907_v58 = vpop.f32.mrf.mxu1  ;;  %5304 = vmatprep.subr.bf16.mxu1 %v6076_v48 }
 0x55e   : > { %v3922_v59 = vmul.f32 0.5, %v3914_v54  ;;  %v3915_v60 = vadd.f32 %v3864_v55, %v3284_v4  ;;  %v3917_v20 = vadd.f32 %v3907_v58, %v3370_v62  ;;  %v3924_v35 = vmul.f32 0.5, %v3916_v56  ;;  %v6078_v56 = vld [vmem:[#allocation13 + $0x70] sm:$0xff]  }
 0x55f   : > { %v3866_v14 = vpop.f32.mrf.mxu0  ;;  %v3909_v17 = vpop.f32.mrf.mxu1 }
 0x560   : > { %6176 = vtanh.f32 %v3922_v59  ;;  %v3923_v57 = vmul.f32 0.5, %v3915_v60  ;;  %v3918_v21 = vadd.f32 %v3866_v14, %v3286_v9  ;;  %v3920_v7 = vadd.f32 %v3909_v17, %v3372_v38  ;;  %v6077_v38 = vld [vmem:[#allocation13 + $0x38] sm:$0xff]  }
 0x561   : > { %v3868_v45 = vpop.f32.mrf.mxu0  ;;  %v3911_v24 = vpop.f32.mrf.mxu1 }
 0x562   : > { %6178 = vtanh.f32 %v3923_v57  ;;  %v3925_v29 = vmul.f32 0.5, %v3918_v21  ;;  %v3919_v13 = vadd.f32 %v3868_v45, %v3288_v16  ;;  %v3921_v47 = vadd.f32 %v3911_v24, %v3374_v27 }
 0x563   : > { %v3927_v51 = vmul.f32 0.5, %v3920_v7  ;;  %v6079_v7 = vld [vmem:[#allocation13 + $0x30] sm:$0xff]  }
 0x564   : > { %6180 = vtanh.f32 %v3925_v29  ;;  %v3926_v33 = vmul.f32 0.5, %v3919_v13 }
 0x565   : > { %6182 = vtanh.f32 %v3917_v20 }
 0x566   : > { %6184 = vtanh.f32 %v3926_v33 }
 0x567   : > { %6186 = vtanh.f32 %v3921_v47 }
 0x568   : > { %6188 = vtanh.f32 %v3924_v35  ;;  %v6081_v35 = vld [vmem:[#allocation13 + $0x28] sm:$0xff]  }
 0x569   : > { %6190 = vtanh.f32 %v3927_v51 }
 0x56d   : > { %v6177_v43 = vpop.eup %6176 }
 0x56e   : > { %v3934_v39 = vmul.f32 0.5, %v6177_v43  ;;  %v6080_v43 = vld [vmem:[#allocation13 + $0x68] sm:$0xff]  }
 0x56f   : > { %v6179_v41 = vpop.eup %6178 }
 0x570   : > { %v3940_v61 = vadd.f32 0.5, %v3934_v39  ;;  %v3935_v32 = vmul.f32 0.5, %v6179_v41  ;;  %v6082_v39 = vld [vmem:[#allocation13 + $0x60] sm:$0xff]  }
 0x571   : > { %v6181_v15 = vpop.eup %6180  ;;  %v6083_v41 = vld [vmem:[#allocation13 + $0x20] sm:$0xff]  }
 0x572   : > { %v6183_v4 = vpop.eup %6182  ;;  %v3941_v54 = vadd.f32 0.5, %v3935_v32  ;;  %v3937_v55 = vmul.f32 0.5, %v6181_v15 }
 0x573   : > { %v6185_v58 = vpop.eup %6184  ;;  %v3950_v40 = vmul.f32 %v6183_v4, %v3940_v61 }
 0x574   : > { %v3948_v8 = vmul.f32 %v3941_v54, %v7054_v12  ;;  %v3943_v53 = vadd.f32 0.5, %v3937_v55  ;;  %v3938_v30 = vmul.f32 0.5, %v6185_v58  ;;  %v6187_v59 = vpop.eup %6186 }
 0x575   : > { %v6189_v17 = vpop.eup %6188 }
 0x576   : > { %v7153_v52 = vadd.f32 %v3950_v40, %v3948_v8  ;;  %v3944_v9 = vadd.f32 0.5, %v3938_v30  ;;  %v3951_v62 = vmul.f32 %v6187_v59, %v3943_v53  ;;  %v6191_v16 = vpop.eup %6190  ;;  %v3936_v57 = vmul.f32 0.5, %v6189_v17 }
 0x577   : > { %v3939_v12 = vmul.f32 0.5, %v6191_v16 }
 0x578   : > { %6192 = vtanh.f32 %v7153_v52  ;;  %v3949_v60 = vmul.f32 %v3944_v9, %v7063_v26  ;;  %v3942_v20 = vadd.f32 0.5, %v3936_v57 }
 0x579   : > { %v3945_v29 = vadd.f32 0.5, %v3939_v12 }
 0x57a   : > { %v7157_v14 = vadd.f32 %v3951_v62, %v3949_v60 }
 0x57b   : > { %v7177_v51 = vpop.f32.mrf.mxu1 }
 0x57c   : > { %6194 = vtanh.f32 %v7157_v14 }
 0x57d   : > { %v7179_v61 = vpop.f32.mrf.mxu1 }
 0x57f   : > { %v7183_v15 = vpop.f32.mrf.mxu1 }
 0x581   : > { %v4204_v55 = vpop.f32.mrf.mxu1 }
 0x585   : > { %v6193_v21 = vpop.eup %6192 }
 0x586   : > { %v3956_v45 = vmul.f32 %v6193_v21, %v3942_v20 }
 0x588   : > { %6196 = vtanh.f32 %v3956_v45 }
 0x589   : > { %v6195_v13 = vpop.eup %6194 }
 0x58a   : > { %v3957_v24 = vmul.f32 %v6195_v13, %v3945_v29 }
 0x58c   : > { %6198 = vtanh.f32 %v3957_v24  ;;  %v4207_v27 = vpack.c.bf16 %v3957_v24, %v3956_v45 }
 0x58e   : > { %4284 = vmatmul.mubr.bf16.vlgmr.msra.gmra.mxu1 %v4207_v27 }
 0x58f   : > { %5305 = vmatpush3.bf16.msra.mxu1 %v6077_v38 }
 0x590   : > { %5306 = vmatprep.subr.bf16.mxu1 %v6078_v56 }
 0x593   : > { %5307 = vmatpush3.bf16.msra.mxu1 %v6079_v7 }
 0x594   : > { %5308 = vmatprep.subr.bf16.mxu1 %v6080_v43 }
 0x595   : > { %v6197_v26 = vpop.eup %6196 }
 0x597   : > { %5309 = vmatpush3.bf16.msra.mxu1 %v6081_v35 }
 0x598   : > { %5310 = vmatprep.subr.bf16.mxu1 %v6082_v39 }
 0x599   : > { %v6199_v33 = vpop.eup %6198 }
 0x59a   : > { %v3960_v47 = vpack.c.bf16 %v6199_v33, %v6197_v26 }
 0x59b   : > { %5311 = vmatpush3.bf16.msra.mxu1 %v6083_v41 }
 0x59c   : > { %4074 = vmatmul.mubr.bf16.vlgmr.msra.gmra.mxu0 %v3960_v47 }
 0x59d   : > { %4209 = vmatpush1.bf16.msra.mxu0 %v6962_v18  ;;  %4240 = vmatprep.mubr.bf16.mxu0 %v6530_v0  ;;  %v6052_v18 = vld [vmem:[#allocation10 + $0x170] ss:$8 sps:$4 sm:$0xff]  }
 0x59e   : > { %4210 = vmatprep.subr.bf16.mxu0 %v6966_v19  ;;  %v6054_v19 = vld [vmem:[#allocation10 + $0x174] ss:$8 sps:$4 sm:$0xff]  }
 0x5a1   : > { %4211 = vmatpush1.bf16.msra.mxu0 %v6971_v22  ;;  %v6057_v22 = vld [vmem:[#allocation10 + $0x164] ss:$8 sps:$4 sm:$0xff]  }
 0x5a2   : > { %4212 = vmatprep.subr.bf16.mxu0 %v6975_v23  ;;  %v6055_v23 = vld [vmem:[#allocation10 + $0x160] ss:$8 sps:$4 sm:$0xff]  }
 0x5a5   : > { %4213 = vmatpush1.bf16.msra.mxu0 %v6978_v25  ;;  %v6060_v25 = vld [vmem:[#allocation10 + $0x154] ss:$8 sps:$4 sm:$0xff]  }
 0x5a6   : > { %4214 = vmatprep.subr.bf16.mxu0 %v6981_v50  ;;  %v6058_v50 = vld [vmem:[#allocation10 + $0x150] ss:$8 sps:$4 sm:$0xff]  }
 0x5a9   : > { %4215 = vmatpush1.bf16.msra.mxu0 %v6984_v42  ;;  %v6063_v42 = vld [vmem:[#allocation10 + $0x144] ss:$8 sps:$4 sm:$0xff]  }
 0x5aa   : > { %4216 = vmatprep.subr.bf16.mxu0 %v6987_v44  ;;  %v6061_v44 = vld [vmem:[#allocation10 + $0x140] ss:$8 sps:$4 sm:$0xff]  }
 0x5ad   : > { %4217 = vmatpush1.bf16.msra.mxu0 %v6990_v46  ;;  %v6066_v46 = vld [vmem:[#allocation10 + $0x134] ss:$8 sps:$4 sm:$0xff]  }
 0x5ae   : > { %4218 = vmatprep.subr.bf16.mxu0 %v6993_v31  ;;  %v6064_v31 = vld [vmem:[#allocation10 + $0x130] ss:$8 sps:$4 sm:$0xff]  }
 0x5b1   : > { %4219 = vmatpush1.bf16.msra.mxu0 %v6996_v1  ;;  %v6067_v1 = vld [vmem:[#allocation10 + $0x120] ss:$8 sps:$4 sm:$0xff]  }
 0x5b2   : > { %4220 = vmatprep.subr.bf16.mxu0 %v6999_v2  ;;  %v6072_v2 = vld [vmem:[#allocation10 + $0x114] ss:$8 sps:$4 sm:$0xff]  }
 0x5b5   : > { %4221 = vmatpush1.bf16.msra.mxu0 %v7002_v5  ;;  %v6070_v5 = vld [vmem:[#allocation10 + $0x110] ss:$8 sps:$4 sm:$0xff]  }
 0x5b6   : > { %4222 = vmatprep.subr.bf16.mxu0 %v7005_v6  ;;  %v6075_v6 = vld [vmem:[#allocation10 + $0x104] ss:$8 sps:$4 sm:$0xff]  }
 0x5b9   : > { %4223 = vmatpush1.bf16.msra.mxu0 %v7008_v49  ;;  %v6073_v49 = vld [vmem:[#allocation10 + $0x100] ss:$8 sps:$4 sm:$0xff]  }
 0x5ba   : > { %4421 = vmatprep.subr.bf16.mxu0 %v6054_v19 }
 0x5bc   : > { %4241 = vmatmul.mubr.bf16.vlgmr.msra.gmra.mxu0 %v4207_v27 }
 0x5bd   : > { %4453 = vmatprep.mubr.bf16.mxu0 %v6530_v0  ;;  %4422 = vmatpush1.bf16.msra.mxu0 %v6052_v18  ;;  %v6069_v0 = vld [vmem:[#allocation10 + $0x124] ss:$8 sps:$4 sm:$0xff]  }
 0x5be   : > { %4423 = vmatprep.subr.bf16.mxu0 %v6057_v22 }
 0x5c1   : > { %4424 = vmatpush1.bf16.msra.mxu0 %v6055_v23 }
 0x5c2   : > { %4425 = vmatprep.subr.bf16.mxu0 %v6060_v25 }
 0x5c5   : > { %4426 = vmatpush1.bf16.msra.mxu0 %v6058_v50 }
 0x5c6   : > { %4427 = vmatprep.subr.bf16.mxu0 %v6063_v42 }
 0x5c9   : > { %4428 = vmatpush1.bf16.msra.mxu0 %v6061_v44 }
 0x5ca   : > { %4429 = vmatprep.subr.bf16.mxu0 %v6066_v46 }
 0x5cd   : > { %4430 = vmatpush1.bf16.msra.mxu0 %v6064_v31 }
 0x5ce   : > { %4431 = vmatprep.subr.bf16.mxu0 %v6069_v0 }
 0x5d1   : > { %4432 = vmatpush1.bf16.msra.mxu0 %v6067_v1 }
 0x5d2   : > { %4433 = vmatprep.subr.bf16.mxu0 %v6072_v2 }
 0x5d5   : > { %4434 = vmatpush1.bf16.msra.mxu0 %v6070_v5 }
 0x5d6   : > { %4435 = vmatprep.subr.bf16.mxu0 %v6075_v6 }
 0x5d9   : > { %4436 = vmatpush1.bf16.msra.mxu0 %v6073_v49 }
 0x64e   : > { %v4285_v40 = vpop.f32.mrf.mxu1 }
 0x650   : > { %v4287_v53 = vpop.f32.mrf.mxu1 }
 0x651   : > { %v4297_v16 = vadd.f32 %v4287_v53, %v7130_v34  ;;  %v6087_v53 = vld [vmem:[#allocation13 + $0x10] sm:$0xff]  }
 0x652   : > { %v4289_v59 = vpop.f32.mrf.mxu1 }
 0x653   : > { %v4300_v27 = vadd.f32 %v4289_v59, %v7132_v36  ;;  %v6090_v59 = vld [vmem:[#allocation13 + $0x40] sm:$0xff]  }
 0x654   : > { %v4291_v20 = vpop.f32.mrf.mxu1 }
 0x655   : > { %v4307_v18 = vmul.f32 0.5, %v4300_v27 }
 0x65c   : > { %v7181_v32 = vpop.f32.mrf.mxu0 }
 0x65e   : > { %v7185_v4 = vpop.f32.mrf.mxu0 }
 0x660   : > { %v7187_v54 = vpop.f32.mrf.mxu0 }
 0x662   : > { %v4081_v58 = vpop.f32.mrf.mxu0 }
 0x663   : > { %v7189_v8 = vadd.f32 %v4204_v55, %v4081_v58  ;;  %v6084_v58 = vld [vmem:[#allocation13 + $0x58] sm:$0xff]  }
 0x664   : > { %5312 = vmatprep.subr.bf16.mxu1 %v6084_v58 }
 0x67c   : > { %v4242_v30 = vpop.f32.mrf.mxu0 }
 0x67d   : > { %v4294_v9 = vadd.f32 %v4242_v30, %v7119_v11  ;;  %v4301_v11 = vadd.f32 %v4291_v20, %v7134_v63  ;;  %v6088_v30 = vld [vmem:[#allocation13 + $0x48] sm:$0xff]  }
 0x67e   : > { %v4244_v60 = vpop.f32.mrf.mxu0 }
 0x67f   : > { %v4302_v62 = vmul.f32 0.5, %v4294_v9  ;;  %v4295_v17 = vadd.f32 %v4244_v60, %v7121_v10  ;;  %v4296_v10 = vadd.f32 %v4285_v40, %v7128_v3  ;;  %v6086_v40 = vld [vmem:[#allocation13 + $0x50] sm:$0xff]   ;;  %v6089_v9 = vld [vmem:[#allocation13 + $0x8] sm:$0xff]   ;;  %v6091_v60 = vld [vmem:[#allocation13] sm:$0xff]  }
 0x680   : > { %v4246_v57 = vpop.f32.mrf.mxu0 }
 0x681   : > { %6200 = vtanh.f32 %v4302_v62  ;;  %v4303_v12 = vmul.f32 0.5, %v4295_v17  ;;  %v4298_v21 = vadd.f32 %v4246_v57, %v7123_v28  ;;  %v4304_v34 = vmul.f32 0.5, %v4296_v10  ;;  %v4468_v57 = vld [vmem:[#allocation11] sm:$0x3] }
 0x682   : > { %v4248_v45 = vpop.f32.mrf.mxu0  ;;  %v4470_v62 = vlaneseq }
 0x683   : > { %6202 = vtanh.f32 %v4303_v12  ;;  %v4305_v29 = vmul.f32 0.5, %v4298_v21  ;;  %v4299_v13 = vadd.f32 %v4248_v45, %v7125_v37  ;;  %v4199_v12 = vadd.f32 %v7177_v51, %v7181_v32 }
 0x684   : > { %6204 = vtanh.f32 %v4297_v16  ;;  %v4471_v17 = vshrl.u32 %v4470_v62, 7  ;;  %v4201_v45 = vadd.f32 %v7179_v61, %v7185_v4 }
 0x685   : > { %6206 = vtanh.f32 %v4305_v29  ;;  %v4306_v24 = vmul.f32 0.5, %v4299_v13 }
 0x686   : > { %v4472_v16 = vsub.s32 0, %v4471_v17  ;;  %v4476_v21 = vsub.s32 1, %v4471_v17 }
 0x687   : > { %6208 = vtanh.f32 %v4306_v24  ;;  %v4203_v24 = vadd.f32 %v7183_v15, %v7187_v54 }
 0x688   : > { %6210 = vtanh.f32 %v4301_v11  ;;  %v4473_v13 = vrot.slane %v4468_v57, %v4472_v16 }
 0x689   : > { %6212 = vtanh.f32 %v4304_v34  ;;  %v4477_v34 = vrot.slane %v4468_v57, %v4476_v21 }
 0x68a   : > { %6214 = vtanh.f32 %v4307_v18 }
 0x68e   : > { %v6201_v26 = vpop.eup %6200 }
 0x68f   : > { %v4314_v28 = vmul.f32 0.5, %v6201_v26 }
 0x690   : > { %v6203_v33 = vpop.eup %6202 }
 0x691   : > { %v6205_v47 = vpop.eup %6204  ;;  %v4320_v19 = vadd.f32 0.5, %v4314_v28  ;;  %v4315_v37 = vmul.f32 0.5, %v6203_v33 }
 0x692   : > { %v6207_v22 = vpop.eup %6206 }
 0x693   : > { %v4330_v23 = vmul.f32 %v6205_v47, %v4320_v19  ;;  %v4321_v63 = vadd.f32 0.5, %v4315_v37  ;;  %v4317_v25 = vmul.f32 0.5, %v6207_v22 }
 0x694   : > { %v6209_v50 = vpop.eup %6208 }
 0x695   : > { %v4328_v3 = vmul.f32 %v4321_v63, %v7153_v52  ;;  %v4323_v42 = vadd.f32 0.5, %v4317_v25  ;;  %v4318_v44 = vmul.f32 0.5, %v6209_v50  ;;  %v6211_v46 = vpop.eup %6210  ;;  %v5272_v50 = vld [vmem:[#allocation14] ss:$0 sm:$0xff] }
 0x696   : > { %v6213_v5 = vpop.eup %6212 }
 0x697   : > { %v4332_v36 = vadd.f32 %v4330_v23, %v4328_v3  ;;  %v4331_v31 = vmul.f32 %v6211_v46, %v4323_v42  ;;  %v4324_v0 = vadd.f32 0.5, %v4318_v44  ;;  %v4316_v6 = vmul.f32 0.5, %v6213_v5  ;;  %v6215_v49 = vpop.eup %6214 }
 0x698   : > { %v4319_v38 = vmul.f32 0.5, %v6215_v49 }
 0x699   : > { %6216 = vtanh.f32 %v4332_v36  ;;  %v4329_v1 = vmul.f32 %v4324_v0, %v7157_v14  ;;  %v4322_v48 = vadd.f32 0.5, %v4316_v6  ;;  %v6085_v14 = vld [vmem:[#allocation13 + $0x18] sm:$0xff]  }
 0x69a   : > { %v4325_v43 = vadd.f32 0.5, %v4319_v38  ;;  %5313 = vmatpush3.bf16.msra.mxu1 %v6085_v14 }
 0x69b   : > { %v4333_v2 = vadd.f32 %v4331_v31, %v4329_v1  ;;  %5314 = vmatprep.subr.bf16.mxu1 %v6086_v40 }
 0x69d   : > { %6218 = vtanh.f32 %v4333_v2 }
 0x69e   : > { %5315 = vmatpush3.bf16.msra.mxu1 %v6087_v53 }
 0x69f   : > { %5316 = vmatprep.subr.bf16.mxu1 %v6088_v30 }
 0x6a2   : > { %5317 = vmatpush3.bf16.msra.mxu1 %v6089_v9 }
 0x6a3   : > { %5318 = vmatprep.subr.bf16.mxu1 %v6090_v59 }
 0x6a6   : > { %v6217_v56 = vpop.eup %6216  ;;  %5319 = vmatpush3.bf16.msra.mxu1 %v6091_v60 }
 0x6a7   : > { %v4336_v7 = vmul.f32 %v6217_v56, %v4322_v48 }
 0x6a9   : > { %6220 = vtanh.f32 %v4336_v7 }
 0x6aa   : > { %v6219_v52 = vpop.eup %6218 }
 0x6ab   : > { %v4337_v35 = vmul.f32 %v6219_v52, %v4325_v43 }
 0x6ad   : > { %6222 = vtanh.f32 %v4337_v35 }
 0x6b6   : > { %v6221_v39 = vpop.eup %6220 }
 0x6ba   : > { %v6223_v41 = vpop.eup %6222 }
 0x6bb   : > { %v4340_v55 = vpack.c.bf16 %v6223_v41, %v6221_v39 }
 0x6bd   : > { %4454 = vmatmul.mubr.bf16.vlgmr.msra.gmra.mxu0 %v4340_v55 }
 0x77d   : > { %v4455_v20 = vpop.f32.mrf.mxu0 }
 0x77e   : > { %v4464_v29 = vadd.f32 %v4455_v20, %v4199_v12 }
 0x77f   : > { %v4457_v11 = vpop.f32.mrf.mxu0 }
 0x780   : > { %v4465_v10 = vadd.f32 %v4457_v11, %v4201_v45  ;;  %v4480_v26 = vadd.f32 %v4473_v13, %v4464_v29 }
 0x781   : > { %v4459_v27 = vpop.f32.mrf.mxu0 }
 0x782   : > { %v4466_v28 = vadd.f32 %v4459_v27, %v4203_v24  ;;  %v4481_v47 = vadd.f32 %v4477_v34, %v4465_v10  ;;  %v4484_v18 = vmax.f32 %v4480_v26, 0.0 }
 0x783   : > { %v4461_v33 = vpop.f32.mrf.mxu0 }
 0x784   : > { %v4482_v51 = vadd.f32 %v4473_v13, %v4466_v28  ;;  %v4467_v32 = vadd.f32 %v4461_v33, %v7189_v8  ;;  %v4485_v4 = vmax.f32 %v4481_v47, 0.0 }
 0x786   : > { %v4486_v19 = vmax.f32 %v4482_v51, 0.0  ;;  %v4483_v61 = vadd.f32 %v4477_v34, %v4467_v32 }
 0x788   : > { %v4488_v37 = vpack.c.bf16 %v4486_v19, %v4484_v18  ;;  %v4487_v22 = vmax.f32 %v4483_v61, 0.0 }
 0x78a   : > { %v4489_v23 = vpack.c.bf16 %v4487_v22, %v4485_v4 }
 0x78c   : > { %4657 = vmatprep.mubr.bf16.mxu1 %v4489_v23 }
 0x78d   : > { %4658 = vmatmul.mubr.bf16.vlgmr.msra.gmra.mxu1 %v4488_v37 }
 0x84d   : > { %v5320_v15 = vpop.f32.mrf.mxu1 }
 0x84f   : > { %v5321_v54 = vpop.f32.mrf.mxu1 }
 0x850   : > { %v5322_v25 = vadd.f32 %v5321_v54, %v5320_v15 }
 0x851   : > { %v5323_v63 = vpop.f32.mrf.mxu1 }
 0x852   : > { %v4660_v42 = vadd.f32 %v5322_v25, %v5272_v50 }
 0x853   : > { %v5324_v3 = vpop.f32.mrf.mxu1 }
 0x854   : > { %v5325_v8 = vadd.f32 %v5324_v3, %v5323_v63 }
 0x856   : > { %v4663_v44 = vadd.f32 %v5325_v8, %v5272_v50 }
 0x858   : > { %v5302_v46 = vpack.c.bf16 %v4663_v44, %v4660_v42 }
 0x85a   : > { %5303 = vst [vmem:[%s439_s25] sm:$0xff] %v5302_v46  }
 0x85b   : > { %6445 = shalt.err (!%p6442_p12)
}
 0x85c   : > { %s6446_s22 = scalar_lea.hbm %s7213_s14, 128  ;;  %s6450_s26 = scalar_lea.hbm %s7266_s9, 256 }
 0x85d   : > { %p6447_p10 = scmp.ne.s32.totalorder %s7213_s14, %s6446_s22  ;;  %p6451_p2 = scmp.lt.s32.totalorder %s7213_s14, %s7266_s9 }
 0x85e   : > { %p6452_p3 = scmp.lt.s32.totalorder %s6450_s26, %s6446_s22 }
 0x85f   : > { %p6448_p11 = pnand %p6447_p10, %p6623_p5 }
 0x860   : > { %p6453_p9 = por %p6452_p3, %p6451_p2 }
 0x861   : > { %p6449_p0 = pneg %p6448_p11 }
 0x863   : > { %p6454_p4 = pnand %p6453_p9, %p6449_p0 }
 0x865   : > { %6457 = shalt.err (!%p6454_p4)
}
 0x866   : > { %s6533_s18 = smov 64   ;;  %s6534_s29 = smov 4  }
 0x867   : > { %5358 = dma.vmem_to_hbm [thread:$0]  (%p6623_p5), %s7215_s17, 128, %s7213_s14, %s7217_s23, %s6533_s18, %s6533_s18, %s6534_s29  }
 0x868 PF: > { %p5405_p13 = scmp.ge.s32.totalorder %s6512_s12, 2  ;;  %s4705_s21 = sand.u32 1, %s6500_s30  }
 0x869   : > { %s4706_s13 = scalar_lea.sflag [#allocation4], %s4705_s21 }
 0x86a   : > { %p5386_p7 = pnand %p5405_p13, %p6627_p6 }
 0x86c   : > { %p5387_p8 = pneg %p5386_p7 }
 0x86e   : > { %6495 = dma.done.wait (%p5387_p8), %s4706_s13, 128  }
 0x86f   : > { %6497 = vsyncadd (%p5387_p8), %s4706_s13, 4294967168  ;;  %s7290_s24 = sld [smem:[#allocation23_spill]]  ;;  %p24_p1 = scmp.ge.s32.totalorder %s6610_s15, 4  }
 0x870   : > { %s7291_s11 = sld [smem:[#allocation24_spill]]  ;;  %s7292_s30 = smov %s6504_s10 }
 0x871   : > { %s7294_s12 = smov %s6610_s15  ;;  %26 = sbr.rel (!%p24_p1) target bundleno = 8 (0x8), region = 124 }
 0x875   : > { %s7293_s10 = smov %s7290_s24 }
 0x876   :  { %4711 = vsyncpa [#allocation3], 1 }
 0x877   :  { %4713 = vsyncpa [#allocation3 + $0x1], 1 }
 0x878   :  { %4714 = vsyncpa [#allocation6], 1 }
 0x879   :  { %4715 = vsyncpa [#allocation9], 1 }
 0x87a   :  { %4716 = vsyncpa [#allocation12], 1 }
 0x87b   :  { %4717 = vsyncpa [#allocation15], 1 }
 0x87c   :  { %4718 = vsyncpa [#allocation4], 1 }
 0x87d   :  { %4720 = vsyncpa [#allocation4 + $0x1], 1 }

</bundles_post_ra>
